<compile_context>
chip_gen: v5e
topology: v5e:2x2
jax: 0.10.0
libtpu: 0.0.40
codegen_flags: <defaults>
</compile_context>

<pallas_src>
import functools

import jax
import jax.numpy as jnp
from jax.experimental import pallas as pl
from jax.experimental.pallas import tpu as pltpu


# Layer sizes from the PyTorch module: 8 -> 256 -> 512 -> 256 -> 128 -> 128 -> 4
LAYER_SIZES = [8, 256, 512, 256, 128, 128, 4]
N_ACTIONS = LAYER_SIZES[-1]
OUT_PAD = 128          # lane-dense padded logits width (>= N_ACTIONS, multiple of 128)
NEG_BIG = -1.0e30      # effectively -inf bias for the padded logit columns


def actor_kernel(x_ref,
                 w1_ref, b1_ref,
                 w2_ref, b2_ref,
                 w3_ref, b3_ref,
                 w4_ref, b4_ref,
                 w5_ref, b5_ref,
                 w6_ref, b6_ref,
                 out_ref):
    """Fused 6-layer MLP + softmax on one (TB, 8) batch tile."""
    ws = (w1_ref[...], w2_ref[...], w3_ref[...], w4_ref[...], w5_ref[...], w6_ref[...])
    bs = (b1_ref[...], b2_ref[...], b3_ref[...], b4_ref[...], b5_ref[...], b6_ref[...])

    h = x_ref[...]                                              # (TB, 8) bf16
    for li in range(5):                                         # fc1..fc5 + ReLU
        y = jnp.dot(h, ws[li], preferred_element_type=jnp.float32) + bs[li]
        h = jnp.maximum(y, 0.0).astype(jnp.bfloat16)

    # fc6 (lane-padded to OUT_PAD cols; padded cols get bias -1e30 -> exp == 0)
    logits = jnp.dot(h, ws[5], preferred_element_type=jnp.float32) + bs[5]

    # Numerically stable softmax over the feature axis (pads don't affect max).
    m = jnp.max(logits, axis=-1, keepdims=True)
    e = jnp.exp(logits - m)
    denom = jnp.sum(e, axis=-1, keepdims=True)
    out_ref[...] = e * pl.reciprocal(denom, approx=True)


def _prepare_params(params):
    """bf16 weights, f32 biases; lane-pad the final layer to OUT_PAD columns."""
    proc = []
    for li, (w, b) in enumerate(params):
        if li == len(params) - 1:
            w = jnp.pad(w, ((0, 0), (0, OUT_PAD - w.shape[1])))
            b = jnp.pad(b, ((0, 0), (0, OUT_PAD - b.shape[1])), constant_values=NEG_BIG)
        proc.append((w.astype(jnp.bfloat16), b.astype(jnp.float32)))
    return proc


@functools.partial(jax.jit, static_argnames=("interpret",))
def actor_forward(x, params, *, interpret=False):
    """x: (batch, 8) float32.  params: list of (W_t, b), W_t shape (in, out), f32.

    Returns (batch, 4) float32 softmax action probabilities.
    """
    batch = x.shape[0]

    # Batch tile: 256 for large batches (fills v6e/v7x 256-wide MXU), else 128.
    tb = 256 if batch >= 256 else 128
    n_tiles = pl.cdiv(batch, tb)
    padded_batch = n_tiles * tb
    if padded_batch != batch:
        x = jnp.pad(x, ((0, padded_batch - batch), (0, 0)))
    x = x.astype(jnp.bfloat16)

    proc = _prepare_params(params)

    flat_args = [x]
    in_specs = [pl.BlockSpec((tb, LAYER_SIZES[0]), lambda i: (i, 0))]
    for w, b in proc:
        flat_args.append(w)
        in_specs.append(pl.BlockSpec(w.shape, lambda i: (0, 0)))   # VMEM-resident
        flat_args.append(b)
        in_specs.append(pl.BlockSpec(b.shape, lambda i: (0, 0)))   # VMEM-resident

    # Advisory cost estimate for XLA scheduling around the custom call.
    flops = 2 * padded_batch * sum(a * b for a, b in zip(LAYER_SIZES[:-1], LAYER_SIZES[1:]))
    weight_bytes = sum(w.size * w.dtype.itemsize + b.size * b.dtype.itemsize for w, b in proc)
    bytes_accessed = int(x.size * x.dtype.itemsize + weight_bytes
                         + padded_batch * OUT_PAD * 4)
    cost = pl.CostEstimate(flops=int(flops),
                           transcendentals=int(padded_batch * OUT_PAD),
                           bytes_accessed=bytes_accessed)

    out_padded = pl.pallas_call(
        actor_kernel,
        out_shape=jax.ShapeDtypeStruct((padded_batch, OUT_PAD), jnp.float32),
        grid=(n_tiles,),
        in_specs=in_specs,
        out_specs=pl.BlockSpec((tb, OUT_PAD), lambda i: (i, 0)),
        compiler_params=pltpu.CompilerParams(dimension_semantics=("parallel",)),
        cost_estimate=cost,
        interpret=interpret,
    )(*flat_args)

    return out_padded[:batch, :N_ACTIONS]


def init_params(key):
    """Deterministic init mimicking nn.Linear default (uniform +/- 1/sqrt(fan_in)).
    Weights are returned pre-transposed to (in, out), f32; biases as (1, out)."""
    params = []
    for i in range(len(LAYER_SIZES) - 1):
        fan_in, fan_out = LAYER_SIZES[i], LAYER_SIZES[i + 1]
        key, kw, kb = jax.random.split(key, 3)
        bound = 1.0 / jnp.sqrt(fan_in)
        w_t = jax.random.uniform(kw, (fan_in, fan_out), jnp.float32, -bound, bound)
        b = jax.random.uniform(kb, (1, fan_out), jnp.float32, -bound, bound)
        params.append((w_t, b))
    return params


def reference_forward(x, params, *, bf16):
    """Pure-JAX reference.  bf16=True mirrors the kernel's mixed precision;
    bf16=False is the exact f32 semantics of the PyTorch module."""
    h = x.astype(jnp.bfloat16) if bf16 else x
    logits = None
    for i, (w, b) in enumerate(params):
        w_c = w.astype(jnp.bfloat16) if bf16 else w
        y = jnp.dot(h, w_c, preferred_element_type=jnp.float32) + b
        if i < len(params) - 1:
            h = jnp.maximum(y, 0.0)
            if bf16:
                h = h.astype(jnp.bfloat16)
        else:
            logits = y
    return jax.nn.softmax(logits, axis=-1)


if __name__ == "__main__":
    key = jax.random.PRNGKey(0)
    kx, kp, kx2 = jax.random.split(key, 3)
    params = init_params(kp)

    # --- small-batch test (batch=8 -> one 128-row tile after padding) ---
    x = jax.random.normal(kx, (8, 8), dtype=jnp.float32)
    out = jax.block_until_ready(actor_forward(x, params))
    ref_bf16 = reference_forward(x, params, bf16=True)
    ref_f32 = reference_forward(x, params, bf16=False)

    assert out.shape == (8, N_ACTIONS)
    assert bool(jnp.all(jnp.isfinite(out))), "non-finite probabilities"
    assert jnp.allclose(out, ref_bf16, atol=1e-2), "mismatch vs bf16 reference"
    assert jnp.allclose(out, ref_f32, atol=5e-2), "mismatch vs f32 reference"
    assert jnp.allclose(jnp.sum(out, axis=1), 1.0, atol=5e-3), "softmax rows must sum to 1"

    # --- multi-tile test (batch=200 -> padded to 256, grid=(2,), parallel axis) ---
    x2 = jax.random.normal(kx2, (200, 8), dtype=jnp.float32)
    out2 = jax.block_until_ready(actor_forward(x2, params))
    ref2 = reference_forward(x2, params, bf16=True)

    assert out2.shape == (200, N_ACTIONS)
    assert jnp.allclose(out2, ref2, atol=1e-2), "mismatch vs bf16 reference (multi-tile)"
    assert jnp.allclose(jnp.sum(out2, axis=1), 1.0, atol=5e-3), "softmax rows must sum to 1"

    print("KERNEL_OK")
</pallas_src>

<mosaic_0001>
module attributes {stable_mosaic.version = 11 : i64} {
  func.func @actor_kernel(%arg0: i32, %arg1: memref<128x8xbf16, #tpu.memory_space<vmem>>, %arg2: memref<8x256xbf16, #tpu.memory_space<vmem>>, %arg3: memref<1x256xf32, #tpu.memory_space<vmem>>, %arg4: memref<256x512xbf16, #tpu.memory_space<vmem>>, %arg5: memref<1x512xf32, #tpu.memory_space<vmem>>, %arg6: memref<512x256xbf16, #tpu.memory_space<vmem>>, %arg7: memref<1x256xf32, #tpu.memory_space<vmem>>, %arg8: memref<256x128xbf16, #tpu.memory_space<vmem>>, %arg9: memref<1x128xf32, #tpu.memory_space<vmem>>, %arg10: memref<128x128xbf16, #tpu.memory_space<vmem>>, %arg11: memref<1x128xf32, #tpu.memory_space<vmem>>, %arg12: memref<128x128xbf16, #tpu.memory_space<vmem>>, %arg13: memref<1x128xf32, #tpu.memory_space<vmem>>, %arg14: memref<128x128xf32, #tpu.memory_space<vmem>>) attributes {dimension_semantics = [#tpu.dimension_semantics<parallel>], iteration_bounds = array<i64: 1>, scalar_prefetch = 0 : i64, scratch_operands = 0 : i64, tpu.core_type = #tpu.core_type<tc>, window_params = [{transform_indices = @transform_0, window_bounds = array<i64: 128, 8>}, {pipeline_mode = #tpu.pipeline_mode<synchronous>, transform_indices = @transform_1, window_bounds = array<i64: 8, 256>}, {pipeline_mode = #tpu.pipeline_mode<synchronous>, transform_indices = @transform_2, window_bounds = array<i64: 1, 256>}, {pipeline_mode = #tpu.pipeline_mode<synchronous>, transform_indices = @transform_3, window_bounds = array<i64: 256, 512>}, {pipeline_mode = #tpu.pipeline_mode<synchronous>, transform_indices = @transform_4, window_bounds = array<i64: 1, 512>}, {pipeline_mode = #tpu.pipeline_mode<synchronous>, transform_indices = @transform_5, window_bounds = array<i64: 512, 256>}, {pipeline_mode = #tpu.pipeline_mode<synchronous>, transform_indices = @transform_6, window_bounds = array<i64: 1, 256>}, {pipeline_mode = #tpu.pipeline_mode<synchronous>, transform_indices = @transform_7, window_bounds = array<i64: 256, 128>}, {pipeline_mode = #tpu.pipeline_mode<synchronous>, transform_indices = @transform_8, window_bounds = array<i64: 1, 128>}, {pipeline_mode = #tpu.pipeline_mode<synchronous>, transform_indices = @transform_9, window_bounds = array<i64: 128, 128>}, {pipeline_mode = #tpu.pipeline_mode<synchronous>, transform_indices = @transform_10, window_bounds = array<i64: 1, 128>}, {pipeline_mode = #tpu.pipeline_mode<synchronous>, transform_indices = @transform_11, window_bounds = array<i64: 128, 128>}, {pipeline_mode = #tpu.pipeline_mode<synchronous>, transform_indices = @transform_12, window_bounds = array<i64: 1, 128>}, {transform_indices = @transform_13, window_bounds = array<i64: 128, 128>}]} {
    %c0 = arith.constant 0 : index
    %c0_0 = arith.constant 0 : index
    %0 = vector.load %arg2[%c0, %c0_0] : memref<8x256xbf16, #tpu.memory_space<vmem>>, vector<8x256xbf16>
    %c0_1 = arith.constant 0 : index
    %c0_2 = arith.constant 0 : index
    %1 = vector.load %arg4[%c0_1, %c0_2] : memref<256x512xbf16, #tpu.memory_space<vmem>>, vector<256x512xbf16>
    %c0_3 = arith.constant 0 : index
    %c0_4 = arith.constant 0 : index
    %2 = vector.load %arg6[%c0_3, %c0_4] : memref<512x256xbf16, #tpu.memory_space<vmem>>, vector<512x256xbf16>
    %c0_5 = arith.constant 0 : index
    %c0_6 = arith.constant 0 : index
    %3 = vector.load %arg8[%c0_5, %c0_6] : memref<256x128xbf16, #tpu.memory_space<vmem>>, vector<256x128xbf16>
    %c0_7 = arith.constant 0 : index
    %c0_8 = arith.constant 0 : index
    %4 = vector.load %arg10[%c0_7, %c0_8] : memref<128x128xbf16, #tpu.memory_space<vmem>>, vector<128x128xbf16>
    %c0_9 = arith.constant 0 : index
    %c0_10 = arith.constant 0 : index
    %5 = vector.load %arg12[%c0_9, %c0_10] : memref<128x128xbf16, #tpu.memory_space<vmem>>, vector<128x128xbf16>
    %c0_11 = arith.constant 0 : index
    %c0_12 = arith.constant 0 : index
    %6 = vector.load %arg3[%c0_11, %c0_12] : memref<1x256xf32, #tpu.memory_space<vmem>>, vector<1x256xf32>
    %c0_13 = arith.constant 0 : index
    %c0_14 = arith.constant 0 : index
    %7 = vector.load %arg5[%c0_13, %c0_14] : memref<1x512xf32, #tpu.memory_space<vmem>>, vector<1x512xf32>
    %c0_15 = arith.constant 0 : index
    %c0_16 = arith.constant 0 : index
    %8 = vector.load %arg7[%c0_15, %c0_16] : memref<1x256xf32, #tpu.memory_space<vmem>>, vector<1x256xf32>
    %c0_17 = arith.constant 0 : index
    %c0_18 = arith.constant 0 : index
    %9 = vector.load %arg9[%c0_17, %c0_18] : memref<1x128xf32, #tpu.memory_space<vmem>>, vector<1x128xf32>
    %c0_19 = arith.constant 0 : index
    %c0_20 = arith.constant 0 : index
    %10 = vector.load %arg11[%c0_19, %c0_20] : memref<1x128xf32, #tpu.memory_space<vmem>>, vector<1x128xf32>
    %c0_21 = arith.constant 0 : index
    %c0_22 = arith.constant 0 : index
    %11 = vector.load %arg13[%c0_21, %c0_22] : memref<1x128xf32, #tpu.memory_space<vmem>>, vector<1x128xf32>
    %c0_23 = arith.constant 0 : index
    %c0_24 = arith.constant 0 : index
    %12 = vector.load %arg1[%c0_23, %c0_24] : memref<128x8xbf16, #tpu.memory_space<vmem>>, vector<128x8xbf16>
    %cst = arith.constant dense<0.000000e+00> : vector<128x256xf32>
    %13 = tpu.matmul %12, %0, %cst {dimension_numbers = #tpu.dot_dimension_numbers<[1], [0], [0], [1], [0, 0, 1, 1], [], []>} : vector<128x8xbf16>, vector<8x256xbf16>, vector<128x256xf32> -> vector<128x256xf32>
    %14 = vector.broadcast %6 : vector<1x256xf32> to vector<128x256xf32>
    %15 = arith.addf %13, %14 : vector<128x256xf32>
    %cst_25 = arith.constant 0.000000e+00 : f32
    %16 = vector.broadcast %cst_25 : f32 to vector<128x256xf32>
    %17 = arith.maximumf %15, %16 : vector<128x256xf32>
    %18 = arith.truncf %17 : vector<128x256xf32> to vector<128x256xbf16>
    %cst_26 = arith.constant dense<0.000000e+00> : vector<128x512xf32>
    %19 = tpu.matmul %18, %1, %cst_26 {dimension_numbers = #tpu.dot_dimension_numbers<[1], [0], [0], [1], [0, 0, 1, 1], [], []>} : vector<128x256xbf16>, vector<256x512xbf16>, vector<128x512xf32> -> vector<128x512xf32>
    %20 = vector.broadcast %7 : vector<1x512xf32> to vector<128x512xf32>
    %21 = arith.addf %19, %20 : vector<128x512xf32>
    %cst_27 = arith.constant 0.000000e+00 : f32
    %22 = vector.broadcast %cst_27 : f32 to vector<128x512xf32>
    %23 = arith.maximumf %21, %22 : vector<128x512xf32>
    %24 = arith.truncf %23 : vector<128x512xf32> to vector<128x512xbf16>
    %cst_28 = arith.constant dense<0.000000e+00> : vector<128x256xf32>
    %25 = tpu.matmul %24, %2, %cst_28 {dimension_numbers = #tpu.dot_dimension_numbers<[1], [0], [0], [1], [0, 0, 1, 1], [], []>} : vector<128x512xbf16>, vector<512x256xbf16>, vector<128x256xf32> -> vector<128x256xf32>
    %26 = vector.broadcast %8 : vector<1x256xf32> to vector<128x256xf32>
    %27 = arith.addf %25, %26 : vector<128x256xf32>
    %cst_29 = arith.constant 0.000000e+00 : f32
    %28 = vector.broadcast %cst_29 : f32 to vector<128x256xf32>
    %29 = arith.maximumf %27, %28 : vector<128x256xf32>
    %30 = arith.truncf %29 : vector<128x256xf32> to vector<128x256xbf16>
    %cst_30 = arith.constant dense<0.000000e+00> : vector<128x128xf32>
    %31 = tpu.matmul %30, %3, %cst_30 {dimension_numbers = #tpu.dot_dimension_numbers<[1], [0], [0], [1], [0, 0, 1, 1], [], []>} : vector<128x256xbf16>, vector<256x128xbf16>, vector<128x128xf32> -> vector<128x128xf32>
    %32 = vector.broadcast %9 : vector<1x128xf32> to vector<128x128xf32>
    %33 = arith.addf %31, %32 : vector<128x128xf32>
    %cst_31 = arith.constant 0.000000e+00 : f32
    %34 = vector.broadcast %cst_31 : f32 to vector<128x128xf32>
    %35 = arith.maximumf %33, %34 : vector<128x128xf32>
    %36 = arith.truncf %35 : vector<128x128xf32> to vector<128x128xbf16>
    %cst_32 = arith.constant dense<0.000000e+00> : vector<128x128xf32>
    %37 = tpu.matmul %36, %4, %cst_32 {dimension_numbers = #tpu.dot_dimension_numbers<[1], [0], [0], [1], [0, 0, 1, 1], [], []>} : vector<128x128xbf16>, vector<128x128xbf16>, vector<128x128xf32> -> vector<128x128xf32>
    %38 = vector.broadcast %10 : vector<1x128xf32> to vector<128x128xf32>
    %39 = arith.addf %37, %38 : vector<128x128xf32>
    %cst_33 = arith.constant 0.000000e+00 : f32
    %40 = vector.broadcast %cst_33 : f32 to vector<128x128xf32>
    %41 = arith.maximumf %39, %40 : vector<128x128xf32>
    %42 = arith.truncf %41 : vector<128x128xf32> to vector<128x128xbf16>
    %cst_34 = arith.constant dense<0.000000e+00> : vector<128x128xf32>
    %43 = tpu.matmul %42, %5, %cst_34 {dimension_numbers = #tpu.dot_dimension_numbers<[1], [0], [0], [1], [0, 0, 1, 1], [], []>} : vector<128x128xbf16>, vector<128x128xbf16>, vector<128x128xf32> -> vector<128x128xf32>
    %44 = vector.broadcast %11 : vector<1x128xf32> to vector<128x128xf32>
    %45 = arith.addf %43, %44 : vector<128x128xf32>
    %cst_35 = arith.constant dense<0xFF800000> : vector<128xf32>
    %46 = vector.multi_reduction <maximumf>, %45, %cst_35 [1] : vector<128x128xf32> to vector<128xf32>
    %47 = vector.shape_cast %46 : vector<128xf32> to vector<128x1xf32>
    %48 = vector.broadcast %47 : vector<128x1xf32> to vector<128x128xf32>
    %49 = arith.subf %45, %48 : vector<128x128xf32>
    %50 = math.exp %49 : vector<128x128xf32>
    %cst_36 = arith.constant dense<0.000000e+00> : vector<128xf32>
    %51 = vector.multi_reduction <add>, %50, %cst_36 [1] : vector<128x128xf32> to vector<128xf32>
    %52 = vector.shape_cast %51 : vector<128xf32> to vector<128x1xf32>
    %53 = tpu.reciprocal %52 {approx = true} : vector<128x1xf32> -> vector<128x1xf32>
    %54 = vector.broadcast %53 : vector<128x1xf32> to vector<128x128xf32>
    %55 = arith.mulf %50, %54 : vector<128x128xf32>
    %c0_37 = arith.constant 0 : index
    %c0_38 = arith.constant 0 : index
    %56 = vector.load %arg14[%c0_37, %c0_38] : memref<128x128xf32, #tpu.memory_space<vmem>>, vector<128x128xf32>
    tpu.vector_store %arg14[%c0_37, %c0_38], %55 {strides = array<i32>} : memref<128x128xf32, #tpu.memory_space<vmem>>, vector<128x128xf32>,
    return
  }
  func.func @transform_0(%arg0: i32) -> (i32, i32) {
    %c0_i32 = arith.constant 0 : i32
    %c0_i32_0 = arith.constant 0 : i32
    return %arg0, %c0_i32 : i32, i32
  }
  func.func @transform_1(%arg0: i32) -> (i32, i32) {
    %c0_i32 = arith.constant 0 : i32
    %c0_i32_0 = arith.constant 0 : i32
    %c0_i32_1 = arith.constant 0 : i32
    return %c0_i32, %c0_i32_0 : i32, i32
  }
  func.func @transform_2(%arg0: i32) -> (i32, i32) {
    %c0_i32 = arith.constant 0 : i32
    %c0_i32_0 = arith.constant 0 : i32
    %c0_i32_1 = arith.constant 0 : i32
    return %c0_i32, %c0_i32_0 : i32, i32
  }
  func.func @transform_3(%arg0: i32) -> (i32, i32) {
    %c0_i32 = arith.constant 0 : i32
    %c0_i32_0 = arith.constant 0 : i32
    %c0_i32_1 = arith.constant 0 : i32
    return %c0_i32, %c0_i32_0 : i32, i32
  }
  func.func @transform_4(%arg0: i32) -> (i32, i32) {
    %c0_i32 = arith.constant 0 : i32
    %c0_i32_0 = arith.constant 0 : i32
    %c0_i32_1 = arith.constant 0 : i32
    return %c0_i32, %c0_i32_0 : i32, i32
  }
  func.func @transform_5(%arg0: i32) -> (i32, i32) {
    %c0_i32 = arith.constant 0 : i32
    %c0_i32_0 = arith.constant 0 : i32
    %c0_i32_1 = arith.constant 0 : i32
    return %c0_i32, %c0_i32_0 : i32, i32
  }
  func.func @transform_6(%arg0: i32) -> (i32, i32) {
    %c0_i32 = arith.constant 0 : i32
    %c0_i32_0 = arith.constant 0 : i32
    %c0_i32_1 = arith.constant 0 : i32
    return %c0_i32, %c0_i32_0 : i32, i32
  }
  func.func @transform_7(%arg0: i32) -> (i32, i32) {
    %c0_i32 = arith.constant 0 : i32
    %c0_i32_0 = arith.constant 0 : i32
    %c0_i32_1 = arith.constant 0 : i32
    return %c0_i32, %c0_i32_0 : i32, i32
  }
  func.func @transform_8(%arg0: i32) -> (i32, i32) {
    %c0_i32 = arith.constant 0 : i32
    %c0_i32_0 = arith.constant 0 : i32
    %c0_i32_1 = arith.constant 0 : i32
    return %c0_i32, %c0_i32_0 : i32, i32
  }
  func.func @transform_9(%arg0: i32) -> (i32, i32) {
    %c0_i32 = arith.constant 0 : i32
    %c0_i32_0 = arith.constant 0 : i32
    %c0_i32_1 = arith.constant 0 : i32
    return %c0_i32, %c0_i32_0 : i32, i32
  }
  func.func @transform_10(%arg0: i32) -> (i32, i32) {
    %c0_i32 = arith.constant 0 : i32
    %c0_i32_0 = arith.constant 0 : i32
    %c0_i32_1 = arith.constant 0 : i32
    return %c0_i32, %c0_i32_0 : i32, i32
  }
  func.func @transform_11(%arg0: i32) -> (i32, i32) {
    %c0_i32 = arith.constant 0 : i32
    %c0_i32_0 = arith.constant 0 : i32
    %c0_i32_1 = arith.constant 0 : i32
    return %c0_i32, %c0_i32_0 : i32, i32
  }
  func.func @transform_12(%arg0: i32) -> (i32, i32) {
    %c0_i32 = arith.constant 0 : i32
    %c0_i32_0 = arith.constant 0 : i32
    %c0_i32_1 = arith.constant 0 : i32
    return %c0_i32, %c0_i32_0 : i32, i32
  }
  func.func @transform_13(%arg0: i32) -> (i32, i32) {
    %c0_i32 = arith.constant 0 : i32
    %c0_i32_0 = arith.constant 0 : i32
    return %arg0, %c0_i32 : i32, i32
  }
}

</mosaic_0001>

<bundles_post_ra>
// kernel: actor_forward.1
= control target key start
LH: loop header
LB: loop body
LE: loop exit
PB: predicated region body
PF: predicated region fallthrough
CT: control target
= control target key end

     0   :  { %vm335_vm0 = vcmask 1043456   ;;  %vm310_vm1 = vcmask 64512   ;;  %s5226_s1 = inlined_call_operand.vmem [shape: bf16[8,256], index: 1, kind: input, shape index: {}]   ;;  %s5227_s0 = inlined_call_operand.vmem [shape: bf16[128,8], index: 0, kind: input, shape index: {}]   ;;  %s5228_s3 = inlined_call_operand.vmem [shape: bf16[256,512], index: 3, kind: input, shape index: {}]   ;;  %s5229_s2 = inlined_call_operand.vmem [shape: f32[1,256], index: 2, kind: input, shape index: {}]   ;;  %s5230_s5 = inlined_call_operand.vmem [shape: bf16[512,256], index: 5, kind: input, shape index: {}]   ;;  %s5231_s4 = inlined_call_operand.vmem [shape: f32[1,512], index: 4, kind: input, shape index: {}]   ;;  %s5232_s6 = inlined_call_operand.vmem [shape: f32[1,256], index: 6, kind: input, shape index: {}]   ;;  %s5233_s7 = inlined_call_operand.vmem [shape: bf16[256,128], index: 7, kind: input, shape index: {}]   ;;  %s5234_s8 = inlined_call_operand.vmem [shape: f32[1,128], index: 8, kind: input, shape index: {}]   ;;  %s5235_s9 = inlined_call_operand.vmem [shape: bf16[128,128], index: 9, kind: input, shape index: {}]   ;;  %s5236_s10 = inlined_call_operand.vmem [shape: f32[1,128], index: 10, kind: input, shape index: {}]   ;;  %s5237_s11 = inlined_call_operand.vmem [shape: bf16[128,128], index: 11, kind: input, shape index: {}]   ;;  %s5238_s12 = inlined_call_operand.vmem [shape: f32[1,128], index: 12, kind: input, shape index: {}]   ;;  %s5239_s13 = inlined_call_operand.vmem [shape: f32[128,128], index: 13, kind: output, shape index: {}]  }
   0x1   :  { %v45_v0 = vld [vmem:[%s5226_s1] sm:$0xff]  ;;  %v3528_v8 = vld [vmem:[%s5227_s0 + $0x8] sm:$0xff]  ;;  %v3529_v10 = vld [vmem:[%s5227_s0 + $0x10] sm:$0xff] }
   0x2   :  { %v306_v1 = vunpack.c.l.b16 %v45_v0  ;;  %v307_v2 = vunpack.c.h.b16 %v45_v0  ;;  %v3527_v7 = vld [vmem:[%s5227_s0] sm:$0xff]  ;;  %v3532_v11 = vld [vmem:[%s5227_s0 + $0x28] sm:$0xff]  ;;  %v2843_v13 = vld [vmem:[%s5228_s3 + $0xf0] sm:$0xf0] }
   0x3   :  { %v3698_v9 = vld [vmem:[%s5227_s0 + $0x20] sm:$0xff]  ;;  %v3429_v16 = vld [vmem:[%s5228_s3 + $0x1ec] sm:$0xf0]  ;;  %v2827_v19 = vld [vmem:[%s5228_s3 + $0xd0] sm:$0xf0] }
   0x4   :  { %v308_v3 = vpack.c.b16 %v306_v1, %v306_v1  ;;  %v309_v4 = vpack.c.b16 %v307_v2, %v307_v2  ;;  %v3395_v12 = vld [vmem:[%s5228_s3 + $0xe4] sm:$0xf]  ;;  %v2969_v15 = vld [vmem:[%s5228_s3 + $0x1e0] sm:$0xf]  ;;  %v3425_v22 = vld [vmem:[%s5228_s3 + $0x1cc] sm:$0xf0] }
   0x5   :  { %v2846_v14 = vor.u32 %v3395_v12, %v2843_v13  ;;  %v3391_v17 = vld [vmem:[%s5228_s3 + $0xc4] sm:$0xf]  ;;  %v2970_v18 = vor.u32 %v3429_v16, %v2969_v15  ;;  %v2953_v20 = vld [vmem:[%s5228_s3 + $0x1c0] sm:$0xf]  ;;  %v2971_v24 = vld [vmem:[%s5228_s3 + $0x1f0] sm:$0xf0] }
   0x6   :  { %v337_v5 = vsel %vm335_vm0, %v308_v3, 0  ;;  %v340_v6 = vsel %vm335_vm0, %v309_v4, 0  ;;  %v2830_v21 = vor.u32 %v3391_v17, %v2827_v19  ;;  %v3427_v23 = vld [vmem:[%s5228_s3 + $0x1e4] sm:$0xf]  ;;  %v2954_v25 = vor.u32 %v3425_v22, %v2953_v20  ;;  %v2811_v28 = vld [vmem:[%s5228_s3 + $0xb0] sm:$0xf0] }
   0x7   :  { %349 = vmatpush.bf16.msra.mxu0 %v337_v5  ;;  %398 = vmatpush.bf16.msra.mxu1 %v340_v6  ;;  %v2974_v26 = vor.u32 %v3427_v23, %v2971_v24  ;;  %v3387_v27 = vld [vmem:[%s5228_s3 + $0xa4] sm:$0xf]  ;;  %v2841_v29 = vld [vmem:[%s5228_s3 + $0xe0] sm:$0xf]  ;;  %v3397_v30 = vld [vmem:[%s5228_s3 + $0xec] sm:$0xf0] }
   0x8   :  { %3536 = vmatpush.bf16.msra.mxu3 %v340_v6  ;;  %3535 = vmatpush.bf16.msra.mxu2 %v337_v5  ;;  %v2937_v31 = vld [vmem:[%s5228_s3 + $0x1a0] sm:$0xf]  ;;  %v3421_v32 = vld [vmem:[%s5228_s3 + $0x1ac] sm:$0xf0]  ;;  %v2842_v33 = vor.u32 %v3397_v30, %v2841_v29  ;;  %v3423_v34 = vld [vmem:[%s5228_s3 + $0x1c4] sm:$0xf]  ;;  %v2814_v36 = vor.u32 %v3387_v27, %v2811_v28 }
   0x9   :  { %v2955_v35 = vld [vmem:[%s5228_s3 + $0x1d0] sm:$0xf0]  ;;  %v2825_v38 = vld [vmem:[%s5228_s3 + $0xc0] sm:$0xf]  ;;  %v3393_v39 = vld [vmem:[%s5228_s3 + $0xcc] sm:$0xf0]  ;;  %v2938_v40 = vor.u32 %v3421_v32, %v2937_v31 }
   0xa   :  { %2711 = vmatmul.msk.bf16.vlgmr.msra.gmra.mxu0 %vm310_vm1, %v3527_v7  ;;  %2719 = vmatmul.msk.bf16.vlgmr.msra.gmra.mxu1 %vm310_vm1, %v3527_v7  ;;  %v2958_v37 = vor.u32 %v3423_v34, %v2955_v35  ;;  %v2826_v41 = vor.u32 %v3393_v39, %v2825_v38  ;;  %v3383_v42 = vld [vmem:[%s5228_s3 + $0x84] sm:$0xf]  ;;  %v2795_v43 = vld [vmem:[%s5228_s3 + $0x90] sm:$0xf0]  ;;  %v2921_v44 = vld [vmem:[%s5228_s3 + $0x180] sm:$0xf] }
   0xb   :  { %2723 = vmatmul.msk.bf16.vlgmr.msra.gmra.mxu3 %vm310_vm1, %v3698_v9  ;;  %2716 = vmatmul.msk.bf16.vlgmr.msra.gmra.mxu2 %vm310_vm1, %v3532_v11  ;;  %v3419_v45 = vld [vmem:[%s5228_s3 + $0x1a4] sm:$0xf]  ;;  %v2939_v46 = vld [vmem:[%s5228_s3 + $0x1b0] sm:$0xf0]  ;;  %v3417_v47 = vld [vmem:[%s5228_s3 + $0x18c] sm:$0xf0]  ;;  %v2798_v52 = vor.u32 %v3383_v42, %v2795_v43 }
   0xc   :  { %915 = vmatpush.bf16.msrb.mxu0 %v2846_v14  ;;  %866 = vmatpush.bf16.msrb.mxu3 %v2970_v18  ;;  %v2942_v48 = vor.u32 %v3419_v45, %v2939_v46  ;;  %v2809_v49 = vld [vmem:[%s5228_s3 + $0xa0] sm:$0xf]  ;;  %v3389_v50 = vld [vmem:[%s5228_s3 + $0xac] sm:$0xf0]  ;;  %v3530_v51 = vld [vmem:[%s5227_s0 + $0x18] sm:$0xff]  ;;  %v2922_v58 = vor.u32 %v3417_v47, %v2921_v44 }
   0xd   :  { %964 = vmatpush.bf16.msrb.mxu1 %v2974_v26  ;;  %817 = vmatpush.bf16.msrb.mxu2 %v2842_v33  ;;  %v3379_v53 = vld [vmem:[%s5228_s3 + $0x64] sm:$0xf]  ;;  %v2779_v54 = vld [vmem:[%s5228_s3 + $0x70] sm:$0xf0]  ;;  %v2810_v59 = vor.u32 %v3389_v50, %v2809_v49  ;;  %v2793_v60 = vld [vmem:[%s5228_s3 + $0x80] sm:$0xf] }
   0xe   :  { %v3415_v55 = vld [vmem:[%s5228_s3 + $0x184] sm:$0xf]  ;;  %v2923_v56 = vld [vmem:[%s5228_s3 + $0x190] sm:$0xf0]  ;;  %v3385_v61 = vld [vmem:[%s5228_s3 + $0x8c] sm:$0xf0]  ;;  %v2782_v0 = vor.u32 %v3379_v53, %v2779_v54 }
   0xf   :  { %v3533_v57 = vld [vmem:[%s5227_s0 + $0x30] sm:$0xff]  ;;  %v2905_v62 = vld [vmem:[%s5228_s3 + $0x160] sm:$0xf]  ;;  %v2926_v1 = vor.u32 %v3415_v55, %v2923_v56  ;;  %v3375_v2 = vld [vmem:[%s5228_s3 + $0x44] sm:$0xf]  ;;  %v2794_v6 = vor.u32 %v3385_v61, %v2793_v60 }
  0x10   :  { %916 = vmatpush.bf16.msrb.mxu0 %v2830_v21  ;;  %867 = vmatpush.bf16.msrb.mxu3 %v2954_v25  ;;  %v3413_v63 = vld [vmem:[%s5228_s3 + $0x16c] sm:$0xf0]  ;;  %v2763_v3 = vld [vmem:[%s5228_s3 + $0x50] sm:$0xf0]  ;;  %v3411_v4 = vld [vmem:[%s5228_s3 + $0x164] sm:$0xf] }
  0x11   :  { %965 = vmatpush.bf16.msrb.mxu1 %v2958_v37  ;;  %818 = vmatpush.bf16.msrb.mxu2 %v2826_v41  ;;  %v2907_v5 = vld [vmem:[%s5228_s3 + $0x170] sm:$0xf0]  ;;  %v2906_v7 = vor.u32 %v3413_v63, %v2905_v62  ;;  %v3409_v12 = vld [vmem:[%s5228_s3 + $0x14c] sm:$0xf0]  ;;  %v2766_v13 = vor.u32 %v3375_v2, %v2763_v3  ;;  %v2761_v17 = vld [vmem:[%s5228_s3 + $0x40] sm:$0xf] }
  0x12   :  { %v2910_v14 = vor.u32 %v3411_v4, %v2907_v5  ;;  %v3377_v18 = vld [vmem:[%s5228_s3 + $0x4c] sm:$0xf0]  ;;  %v3534_v20 = vld [vmem:[%s5227_s0 + $0x38] sm:$0xff]  ;;  %v3407_v21 = vld [vmem:[%s5228_s3 + $0x144] sm:$0xf] }
  0x13   :  { %v2762_v19 = vor.u32 %v3377_v18, %v2761_v17  ;;  %v2891_v22 = vld [vmem:[%s5228_s3 + $0x150] sm:$0xf0]  ;;  %v2873_v24 = vld [vmem:[%s5228_s3 + $0x120] sm:$0xf]  ;;  %v3373_v27 = vld [vmem:[%s5228_s3 + $0x2c] sm:$0xf0] }
  0x14   :  { %917 = vmatpush.bf16.msrb.mxu0 %v2814_v36  ;;  %868 = vmatpush.bf16.msrb.mxu3 %v2938_v40  ;;  %v2894_v23 = vor.u32 %v3407_v21, %v2891_v22  ;;  %v2745_v25 = vld [vmem:[%s5228_s3 + $0x20] sm:$0xf]  ;;  %v3371_v28 = vld [vmem:[%s5228_s3 + $0x24] sm:$0xf]  ;;  %v2747_v29 = vld [vmem:[%s5228_s3 + $0x30] sm:$0xf0] }
  0x15   :  { %966 = vmatpush.bf16.msrb.mxu1 %v2942_v48  ;;  %819 = vmatpush.bf16.msrb.mxu2 %v2810_v59  ;;  %v2746_v30 = vor.u32 %v3373_v27, %v2745_v25  ;;  %v2750_v31 = vor.u32 %v3371_v28, %v2747_v29  ;;  %v3403_v32 = vld [vmem:[%s5228_s3 + $0x124] sm:$0xf]  ;;  %v2875_v33 = vld [vmem:[%s5228_s3 + $0x130] sm:$0xf0]  ;;  %v2729_v35 = vld [vmem:[%s5228_s3] sm:$0xf] }
  0x16   :  { %v2878_v34 = vor.u32 %v3403_v32, %v2875_v33  ;;  %v3369_v36 = vld [vmem:[%s5228_s3 + $0xc] sm:$0xf0]  ;;  %v2857_v37 = vld [vmem:[%s5228_s3 + $0x100] sm:$0xf]  ;;  %v3367_v40 = vld [vmem:[%s5228_s3 + $0x4] sm:$0xf] }
  0x17   :  { %v2730_v38 = vor.u32 %v3369_v36, %v2729_v35  ;;  %v3401_v39 = vld [vmem:[%s5228_s3 + $0x10c] sm:$0xf0]  ;;  %v2731_v41 = vld [vmem:[%s5228_s3 + $0x10] sm:$0xf0]  ;;  %v3399_v44 = vld [vmem:[%s5228_s3 + $0x104] sm:$0xf] }
  0x18   :  { %918 = vmatpush.bf16.msrb.mxu0 %v2798_v52  ;;  %869 = vmatpush.bf16.msrb.mxu3 %v2922_v58  ;;  %v2858_v42 = vor.u32 %v3401_v39, %v2857_v37  ;;  %v2734_v43 = vor.u32 %v3367_v40, %v2731_v41  ;;  %v2859_v45 = vld [vmem:[%s5228_s3 + $0x110] sm:$0xf0]  ;;  %v2849_v47 = vld [vmem:[%s5228_s3 + $0xe8] sm:$0xf]  ;;  %v3398_v48 = vld [vmem:[%s5228_s3 + $0xf4] sm:$0xf0] }
  0x19   :  { %967 = vmatpush.bf16.msrb.mxu1 %v2926_v1  ;;  %820 = vmatpush.bf16.msrb.mxu2 %v2794_v6  ;;  %v2862_v46 = vor.u32 %v3399_v44, %v2859_v45  ;;  %v2850_v49 = vor.u32 %v3398_v48, %v2849_v47  ;;  %v2977_v50 = vld [vmem:[%s5228_s3 + $0x1e8] sm:$0xf]  ;;  %v3396_v52 = vld [vmem:[%s5228_s3 + $0xec] sm:$0xf]  ;;  %v2851_v54 = vld [vmem:[%s5228_s3 + $0xf8] sm:$0xf0] }
  0x1a   :  { %2712 = vmatmul.msk.bf16.gmra.mxu0 %vm310_vm1, %v3528_v8  ;;  %2720 = vmatmul.msk.bf16.gmra.mxu1 %vm310_vm1, %v3528_v8  ;;  %v2777_v8 = vld [vmem:[%s5228_s3 + $0x60] sm:$0xf]  ;;  %v2854_v55 = vor.u32 %v3396_v52, %v2851_v54  ;;  %v3428_v56 = vld [vmem:[%s5228_s3 + $0x1ec] sm:$0xf]  ;;  %v2833_v62 = vld [vmem:[%s5228_s3 + $0xc8] sm:$0xf] }
  0x1b   :  { %2724 = vmatmul.msk.bf16.gmra.mxu3 %vm310_vm1, %v3532_v11  ;;  %2717 = vmatmul.msk.bf16.gmra.mxu2 %vm310_vm1, %v3533_v57  ;;  %v2889_v11 = vld [vmem:[%s5228_s3 + $0x140] sm:$0xf]  ;;  %v3394_v63 = vld [vmem:[%s5228_s3 + $0xd4] sm:$0xf0]  ;;  %v2961_v3 = vld [vmem:[%s5228_s3 + $0x1c8] sm:$0xf] }
  0x1c   :  { %919 = vmatpush.bf16.msrb.mxu0 %v2782_v0  ;;  %870 = vmatpush.bf16.msrb.mxu3 %v2906_v7  ;;  %v2890_v16 = vor.u32 %v3409_v12, %v2889_v11  ;;  %v238_v59 = vld [vmem:[%s5229_s2] sm:$0x3]  ;;  %v2834_v0 = vor.u32 %v3394_v63, %v2833_v62  ;;  %v3426_v4 = vld [vmem:[%s5228_s3 + $0x1d4] sm:$0xf0]  ;;  %v3392_v6 = vld [vmem:[%s5228_s3 + $0xcc] sm:$0xf] }
  0x1d   :  { %968 = vmatpush.bf16.msrb.mxu1 %v2910_v14  ;;  %v3954_v1 = vperm.slane %v238_v59, 0  ;;  %v3956_v2 = vperm.slane %v238_v59, 1  ;;  %v2962_v5 = vor.u32 %v3426_v4, %v2961_v3  ;;  %v2835_v7 = vld [vmem:[%s5228_s3 + $0xd8] sm:$0xf0]  ;;  %v3424_v22 = vld [vmem:[%s5228_s3 + $0x1cc] sm:$0xf] }
  0x1e   :  { %v3390_v27 = vld [vmem:[%s5228_s3 + $0xb4] sm:$0xf0]  ;;  %v2945_v29 = vld [vmem:[%s5228_s3 + $0x1a8] sm:$0xf]  ;;  %v3388_v32 = vld [vmem:[%s5228_s3 + $0xac] sm:$0xf] }
  0x1f   :  { %v2819_v33 = vld [vmem:[%s5228_s3 + $0xb8] sm:$0xf0]  ;;  %v3420_v47 = vld [vmem:[%s5228_s3 + $0x1ac] sm:$0xf]  ;;  %v2801_v52 = vld [vmem:[%s5228_s3 + $0x88] sm:$0xf] }
  0x20   :  { %920 = vmatpush.bf16.msrb.mxu0 %v2766_v13  ;;  %871 = vmatpush.bf16.msrb.mxu3 %v2890_v16  ;;  %v2947_v48 = vld [vmem:[%s5228_s3 + $0x1b8] sm:$0xf0] }
  0x21   :  { %969 = vmatpush.bf16.msrb.mxu1 %v2894_v23  ;;  %v2963_v23 = vld [vmem:[%s5228_s3 + $0x1d8] sm:$0xf0] }
  0x22   :  { %v2803_v59 = vld [vmem:[%s5228_s3 + $0x98] sm:$0xf0] }
  0x24   :  { %921 = vmatpush.bf16.msrb.mxu0 %v2750_v31 }
  0x25   :  { %970 = vmatpush.bf16.msrb.mxu1 %v2878_v34  ;;  %v2822_v34 = vor.u32 %v3388_v32, %v2819_v33 }
  0x28   :  { %922 = vmatpush.bf16.msrb.mxu0 %v2734_v43 }
  0x29   :  { %971 = vmatpush.bf16.msrb.mxu1 %v2862_v46 }
  0x2a   :  { %2713 = vmatmul.msk.bf16.gmra.mxu0 %vm310_vm1, %v3529_v10  ;;  %2721 = vmatmul.msk.bf16.gmra.mxu1 %vm310_vm1, %v3529_v10  ;;  %v3381_v10 = vld [vmem:[%s5228_s3 + $0x6c] sm:$0xf0] }
  0x2b   :  { %2725 = vmatmul.msk.bf16.gmra.mxu3 %vm310_vm1, %v3533_v57  ;;  %v2778_v15 = vor.u32 %v3381_v10, %v2777_v8  ;;  %2718 = vmatmul.msk.bf16.gmra.mxu2 %vm310_vm1, %v3534_v20  ;;  %v2979_v57 = vld [vmem:[%s5228_s3 + $0x1f8] sm:$0xf0]  ;;  %v2838_v8 = vor.u32 %v3392_v6, %v2835_v7 }
  0x2c   :  { %1111 = vmatpush.bf16.msra.mxu0 %v2854_v55  ;;  %v2982_v58 = vor.u32 %v3428_v56, %v2979_v57  ;;  %v2929_v55 = vld [vmem:[%s5228_s3 + $0x188] sm:$0xf]  ;;  %v3418_v56 = vld [vmem:[%s5228_s3 + $0x194] sm:$0xf0] }
  0x2d   :  { %821 = vmatpush.bf16.msrb.mxu2 %v2778_v15  ;;  %v2930_v57 = vor.u32 %v3418_v56, %v2929_v55  ;;  %v2771_v55 = vld [vmem:[%s5228_s3 + $0x58] sm:$0xf0] }
  0x2e   :  { %1160 = vmatpush.bf16.msra.mxu1 %v2982_v58  ;;  %v3384_v58 = vld [vmem:[%s5228_s3 + $0x8c] sm:$0xf] }
  0x30   :  { %1112 = vmatpush.bf16.msra.mxu0 %v2838_v8 }
  0x31   :  { %822 = vmatpush.bf16.msrb.mxu2 %v2762_v19 }
  0x34   :  { %1113 = vmatpush.bf16.msra.mxu0 %v2822_v34 }
  0x35   :  { %823 = vmatpush.bf16.msrb.mxu2 %v2746_v30  ;;  %v3422_v30 = vld [vmem:[%s5228_s3 + $0x1b4] sm:$0xf0] }
  0x36   :  { %v2946_v31 = vor.u32 %v3422_v30, %v2945_v29  ;;  %v2915_v29 = vld [vmem:[%s5228_s3 + $0x178] sm:$0xf0] }
  0x39   :  { %824 = vmatpush.bf16.msrb.mxu2 %v2730_v38 }
  0x3a   :  { %2714 = vmatmul.msk.bf16.gmra.mxu0 %vm310_vm1, %v3530_v51  ;;  %2722 = vmatmul.msk.bf16.gmra.mxu1 %vm310_vm1, %v3530_v51  ;;  %v3430_v51 = vld [vmem:[%s5228_s3 + $0x1f4] sm:$0xf0] }
  0x3b   :  { %2726 = vmatmul.msk.bf16.gmra.mxu3 %vm310_vm1, %v3534_v20  ;;  %v2978_v53 = vor.u32 %v3430_v51, %v2977_v50 }
  0x3d   :  { %1013 = vmatpush.bf16.msra.mxu2 %v2850_v49  ;;  %v2950_v49 = vor.u32 %v3420_v47, %v2947_v48 }
  0x41   :  { %1014 = vmatpush.bf16.msra.mxu2 %v2834_v0 }
  0x4a   :  { %2715 = vmatmul.msk.bf16.gmra.mxu0 %vm310_vm1, %v3698_v9  ;;  %v3405_v9 = vld [vmem:[%s5228_s3 + $0x12c] sm:$0xf0] }
  0x4b   :  { %v2874_v26 = vor.u32 %v3405_v9, %v2873_v24  ;;  %v2966_v24 = vor.u32 %v3424_v22, %v2963_v23  ;;  %v2913_v22 = vld [vmem:[%s5228_s3 + $0x168] sm:$0xf] }
  0x4d   :  { %872 = vmatpush.bf16.msrb.mxu3 %v2874_v26  ;;  %v2817_v26 = vld [vmem:[%s5228_s3 + $0xa8] sm:$0xf]  ;;  %1161 = vmatpush.bf16.msra.mxu1 %v2966_v24  ;;  %v3414_v24 = vld [vmem:[%s5228_s3 + $0x174] sm:$0xf0] }
  0x4e   :  { %v2818_v28 = vor.u32 %v3390_v27, %v2817_v26  ;;  %v2914_v26 = vor.u32 %v3414_v24, %v2913_v22  ;;  %v3372_v22 = vld [vmem:[%s5228_s3 + $0x2c] sm:$0xf] }
  0x50   :  { %1015 = vmatpush.bf16.msra.mxu2 %v2818_v28  ;;  %v3412_v28 = vld [vmem:[%s5228_s3 + $0x16c] sm:$0xf] }
  0x51   :  { %873 = vmatpush.bf16.msrb.mxu3 %v2858_v42  ;;  %1162 = vmatpush.bf16.msra.mxu1 %v2950_v49  ;;  %v2918_v30 = vor.u32 %v3412_v28, %v2915_v29  ;;  %v2769_v49 = vld [vmem:[%s5228_s3 + $0x48] sm:$0xf] }
  0x55   :  { %1062 = vmatpush.bf16.msra.mxu3 %v2978_v53  ;;  %v3386_v53 = vld [vmem:[%s5228_s3 + $0x94] sm:$0xf0] }
  0x56   :  { %v2802_v54 = vor.u32 %v3386_v53, %v2801_v52  ;;  %v3410_v53 = vld [vmem:[%s5228_s3 + $0x154] sm:$0xf0] }
  0x58   :  { %1016 = vmatpush.bf16.msra.mxu2 %v2802_v54  ;;  %v3376_v54 = vld [vmem:[%s5228_s3 + $0x4c] sm:$0xf] }
  0x59   :  { %1063 = vmatpush.bf16.msra.mxu3 %v2962_v5 }
  0x5d   :  { %1064 = vmatpush.bf16.msra.mxu3 %v2946_v31 }
  0x61   :  { %1065 = vmatpush.bf16.msra.mxu3 %v2930_v57  ;;  %v2774_v57 = vor.u32 %v3376_v54, %v2771_v55  ;;  %v3400_v55 = vld [vmem:[%s5228_s3 + $0x10c] sm:$0xf] }
  0x65   :  { %1066 = vmatpush.bf16.msra.mxu3 %v2914_v26  ;;  %v2883_v26 = vld [vmem:[%s5228_s3 + $0x138] sm:$0xf0] }
  0x87   :  { %v351_v60 = vpop.f32.mrf.mxu0  ;;  %v400_v61 = vpop.f32.mrf.mxu1 }
  0x88   :  { %v352_v10 = vadd.f32 %v351_v60, %v3954_v1  ;;  %v401_v11 = vadd.f32 %v400_v61, %v3956_v2  ;;  %v2806_v60 = vor.u32 %v3384_v58, %v2803_v59  ;;  %v3408_v58 = vld [vmem:[%s5228_s3 + $0x14c] sm:$0xf]  ;;  %v2899_v59 = vld [vmem:[%s5228_s3 + $0x158] sm:$0xf0] }
  0x8a   :  { %v440_v16 = vmax.f32 %v352_v10, 0.0  ;;  %v441_v17 = vmax.f32 %v401_v11, 0.0  ;;  %1114 = vmatpush.bf16.msra.mxu0 %v2806_v60  ;;  %v2902_v60 = vor.u32 %v3408_v58, %v2899_v59 }
  0x8e   :  { %v4046_v10 = vpop.f32.mrf.mxu3 }
  0x8f   :  { %v353_v12 = vpop.f32.mrf.mxu0  ;;  %v402_v13 = vpop.f32.mrf.mxu1 }
  0x90   :  { %v354_v14 = vadd.f32 %v353_v12, %v3954_v1  ;;  %v403_v15 = vadd.f32 %v402_v13, %v3956_v2  ;;  %v3416_v13 = vld [vmem:[%s5228_s3 + $0x18c] sm:$0xf] }
  0x92   :  { %v442_v18 = vmax.f32 %v354_v14, 0.0  ;;  %v443_v19 = vmax.f32 %v403_v15, 0.0  ;;  %v2931_v14 = vld [vmem:[%s5228_s3 + $0x198] sm:$0xf0] }
  0x93   :  { %v2934_v15 = vor.u32 %v3416_v13, %v2931_v14 }
  0x94   :  { %v3974_v20 = vpack.c.bf16 %v442_v18, %v440_v16  ;;  %v3976_v21 = vpack.c.bf16 %v443_v19, %v441_v17  ;;  %v2785_v18 = vld [vmem:[%s5228_s3 + $0x68] sm:$0xf]  ;;  %v3382_v19 = vld [vmem:[%s5228_s3 + $0x74] sm:$0xf0] }
  0x95   :  { %1163 = vmatpush.bf16.msra.mxu1 %v2934_v15  ;;  %v2786_v23 = vor.u32 %v3382_v19, %v2785_v18  ;;  %v3406_v19 = vld [vmem:[%s5228_s3 + $0x134] sm:$0xf0] }
  0x96   :  { %825 = vmatmul.bf16.vlgmr.msrb.gmra.mxu2 %v3974_v20  ;;  %874 = vmatmul.bf16.vlgmr.msrb.gmra.mxu3 %v3976_v21  ;;  %v422_v31 = vpop.f32.mrf.mxu3 }
  0x97   :  { %923 = vmatmul.bf16.vlgmr.msrb.gmra.mxu0 %v3974_v20  ;;  %972 = vmatmul.bf16.vlgmr.msrb.gmra.mxu1 %v3976_v21  ;;  %v356_v9 = vpop.f32.mrf.mxu0  ;;  %v405_v25 = vpop.f32.mrf.mxu1 }
  0x98   :  { %v357_v35 = vadd.f32 %v356_v9, %v3954_v1  ;;  %v406_v36 = vadd.f32 %v405_v25, %v3956_v2  ;;  %v3380_v9 = vld [vmem:[%s5228_s3 + $0x6c] sm:$0xf]  ;;  %v2787_v25 = vld [vmem:[%s5228_s3 + $0x78] sm:$0xf0]  ;;  %1017 = vmatpush.bf16.msra.mxu2 %v2786_v23 }
  0x99   :  { %v2790_v27 = vor.u32 %v3380_v9, %v2787_v25  ;;  %1164 = vmatpush.bf16.msra.mxu1 %v2918_v30  ;;  %v2755_v23 = vld [vmem:[%s5228_s3 + $0x38] sm:$0xf0]  ;;  %v3404_v25 = vld [vmem:[%s5228_s3 + $0x12c] sm:$0xf] }
  0x9a   :  { %v444_v41 = vmax.f32 %v357_v35, 0.0  ;;  %v445_v42 = vmax.f32 %v406_v36, 0.0  ;;  %v2758_v9 = vor.u32 %v3372_v22, %v2755_v23 }
  0x9b   :  { %1115 = vmatpush.bf16.msra.mxu0 %v2790_v27  ;;  %v2886_v27 = vor.u32 %v3404_v25, %v2883_v26  ;;  %v3446_v25 = vld [vmem:[%s5230_s5 + $0x74] sm:$0xf0] }
  0x9d   :  { %1165 = vmatpush.bf16.msra.mxu1 %v2902_v60 }
  0x9e   :  { %v425_v48 = vpop.f32.mrf.mxu3 }
  0x9f   :  { %v358_v37 = vpop.f32.mrf.mxu0  ;;  %v407_v38 = vpop.f32.mrf.mxu1  ;;  %1116 = vmatpush.bf16.msra.mxu0 %v2774_v57 }
  0xa0   :  { %v359_v39 = vadd.f32 %v358_v37, %v3954_v1  ;;  %v408_v40 = vadd.f32 %v407_v38, %v3956_v2 }
  0xa1   :  { %1166 = vmatpush.bf16.msra.mxu1 %v2886_v27 }
  0xa2   :  { %v446_v43 = vmax.f32 %v359_v39, 0.0  ;;  %v447_v44 = vmax.f32 %v408_v40, 0.0 }
  0xa3   :  { %1117 = vmatpush.bf16.msra.mxu0 %v2758_v9  ;;  %v3041_v9 = vld [vmem:[%s5230_s5 + $0x70] sm:$0xf] }
  0xa4   :  { %v4010_v45 = vpack.c.bf16 %v446_v43, %v444_v41  ;;  %v4012_v46 = vpack.c.bf16 %v447_v44, %v445_v42  ;;  %v376_v44 = vpop.f32.mrf.mxu2 }
  0xa5   :  { %v377_v30 = vadd.f32 %v376_v44, %v3954_v1  ;;  %v2737_v44 = vld [vmem:[%s5228_s3 + $0x8] sm:$0xf] }
  0xa6   :  { %830 = vmatmul.bf16.gmra.mxu2 %v4010_v45  ;;  %879 = vmatmul.bf16.gmra.mxu3 %v4012_v46 }
  0xa7   :  { %928 = vmatmul.bf16.gmra.mxu0 %v4010_v45  ;;  %977 = vmatmul.bf16.gmra.mxu1 %v4012_v46  ;;  %v361_v50 = vpop.f32.mrf.mxu0  ;;  %v410_v51 = vpop.f32.mrf.mxu1 }
  0xa8   :  { %v362_v61 = vadd.f32 %v361_v50, %v3954_v1  ;;  %v411_v62 = vadd.f32 %v410_v51, %v3956_v2  ;;  %v3378_v50 = vld [vmem:[%s5228_s3 + $0x54] sm:$0xf0]  ;;  %v2897_v51 = vld [vmem:[%s5228_s3 + $0x148] sm:$0xf] }
  0xa9   :  { %v2770_v52 = vor.u32 %v3378_v50, %v2769_v49  ;;  %v2898_v56 = vor.u32 %v3410_v53, %v2897_v51  ;;  %v3402_v50 = vld [vmem:[%s5228_s3 + $0x114] sm:$0xf0]  ;;  %v3368_v51 = vld [vmem:[%s5228_s3 + $0xc] sm:$0xf] }
  0xaa   :  { %v448_v5 = vmax.f32 %v362_v61, 0.0  ;;  %v449_v6 = vmax.f32 %v411_v62, 0.0  ;;  %v421_v61 = vadd.f32 %v4046_v10, %v3956_v2  ;;  %v423_v62 = vadd.f32 %v422_v31, %v3956_v2  ;;  %v2753_v10 = vld [vmem:[%s5228_s3 + $0x28] sm:$0xf] }
  0xab   :  { %1018 = vmatpush.bf16.msra.mxu2 %v2770_v52  ;;  %1067 = vmatpush.bf16.msra.mxu3 %v2898_v56  ;;  %v426_v31 = vadd.f32 %v425_v48, %v3956_v2  ;;  %v2865_v48 = vld [vmem:[%s5228_s3 + $0x108] sm:$0xf]  ;;  %v2739_v52 = vld [vmem:[%s5228_s3 + $0x18] sm:$0xf0] }
  0xac   :  { %v2866_v53 = vor.u32 %v3402_v50, %v2865_v48  ;;  %v2742_v54 = vor.u32 %v3368_v51, %v2739_v52  ;;  %v2867_v56 = vld [vmem:[%s5228_s3 + $0x118] sm:$0xf0]  ;;  %v3097_v51 = vld [vmem:[%s5230_s5 + $0xe0] sm:$0xf]  ;;  %v3460_v52 = vld [vmem:[%s5230_s5 + $0xe4] sm:$0xf0] }
  0xad   :  { %v2870_v57 = vor.u32 %v3400_v55, %v2867_v56 }
  0xae   :  { %1118 = vmatpush.bf16.msra.mxu0 %v2742_v54  ;;  %v3098_v54 = vor.u32 %v3460_v52, %v3097_v51 }
  0xaf   :  { %v363_v63 = vpop.f32.mrf.mxu0  ;;  %v412_v0 = vpop.f32.mrf.mxu1  ;;  %1167 = vmatpush.bf16.msra.mxu1 %v2870_v57 }
  0xb0   :  { %v364_v3 = vadd.f32 %v363_v63, %v3954_v1  ;;  %v413_v4 = vadd.f32 %v412_v0, %v3956_v2 }
  0xb2   :  { %v450_v7 = vmax.f32 %v364_v3, 0.0  ;;  %v451_v8 = vmax.f32 %v413_v4, 0.0  ;;  %v457_v3 = vmax.f32 %v421_v61, 0.0  ;;  %v459_v4 = vmax.f32 %v423_v62, 0.0 }
  0xb4   :  { %v4048_v11 = vpack.c.bf16 %v450_v7, %v448_v5  ;;  %v4050_v12 = vpack.c.bf16 %v451_v8, %v449_v6  ;;  %v378_v6 = vpop.f32.mrf.mxu2  ;;  %v427_v7 = vpop.f32.mrf.mxu3  ;;  %v4127_v14 = vpack.c.bf16 %v459_v4, %v457_v3 }
  0xb6   :  { %835 = vmatmul.bf16.gmra.mxu2 %v4048_v11  ;;  %884 = vmatmul.bf16.gmra.mxu3 %v4050_v12 }
  0xb7   :  { %933 = vmatmul.bf16.gmra.mxu0 %v4048_v11  ;;  %982 = vmatmul.bf16.gmra.mxu1 %v4050_v12  ;;  %v366_v16 = vpop.f32.mrf.mxu0  ;;  %v415_v17 = vpop.f32.mrf.mxu1 }
  0xb8   :  { %v367_v32 = vadd.f32 %v366_v16, %v3954_v1  ;;  %v416_v33 = vadd.f32 %v415_v17, %v3956_v2  ;;  %v3374_v16 = vld [vmem:[%s5228_s3 + $0x34] sm:$0xf0]  ;;  %v2881_v17 = vld [vmem:[%s5228_s3 + $0x128] sm:$0xf] }
  0xb9   :  { %v2754_v18 = vor.u32 %v3374_v16, %v2753_v10  ;;  %v2882_v24 = vor.u32 %v3406_v19, %v2881_v17 }
  0xba   :  { %v452_v38 = vmax.f32 %v367_v32, 0.0  ;;  %v453_v39 = vmax.f32 %v416_v33, 0.0  ;;  %v379_v32 = vadd.f32 %v378_v6, %v3954_v1  ;;  %v428_v33 = vadd.f32 %v427_v7, %v3956_v2 }
  0xbb   :  { %1019 = vmatpush.bf16.msra.mxu2 %v2754_v18  ;;  %1068 = vmatpush.bf16.msra.mxu3 %v2882_v24 }
  0xbc   :  { %v381_v28 = vpop.f32.mrf.mxu2  ;;  %v430_v29 = vpop.f32.mrf.mxu3 }
  0xbd   :  { %v382_v58 = vadd.f32 %v381_v28, %v3954_v1  ;;  %v431_v59 = vadd.f32 %v430_v29, %v3956_v2  ;;  %v3042_v28 = vor.u32 %v3446_v25, %v3041_v9 }
  0xbf   :  { %v368_v34 = vpop.f32.mrf.mxu0  ;;  %v417_v35 = vpop.f32.mrf.mxu1  ;;  %1069 = vmatpush.bf16.msra.mxu3 %v2866_v53  ;;  %v465_v3 = vmax.f32 %v431_v59, 0.0 }
  0xc0   :  { %v369_v36 = vadd.f32 %v368_v34, %v3954_v1  ;;  %v418_v37 = vadd.f32 %v417_v35, %v3956_v2  ;;  %v460_v34 = vmax.f32 %v377_v30, 0.0  ;;  %v461_v35 = vmax.f32 %v426_v31, 0.0  ;;  %v4234_v30 = vld [vmem:[%s5231_s4] sm:$0xf]  ;;  %v3169_v31 = vld [vmem:[%s5230_s5 + $0x170] sm:$0xf] }
  0xc1   :  { %v4261_v50 = vperm.slane %v4234_v30, 0 }
  0xc2   :  { %v454_v40 = vmax.f32 %v369_v36, 0.0  ;;  %v455_v41 = vmax.f32 %v418_v37, 0.0  ;;  %v462_v36 = vmax.f32 %v379_v32, 0.0  ;;  %v463_v37 = vmax.f32 %v428_v33, 0.0  ;;  %v3478_v32 = vld [vmem:[%s5230_s5 + $0x174] sm:$0xf0] }
  0xc3   :  { %v3170_v33 = vor.u32 %v3478_v32, %v3169_v31 }
  0xc4   :  { %v4090_v42 = vpack.c.bf16 %v454_v40, %v452_v38  ;;  %v4092_v43 = vpack.c.bf16 %v455_v41, %v453_v39  ;;  %v4163_v38 = vpack.c.bf16 %v462_v36, %v460_v34  ;;  %v4165_v39 = vpack.c.bf16 %v463_v37, %v461_v35  ;;  %v383_v40 = vpop.f32.mrf.mxu2  ;;  %v432_v41 = vpop.f32.mrf.mxu3  ;;  %v3233_v35 = vld [vmem:[%s5230_s5 + $0x1f0] sm:$0xf]  ;;  %v3494_v36 = vld [vmem:[%s5230_s5 + $0x1f4] sm:$0xf0]  ;;  %v3033_v37 = vld [vmem:[%s5230_s5 + $0x60] sm:$0xf] }
  0xc5   :  { %v384_v60 = vadd.f32 %v383_v40, %v3954_v1  ;;  %v433_v61 = vadd.f32 %v432_v41, %v3956_v2  ;;  %v4243_v34 = vperm.slane %v4234_v30, 1  ;;  %1728 = vmatpush.bf16.msrb.mxu0 %v3170_v33  ;;  %v3234_v40 = vor.u32 %v3494_v36, %v3233_v35  ;;  %v3444_v41 = vld [vmem:[%s5230_s5 + $0x64] sm:$0xf0] }
  0xc6   :  { %840 = vmatmul.bf16.gmra.mxu2 %v4090_v42  ;;  %889 = vmatmul.bf16.gmra.mxu3 %v4092_v43 }
  0xc7   :  { %938 = vmatmul.bf16.gmra.mxu0 %v4090_v42  ;;  %987 = vmatmul.bf16.gmra.mxu1 %v4092_v43  ;;  %v371_v47 = vpop.f32.mrf.mxu0  ;;  %v466_v4 = vmax.f32 %v384_v60, 0.0 }
  0xc8   :  { %v372_v63 = vadd.f32 %v371_v47, %v3954_v1  ;;  %v3370_v47 = vld [vmem:[%s5228_s3 + $0x14] sm:$0xf0]  ;;  %1777 = vmatpush.bf16.msrb.mxu1 %v3234_v40 }
  0xc9   :  { %v2738_v49 = vor.u32 %v3370_v47, %v2737_v44  ;;  %v3034_v44 = vor.u32 %v3444_v41, %v3033_v37 }
  0xca   :  { %v456_v8 = vmax.f32 %v372_v63, 0.0 }
  0xcb   :  { %1020 = vmatpush.bf16.msra.mxu2 %v2738_v49 }
  0xcc   :  { %v386_v62 = vpop.f32.mrf.mxu2  ;;  %v435_v63 = vpop.f32.mrf.mxu3 }
  0xcd   :  { %v387_v10 = vadd.f32 %v386_v62, %v3954_v1  ;;  %v436_v16 = vadd.f32 %v435_v63, %v3956_v2  ;;  %v3161_v62 = vld [vmem:[%s5230_s5 + $0x160] sm:$0xf] }
  0xcf   :  { %v373_v0 = vpop.f32.mrf.mxu0  ;;  %v468_v19 = vmax.f32 %v387_v10, 0.0  ;;  %v469_v22 = vmax.f32 %v436_v16, 0.0  ;;  %1630 = vmatpush.bf16.msrb.mxu2 %v3042_v28 }
  0xd0   :  { %v374_v5 = vadd.f32 %v373_v0, %v3954_v1  ;;  %v464_v0 = vmax.f32 %v382_v58, 0.0 }
  0xd2   :  { %v458_v13 = vmax.f32 %v374_v5, 0.0  ;;  %v467_v5 = vmax.f32 %v433_v61, 0.0  ;;  %v4199_v6 = vpack.c.bf16 %v466_v4, %v464_v0 }
  0xd3   :  { %1631 = vmatpush.bf16.msrb.mxu2 %v3034_v44 }
  0xd4   :  { %v4129_v15 = vpack.c.bf16 %v458_v13, %v456_v8  ;;  %v4201_v7 = vpack.c.bf16 %v467_v5, %v465_v3  ;;  %v388_v8 = vpop.f32.mrf.mxu2  ;;  %v437_v13 = vpop.f32.mrf.mxu3 }
  0xd5   :  { %v389_v17 = vadd.f32 %v388_v8, %v3954_v1  ;;  %v438_v18 = vadd.f32 %v437_v13, %v3956_v2  ;;  %v3105_v1 = vld [vmem:[%s5230_s5 + $0xf0] sm:$0xf]  ;;  %v3462_v2 = vld [vmem:[%s5230_s5 + $0xf4] sm:$0xf0]  ;;  %v3225_v8 = vld [vmem:[%s5230_s5 + $0x1e0] sm:$0xf] }
  0xd6   :  { %845 = vmatmul.bf16.gmra.mxu2 %v4129_v15  ;;  %894 = vmatmul.bf16.gmra.mxu3 %v4127_v14  ;;  %v3106_v29 = vor.u32 %v3462_v2, %v3105_v1  ;;  %v3492_v13 = vld [vmem:[%s5230_s5 + $0x1e4] sm:$0xf0]  ;;  %v3089_v2 = vld [vmem:[%s5230_s5 + $0xd0] sm:$0xf] }
  0xd7   :  { %943 = vmatmul.bf16.gmra.mxu0 %v4129_v15  ;;  %992 = vmatmul.bf16.gmra.mxu1 %v4127_v14  ;;  %v470_v23 = vmax.f32 %v389_v17, 0.0  ;;  %v471_v24 = vmax.f32 %v438_v18, 0.0  ;;  %v3226_v16 = vor.u32 %v3492_v13, %v3225_v8  ;;  %v3025_v17 = vld [vmem:[%s5230_s5 + $0x50] sm:$0xf]  ;;  %v3442_v18 = vld [vmem:[%s5230_s5 + $0x54] sm:$0xf0] }
  0xd8   :  { %1679 = vmatpush.bf16.msrb.mxu3 %v3106_v29  ;;  %v3458_v29 = vld [vmem:[%s5230_s5 + $0xd4] sm:$0xf0]  ;;  %v3456_v8 = vld [vmem:[%s5230_s5 + $0xc4] sm:$0xf0] }
  0xd9   :  { %v4217_v26 = vpack.c.bf16 %v470_v23, %v468_v19  ;;  %v4219_v27 = vpack.c.bf16 %v471_v24, %v469_v22  ;;  %v3026_v22 = vor.u32 %v3442_v18, %v3025_v17  ;;  %1778 = vmatpush.bf16.msrb.mxu1 %v3226_v16  ;;  %v3090_v32 = vor.u32 %v3458_v29, %v3089_v2 }
  0xdb   :  { %1632 = vmatpush.bf16.msrb.mxu2 %v3026_v22 }
  0xdc   :  { %1680 = vmatpush.bf16.msrb.mxu3 %v3098_v54 }
  0xe0   :  { %1681 = vmatpush.bf16.msrb.mxu3 %v3090_v32 }
  0xe6   :  { %850 = vmatmul.bf16.gmra.mxu2 %v4163_v38  ;;  %899 = vmatmul.bf16.gmra.mxu3 %v4165_v39 }
  0xe7   :  { %948 = vmatmul.bf16.gmra.mxu0 %v4163_v38  ;;  %997 = vmatmul.bf16.gmra.mxu1 %v4165_v39 }
  0xf6   :  { %855 = vmatmul.bf16.gmra.mxu2 %v4199_v6  ;;  %904 = vmatmul.bf16.gmra.mxu3 %v4201_v7 }
  0xf7   :  { %953 = vmatmul.bf16.gmra.mxu0 %v4199_v6  ;;  %1002 = vmatmul.bf16.gmra.mxu1 %v4201_v7 }
 0x106   :  { %860 = vmatmul.bf16.gmra.mxu2 %v4217_v26  ;;  %909 = vmatmul.bf16.gmra.mxu3 %v4219_v27 }
 0x107   :  { %958 = vmatmul.bf16.gmra.mxu0 %v4217_v26  ;;  %1007 = vmatmul.bf16.gmra.mxu1 %v4219_v27 }
 0x114   :  { %v924_v47 = vpop.f32.mrf.mxu0  ;;  %v973_v48 = vpop.f32.mrf.mxu1 }
 0x115   :  { %v925_v49 = vadd.f32 %v924_v47, %v4243_v34 }
 0x116   :  { %1021 = vmatmul.bf16.vlgmr.msra.gmra.mxu2 %v3974_v20  ;;  %1070 = vmatmul.bf16.vlgmr.msra.gmra.mxu3 %v3976_v21 }
 0x117   :  { %v974_v53 = vadd.f32 %v973_v48, %v925_v49  ;;  %1119 = vmatmul.bf16.vlgmr.msra.gmra.mxu0 %v3974_v20  ;;  %1168 = vmatmul.bf16.vlgmr.msra.gmra.mxu1 %v3976_v21  ;;  %v3476_v20 = vld [vmem:[%s5230_s5 + $0x164] sm:$0xf0]  ;;  %v3153_v48 = vld [vmem:[%s5230_s5 + $0x150] sm:$0xf] }
 0x118   :  { %v3162_v63 = vor.u32 %v3476_v20, %v3161_v62 }
 0x119   :  { %v826_v55 = vpop.f32.mrf.mxu2  ;;  %v875_v56 = vpop.f32.mrf.mxu3  ;;  %v1210_v0 = vmax.f32 %v974_v53, 0.0 }
 0x11a   :  { %v827_v57 = vadd.f32 %v826_v55, %v4261_v50  ;;  %1729 = vmatpush.bf16.msrb.mxu0 %v3162_v63  ;;  %v3217_v55 = vld [vmem:[%s5230_s5 + $0x1d0] sm:$0xf] }
 0x11c   :  { %v876_v58 = vadd.f32 %v875_v56, %v827_v57  ;;  %v926_v59 = vpop.f32.mrf.mxu0  ;;  %v975_v60 = vpop.f32.mrf.mxu1  ;;  %v3490_v56 = vld [vmem:[%s5230_s5 + $0x1d4] sm:$0xf0] }
 0x11d   :  { %v927_v61 = vadd.f32 %v926_v59, %v4243_v34  ;;  %v3017_v59 = vld [vmem:[%s5230_s5 + $0x40] sm:$0xf] }
 0x11e   :  { %v1209_v28 = vmax.f32 %v876_v58, 0.0  ;;  %v3218_v58 = vor.u32 %v3490_v56, %v3217_v55  ;;  %v3454_v55 = vld [vmem:[%s5230_s5 + $0xb4] sm:$0xf0] }
 0x11f   :  { %v976_v21 = vadd.f32 %v975_v60, %v927_v61  ;;  %v3440_v60 = vld [vmem:[%s5230_s5 + $0x44] sm:$0xf0] }
 0x120   :  { %v3018_v61 = vor.u32 %v3440_v60, %v3017_v59  ;;  %1779 = vmatpush.bf16.msrb.mxu1 %v3218_v58 }
 0x121   :  { %v1214_v3 = vmax.f32 %v976_v21, 0.0  ;;  %v828_v4 = vpop.f32.mrf.mxu2  ;;  %v877_v5 = vpop.f32.mrf.mxu3 }
 0x122   :  { %v829_v10 = vadd.f32 %v828_v4, %v4261_v50  ;;  %1633 = vmatpush.bf16.msrb.mxu2 %v3018_v61 }
 0x123   :  { %v4292_v19 = vpack.c.bf16 %v1214_v3, %v1210_v0 }
 0x124   :  { %v878_v23 = vadd.f32 %v877_v5, %v829_v10  ;;  %v929_v24 = vpop.f32.mrf.mxu0  ;;  %v978_v9 = vpop.f32.mrf.mxu1  ;;  %v3081_v5 = vld [vmem:[%s5230_s5 + $0xc0] sm:$0xf] }
 0x125   :  { %v930_v25 = vadd.f32 %v929_v24, %v4243_v34  ;;  %v3082_v10 = vor.u32 %v3456_v8, %v3081_v5 }
 0x126   :  { %v1213_v1 = vmax.f32 %v878_v23, 0.0  ;;  %1026 = vmatmul.bf16.gmra.mxu2 %v4010_v45  ;;  %1075 = vmatmul.bf16.gmra.mxu3 %v4012_v46 }
 0x127   :  { %v979_v31 = vadd.f32 %v978_v9, %v930_v25  ;;  %1124 = vmatmul.bf16.gmra.mxu0 %v4010_v45  ;;  %1173 = vmatmul.bf16.gmra.mxu1 %v4012_v46  ;;  %v3474_v45 = vld [vmem:[%s5230_s5 + $0x154] sm:$0xf0] }
 0x128   :  { %v4305_v33 = vpack.c.bf16 %v1213_v1, %v1209_v28  ;;  %v3154_v49 = vor.u32 %v3474_v45, %v3153_v48  ;;  %1682 = vmatpush.bf16.msrb.mxu3 %v3082_v10  ;;  %v3145_v28 = vld [vmem:[%s5230_s5 + $0x140] sm:$0xf] }
 0x129   :  { %v831_v35 = vpop.f32.mrf.mxu2  ;;  %v880_v36 = vpop.f32.mrf.mxu3  ;;  %v1218_v51 = vmax.f32 %v979_v31, 0.0 }
 0x12a   :  { %v832_v37 = vadd.f32 %v831_v35, %v4261_v50  ;;  %1730 = vmatpush.bf16.msrb.mxu0 %v3154_v49  ;;  %v3209_v35 = vld [vmem:[%s5230_s5 + $0x1c0] sm:$0xf] }
 0x12c   :  { %v881_v40 = vadd.f32 %v880_v36, %v832_v37  ;;  %v931_v41 = vpop.f32.mrf.mxu0  ;;  %v980_v44 = vpop.f32.mrf.mxu1  ;;  %v3488_v36 = vld [vmem:[%s5230_s5 + $0x1c4] sm:$0xf0] }
 0x12d   :  { %v932_v47 = vadd.f32 %v931_v41, %v4243_v34  ;;  %v3009_v41 = vld [vmem:[%s5230_s5 + $0x30] sm:$0xf] }
 0x12e   :  { %v1217_v3 = vmax.f32 %v881_v40, 0.0  ;;  %v3210_v40 = vor.u32 %v3488_v36, %v3209_v35  ;;  %v3452_v35 = vld [vmem:[%s5230_s5 + $0xa4] sm:$0xf0] }
 0x12f   :  { %v981_v46 = vadd.f32 %v980_v44, %v932_v47  ;;  %v3438_v44 = vld [vmem:[%s5230_s5 + $0x34] sm:$0xf0] }
 0x130   :  { %v3010_v47 = vor.u32 %v3438_v44, %v3009_v41  ;;  %1780 = vmatpush.bf16.msrb.mxu1 %v3210_v40 }
 0x131   :  { %v1222_v52 = vmax.f32 %v981_v46, 0.0  ;;  %v833_v53 = vpop.f32.mrf.mxu2  ;;  %v882_v54 = vpop.f32.mrf.mxu3 }
 0x132   :  { %v834_v57 = vadd.f32 %v833_v53, %v4261_v50  ;;  %1634 = vmatpush.bf16.msrb.mxu2 %v3010_v47 }
 0x133   :  { %v4328_v62 = vpack.c.bf16 %v1222_v52, %v1218_v51 }
 0x134   :  { %v883_v20 = vadd.f32 %v882_v54, %v834_v57  ;;  %v934_v21 = vpop.f32.mrf.mxu0  ;;  %v983_v63 = vpop.f32.mrf.mxu1  ;;  %v3073_v54 = vld [vmem:[%s5230_s5 + $0xb0] sm:$0xf] }
 0x135   :  { %v935_v0 = vadd.f32 %v934_v21, %v4243_v34  ;;  %v3074_v57 = vor.u32 %v3454_v55, %v3073_v54  ;;  %v3193_v54 = vld [vmem:[%s5230_s5 + $0x1a0] sm:$0xf]  ;;  %v3484_v55 = vld [vmem:[%s5230_s5 + $0x1a4] sm:$0xf0] }
 0x136   :  { %v1221_v4 = vmax.f32 %v883_v20, 0.0  ;;  %1031 = vmatmul.bf16.gmra.mxu2 %v4048_v11  ;;  %1080 = vmatmul.bf16.gmra.mxu3 %v4050_v12 }
 0x137   :  { %v984_v13 = vadd.f32 %v983_v63, %v935_v0  ;;  %1129 = vmatmul.bf16.gmra.mxu0 %v4048_v11  ;;  %1178 = vmatmul.bf16.gmra.mxu1 %v4050_v12  ;;  %v3472_v11 = vld [vmem:[%s5230_s5 + $0x144] sm:$0xf0] }
 0x138   :  { %v4341_v16 = vpack.c.bf16 %v1221_v4, %v1217_v3  ;;  %v3146_v1 = vor.u32 %v3472_v11, %v3145_v28  ;;  %1683 = vmatpush.bf16.msrb.mxu3 %v3074_v57  ;;  %v3137_v3 = vld [vmem:[%s5230_s5 + $0x130] sm:$0xf]  ;;  %v3194_v57 = vor.u32 %v3484_v55, %v3193_v54 }
 0x139   :  { %v836_v17 = vpop.f32.mrf.mxu2  ;;  %v885_v18 = vpop.f32.mrf.mxu3  ;;  %v1226_v2 = vmax.f32 %v984_v13, 0.0 }
 0x13a   :  { %v837_v22 = vadd.f32 %v836_v17, %v4261_v50  ;;  %1731 = vmatpush.bf16.msrb.mxu0 %v3146_v1  ;;  %v3201_v17 = vld [vmem:[%s5230_s5 + $0x1b0] sm:$0xf] }
 0x13c   :  { %v886_v23 = vadd.f32 %v885_v18, %v837_v22  ;;  %v936_v24 = vpop.f32.mrf.mxu0  ;;  %v985_v9 = vpop.f32.mrf.mxu1  ;;  %v3486_v18 = vld [vmem:[%s5230_s5 + $0x1b4] sm:$0xf0] }
 0x13d   :  { %v937_v25 = vadd.f32 %v936_v24, %v4243_v34  ;;  %v3001_v24 = vld [vmem:[%s5230_s5 + $0x20] sm:$0xf] }
 0x13e   :  { %v1225_v52 = vmax.f32 %v886_v23, 0.0  ;;  %v3202_v23 = vor.u32 %v3486_v18, %v3201_v17 }
 0x13f   :  { %v986_v12 = vadd.f32 %v985_v9, %v937_v25  ;;  %v3436_v9 = vld [vmem:[%s5230_s5 + $0x24] sm:$0xf0] }
 0x140   :  { %v3002_v25 = vor.u32 %v3436_v9, %v3001_v24  ;;  %1781 = vmatpush.bf16.msrb.mxu1 %v3202_v23  ;;  %v3121_v9 = vld [vmem:[%s5230_s5 + $0x110] sm:$0xf] }
 0x141   :  { %v1230_v29 = vmax.f32 %v986_v12, 0.0  ;;  %v838_v31 = vpop.f32.mrf.mxu2  ;;  %v887_v32 = vpop.f32.mrf.mxu3 }
 0x142   :  { %v839_v37 = vadd.f32 %v838_v31, %v4261_v50  ;;  %1635 = vmatpush.bf16.msrb.mxu2 %v3002_v25 }
 0x143   :  { %v4364_v48 = vpack.c.bf16 %v1230_v29, %v1226_v2 }
 0x144   :  { %v888_v45 = vadd.f32 %v887_v32, %v839_v37  ;;  %v939_v46 = vpop.f32.mrf.mxu0  ;;  %v988_v49 = vpop.f32.mrf.mxu1  ;;  %v3065_v32 = vld [vmem:[%s5230_s5 + $0xa0] sm:$0xf]  ;;  %1782 = vmatpush.bf16.msrb.mxu1 %v3194_v57 }
 0x145   :  { %v940_v51 = vadd.f32 %v939_v46, %v4243_v34  ;;  %v3066_v37 = vor.u32 %v3452_v35, %v3065_v32  ;;  %v3432_v32 = vld [vmem:[%s5230_s5 + $0x4] sm:$0xf0]  ;;  %v3049_v35 = vld [vmem:[%s5230_s5 + $0x80] sm:$0xf] }
 0x146   :  { %v1229_v53 = vmax.f32 %v888_v45, 0.0  ;;  %1036 = vmatmul.bf16.gmra.mxu2 %v4090_v42  ;;  %1085 = vmatmul.bf16.gmra.mxu3 %v4092_v43 }
 0x147   :  { %v989_v56 = vadd.f32 %v988_v49, %v940_v51  ;;  %1134 = vmatmul.bf16.gmra.mxu0 %v4090_v42  ;;  %1183 = vmatmul.bf16.gmra.mxu1 %v4092_v43  ;;  %v3470_v42 = vld [vmem:[%s5230_s5 + $0x134] sm:$0xf0]  ;;  %v3129_v51 = vld [vmem:[%s5230_s5 + $0x120] sm:$0xf] }
 0x148   :  { %v4377_v58 = vpack.c.bf16 %v1229_v53, %v1225_v52  ;;  %v3138_v4 = vor.u32 %v3470_v42, %v3137_v3  ;;  %1684 = vmatpush.bf16.msrb.mxu3 %v3066_v37 }
 0x149   :  { %v841_v59 = vpop.f32.mrf.mxu2  ;;  %v890_v60 = vpop.f32.mrf.mxu3  ;;  %v1234_v5 = vmax.f32 %v989_v56, 0.0 }
 0x14a   :  { %v842_v61 = vadd.f32 %v841_v59, %v4261_v50  ;;  %1732 = vmatpush.bf16.msrb.mxu0 %v3138_v4  ;;  %v2993_v59 = vld [vmem:[%s5230_s5 + $0x10] sm:$0xf]  ;;  %v3450_v4 = vld [vmem:[%s5230_s5 + $0x94] sm:$0xf0] }
 0x14c   :  { %v891_v20 = vadd.f32 %v890_v60, %v842_v61  ;;  %v941_v21 = vpop.f32.mrf.mxu0  ;;  %v990_v63 = vpop.f32.mrf.mxu1  ;;  %v3434_v60 = vld [vmem:[%s5230_s5 + $0x14] sm:$0xf0] }
 0x14d   :  { %v942_v0 = vadd.f32 %v941_v21, %v4243_v34  ;;  %v2994_v61 = vor.u32 %v3434_v60, %v2993_v59 }
 0x14e   :  { %v1233_v29 = vmax.f32 %v891_v20, 0.0 }
 0x14f   :  { %v991_v43 = vadd.f32 %v990_v63, %v942_v0  ;;  %1636 = vmatpush.bf16.msrb.mxu2 %v2994_v61 }
 0x151   :  { %v1238_v8 = vmax.f32 %v991_v43, 0.0  ;;  %v843_v13 = vpop.f32.mrf.mxu2  ;;  %v892_v10 = vpop.f32.mrf.mxu3  ;;  %v3057_v43 = vld [vmem:[%s5230_s5 + $0x90] sm:$0xf] }
 0x152   :  { %v844_v22 = vadd.f32 %v843_v13, %v4261_v50 }
 0x153   :  { %v4400_v28 = vpack.c.bf16 %v1238_v8, %v1234_v5  ;;  %v3058_v8 = vor.u32 %v3450_v4, %v3057_v43  ;;  %v3445_v4 = vld [vmem:[%s5230_s5 + $0x74] sm:$0xf] }
 0x154   :  { %v893_v11 = vadd.f32 %v892_v10, %v844_v22  ;;  %v944_v12 = vpop.f32.mrf.mxu0  ;;  %v993_v1 = vpop.f32.mrf.mxu1 }
 0x155   :  { %v945_v2 = vadd.f32 %v944_v12, %v4243_v34  ;;  %1685 = vmatpush.bf16.msrb.mxu3 %v3058_v8  ;;  %v3185_v12 = vld [vmem:[%s5230_s5 + $0x190] sm:$0xf]  ;;  %v3043_v8 = vld [vmem:[%s5230_s5 + $0x78] sm:$0xf0] }
 0x156   :  { %v1237_v31 = vmax.f32 %v893_v11, 0.0  ;;  %1041 = vmatmul.bf16.gmra.mxu2 %v4129_v15  ;;  %1090 = vmatmul.bf16.gmra.mxu3 %v4127_v14 }
 0x157   :  { %v4411_v36 = vadd.f32 %v993_v1, %v945_v2  ;;  %1139 = vmatmul.bf16.gmra.mxu0 %v4129_v15  ;;  %1188 = vmatmul.bf16.gmra.mxu1 %v4127_v14  ;;  %v3468_v14 = vld [vmem:[%s5230_s5 + $0x124] sm:$0xf0]  ;;  %v3482_v1 = vld [vmem:[%s5230_s5 + $0x194] sm:$0xf0] }
 0x158   :  { %v4415_v40 = vpack.c.bf16 %v1237_v31, %v1233_v29  ;;  %v3130_v15 = vor.u32 %v3468_v14, %v3129_v51  ;;  %v3186_v29 = vor.u32 %v3482_v1, %v3185_v12  ;;  %v2985_v31 = vld [vmem:[%s5230_s5] sm:$0xf]  ;;  %v3107_v12 = vld [vmem:[%s5230_s5 + $0xf8] sm:$0xf0] }
 0x159   :  { %v846_v41 = vpop.f32.mrf.mxu2  ;;  %v895_v44 = vpop.f32.mrf.mxu3  ;;  %v2986_v37 = vor.u32 %v3432_v32, %v2985_v31 }
 0x15a   :  { %v847_v47 = vadd.f32 %v846_v41, %v4261_v50  ;;  %1733 = vmatpush.bf16.msrb.mxu0 %v3130_v15  ;;  %v3448_v41 = vld [vmem:[%s5230_s5 + $0x84] sm:$0xf0]  ;;  %1783 = vmatpush.bf16.msrb.mxu1 %v3186_v29 }
 0x15b   :  { %v3050_v51 = vor.u32 %v3448_v41, %v3049_v35  ;;  %1637 = vmatpush.bf16.msrb.mxu2 %v2986_v37  ;;  %v3477_v37 = vld [vmem:[%s5230_s5 + $0x174] sm:$0xf]  ;;  %v3171_v41 = vld [vmem:[%s5230_s5 + $0x178] sm:$0xf0] }
 0x15c   :  { %v896_v45 = vadd.f32 %v895_v44, %v847_v47  ;;  %v4418_v46 = vpop.f32.mrf.mxu0  ;;  %v4420_v49 = vpop.f32.mrf.mxu1 }
 0x15d   :  { %1686 = vmatpush.bf16.msrb.mxu3 %v3050_v51  ;;  %v3493_v51 = vld [vmem:[%s5230_s5 + $0x1f4] sm:$0xf] }
 0x15e   :  { %v1241_v3 = vmax.f32 %v896_v45, 0.0 }
 0x161   :  { %v848_v52 = vpop.f32.mrf.mxu2  ;;  %v897_v53 = vpop.f32.mrf.mxu3 }
 0x162   :  { %v849_v56 = vadd.f32 %v848_v52, %v4261_v50 }
 0x164   :  { %v898_v20 = vadd.f32 %v897_v53, %v849_v56  ;;  %v949_v21 = vpop.f32.mrf.mxu0  ;;  %v998_v63 = vpop.f32.mrf.mxu1 }
 0x165   :  { %v950_v0 = vadd.f32 %v949_v21, %v4243_v34  ;;  %v3177_v21 = vld [vmem:[%s5230_s5 + $0x180] sm:$0xf] }
 0x166   :  { %v1245_v42 = vmax.f32 %v898_v20, 0.0  ;;  %1046 = vmatmul.bf16.gmra.mxu2 %v4163_v38  ;;  %1095 = vmatmul.bf16.gmra.mxu3 %v4165_v39  ;;  %v3113_v20 = vld [vmem:[%s5230_s5 + $0x100] sm:$0xf] }
 0x167   :  { %v4450_v5 = vadd.f32 %v998_v63, %v950_v0  ;;  %1144 = vmatmul.bf16.gmra.mxu0 %v4163_v38  ;;  %1193 = vmatmul.bf16.gmra.mxu1 %v4165_v39  ;;  %v3466_v38 = vld [vmem:[%s5230_s5 + $0x114] sm:$0xf0]  ;;  %v3480_v63 = vld [vmem:[%s5230_s5 + $0x184] sm:$0xf0] }
 0x168   :  { %v4454_v13 = vpack.c.bf16 %v1245_v42, %v1241_v3  ;;  %v3122_v39 = vor.u32 %v3466_v38, %v3121_v9  ;;  %v3178_v0 = vor.u32 %v3480_v63, %v3177_v21  ;;  %v3459_v63 = vld [vmem:[%s5230_s5 + $0xe4] sm:$0xf] }
 0x169   :  { %v851_v10 = vpop.f32.mrf.mxu2  ;;  %v900_v17 = vpop.f32.mrf.mxu3 }
 0x16a   :  { %v852_v18 = vadd.f32 %v851_v10, %v4261_v50  ;;  %1734 = vmatpush.bf16.msrb.mxu0 %v3122_v39  ;;  %1784 = vmatpush.bf16.msrb.mxu1 %v3178_v0  ;;  %v3099_v0 = vld [vmem:[%s5230_s5 + $0xe8] sm:$0xf0] }
 0x16c   :  { %v901_v22 = vadd.f32 %v900_v17, %v852_v18  ;;  %v4457_v23 = vpop.f32.mrf.mxu0  ;;  %v4459_v24 = vpop.f32.mrf.mxu1 }
 0x16e   :  { %v1249_v15 = vmax.f32 %v901_v22, 0.0  ;;  %v3046_v22 = vor.u32 %v3445_v4, %v3043_v8 }
 0x170   :  { %1826 = vmatpush.bf16.msra.mxu2 %v3046_v22 }
 0x171   :  { %v853_v25 = vpop.f32.mrf.mxu2  ;;  %v902_v11 = vpop.f32.mrf.mxu3 }
 0x172   :  { %v854_v2 = vadd.f32 %v853_v25, %v4261_v50 }
 0x174   :  { %v903_v44 = vadd.f32 %v902_v11, %v854_v2  ;;  %v954_v47 = vpop.f32.mrf.mxu0  ;;  %v1003_v45 = vpop.f32.mrf.mxu1  ;;  %v3461_v11 = vld [vmem:[%s5230_s5 + $0xf4] sm:$0xf] }
 0x175   :  { %v955_v14 = vadd.f32 %v954_v47, %v4243_v34  ;;  %v3110_v31 = vor.u32 %v3461_v11, %v3107_v12  ;;  %v3163_v11 = vld [vmem:[%s5230_s5 + $0x168] sm:$0xf0] }
 0x176   :  { %v1253_v52 = vmax.f32 %v903_v44, 0.0  ;;  %1051 = vmatmul.bf16.gmra.mxu2 %v4199_v6  ;;  %1100 = vmatmul.bf16.gmra.mxu3 %v4201_v7  ;;  %v3174_v44 = vor.u32 %v3477_v37, %v3171_v41  ;;  %v3227_v37 = vld [vmem:[%s5230_s5 + $0x1e8] sm:$0xf0] }
 0x177   :  { %v4489_v53 = vadd.f32 %v1003_v45, %v955_v14  ;;  %1149 = vmatmul.bf16.gmra.mxu0 %v4199_v6  ;;  %1198 = vmatmul.bf16.gmra.mxu1 %v4201_v7  ;;  %v3464_v6 = vld [vmem:[%s5230_s5 + $0x104] sm:$0xf0]  ;;  %v3235_v14 = vld [vmem:[%s5230_s5 + $0x1f8] sm:$0xf0] }
 0x178   :  { %v4493_v54 = vpack.c.bf16 %v1253_v52, %v1249_v15  ;;  %v3114_v7 = vor.u32 %v3464_v6, %v3113_v20  ;;  %1875 = vmatpush.bf16.msra.mxu3 %v3110_v31  ;;  %v3238_v52 = vor.u32 %v3493_v51, %v3235_v14  ;;  %v3027_v51 = vld [vmem:[%s5230_s5 + $0x58] sm:$0xf0] }
 0x179   :  { %v856_v55 = vpop.f32.mrf.mxu2  ;;  %v905_v56 = vpop.f32.mrf.mxu3 }
 0x17a   :  { %v857_v57 = vadd.f32 %v856_v55, %v4261_v50  ;;  %1735 = vmatpush.bf16.msrb.mxu0 %v3114_v7  ;;  %v3443_v55 = vld [vmem:[%s5230_s5 + $0x64] sm:$0xf]  ;;  %1973 = vmatpush.bf16.msra.mxu1 %v3238_v52  ;;  %v4559_v7 = vperm.slane %v4234_v30, 3 }
 0x17c   :  { %v906_v59 = vadd.f32 %v905_v56, %v857_v57  ;;  %v4496_v60 = vpop.f32.mrf.mxu0  ;;  %v4498_v61 = vpop.f32.mrf.mxu1  ;;  %v3035_v56 = vld [vmem:[%s5230_s5 + $0x68] sm:$0xf0] }
 0x17d   :  { %v3038_v57 = vor.u32 %v3443_v55, %v3035_v56 }
 0x17e   :  { %v1257_v38 = vmax.f32 %v906_v59, 0.0  ;;  %1924 = vmatpush.bf16.msra.mxu0 %v3174_v44 }
 0x17f   :  { %1827 = vmatpush.bf16.msra.mxu2 %v3038_v57 }
 0x181   :  { %v858_v3 = vpop.f32.mrf.mxu2  ;;  %v907_v42 = vpop.f32.mrf.mxu3 }
 0x182   :  { %v859_v43 = vadd.f32 %v858_v3, %v4261_v50  ;;  %v3102_v3 = vor.u32 %v3459_v63, %v3099_v0 }
 0x184   :  { %v908_v10 = vadd.f32 %v907_v42, %v859_v43  ;;  %v959_v17 = vpop.f32.mrf.mxu0  ;;  %v1008_v18 = vpop.f32.mrf.mxu1  ;;  %1876 = vmatpush.bf16.msra.mxu3 %v3102_v3 }
 0x185   :  { %v960_v9 = vadd.f32 %v959_v17, %v4243_v34 }
 0x186   :  { %v1261_v39 = vmax.f32 %v908_v10, 0.0  ;;  %1056 = vmatmul.bf16.gmra.mxu2 %v4217_v26  ;;  %1105 = vmatmul.bf16.gmra.mxu3 %v4219_v27  ;;  %v4573_v10 = vperm.slane %v4234_v30, 2 }
 0x187   :  { %v4522_v25 = vadd.f32 %v1008_v18, %v960_v9  ;;  %1154 = vmatmul.bf16.gmra.mxu0 %v4217_v26  ;;  %1203 = vmatmul.bf16.gmra.mxu1 %v4219_v27 }
 0x188   :  { %v4532_v1 = vpack.c.bf16 %v1261_v39, %v1257_v38  ;;  %v3475_v39 = vld [vmem:[%s5230_s5 + $0x164] sm:$0xf] }
 0x189   :  { %v861_v2 = vpop.f32.mrf.mxu2  ;;  %v910_v29 = vpop.f32.mrf.mxu3 }
 0x18a   :  { %v862_v32 = vadd.f32 %v861_v2, %v4261_v50  ;;  %v3166_v2 = vor.u32 %v3475_v39, %v3163_v11 }
 0x18c   :  { %v911_v26 = vadd.f32 %v910_v29, %v862_v32  ;;  %v4535_v35 = vpop.f32.mrf.mxu0  ;;  %v4537_v27 = vpop.f32.mrf.mxu1  ;;  %1925 = vmatpush.bf16.msra.mxu0 %v3166_v2 }
 0x18e   :  { %v1265_v21 = vmax.f32 %v911_v26, 0.0  ;;  %v3491_v26 = vld [vmem:[%s5230_s5 + $0x1e4] sm:$0xf] }
 0x191   :  { %v863_v47 = vpop.f32.mrf.mxu2  ;;  %v912_v45 = vpop.f32.mrf.mxu3 }
 0x192   :  { %v864_v15 = vadd.f32 %v863_v47, %v4261_v50  ;;  %v3230_v47 = vor.u32 %v3491_v26, %v3227_v37 }
 0x194   :  { %v913_v59 = vadd.f32 %v912_v45, %v864_v15  ;;  %v1120_v20 = vpop.f32.mrf.mxu0  ;;  %v1169_v6 = vpop.f32.mrf.mxu1  ;;  %v3441_v45 = vld [vmem:[%s5230_s5 + $0x54] sm:$0xf]  ;;  %1974 = vmatpush.bf16.msra.mxu1 %v3230_v47 }
 0x195   :  { %v1121_v43 = vadd.f32 %v1120_v20, %v4559_v7  ;;  %v3030_v15 = vor.u32 %v3441_v45, %v3027_v51  ;;  %v3457_v20 = vld [vmem:[%s5230_s5 + $0xd4] sm:$0xf] }
 0x196   :  { %v1269_v50 = vmax.f32 %v913_v59, 0.0  ;;  %1638 = vmatmul.bf16.vlgmr.msrb.gmra.mxu2 %v4305_v33  ;;  %1687 = vmatmul.bf16.vlgmr.msrb.gmra.mxu3 %v4292_v19 }
 0x197   :  { %v1170_v22 = vadd.f32 %v1169_v6, %v1121_v43  ;;  %1828 = vmatpush.bf16.msra.mxu2 %v3030_v15  ;;  %v3091_v6 = vld [vmem:[%s5230_s5 + $0xd8] sm:$0xf0] }
 0x198   :  { %v4569_v42 = vpack.c.bf16 %v1269_v50, %v1265_v21  ;;  %v3094_v21 = vor.u32 %v3457_v20, %v3091_v6 }
 0x199   :  { %v1022_v4 = vpop.f32.mrf.mxu2  ;;  %v1071_v8 = vpop.f32.mrf.mxu3  ;;  %v1212_v29 = vmax.f32 %v1170_v22, 0.0  ;;  %v3473_v22 = vld [vmem:[%s5230_s5 + $0x154] sm:$0xf] }
 0x19a   :  { %v1023_v38 = vadd.f32 %v1022_v4, %v4573_v10  ;;  %1877 = vmatpush.bf16.msra.mxu3 %v3094_v21 }
 0x19c   :  { %v1122_v17 = vpop.f32.mrf.mxu0  ;;  %v1171_v18 = vpop.f32.mrf.mxu1  ;;  %v1072_v41 = vadd.f32 %v1071_v8, %v1023_v38 }
 0x19d   :  { %v1123_v9 = vadd.f32 %v1122_v17, %v4559_v7 }
 0x19e   :  { %v1211_v57 = vmax.f32 %v1072_v41, 0.0  ;;  %v3439_v41 = vld [vmem:[%s5230_s5 + $0x44] sm:$0xf] }
 0x19f   :  { %v1172_v12 = vadd.f32 %v1171_v18, %v1123_v9  ;;  %v3155_v9 = vld [vmem:[%s5230_s5 + $0x158] sm:$0xf0] }
 0x1a0   :  { %v3158_v39 = vor.u32 %v3473_v22, %v3155_v9  ;;  %v3147_v22 = vld [vmem:[%s5230_s5 + $0x148] sm:$0xf0] }
 0x1a1   :  { %v1216_v30 = vmax.f32 %v1172_v12, 0.0  ;;  %v1024_v31 = vpop.f32.mrf.mxu2  ;;  %v1073_v32 = vpop.f32.mrf.mxu3 }
 0x1a2   :  { %v1025_v44 = vadd.f32 %v1024_v31, %v4573_v10  ;;  %1926 = vmatpush.bf16.msra.mxu0 %v3158_v39  ;;  %v3219_v31 = vld [vmem:[%s5230_s5 + $0x1d8] sm:$0xf0] }
 0x1a3   :  { %v4596_v14 = vpack.c.bf16 %v1216_v30, %v1212_v29  ;;  %v3489_v30 = vld [vmem:[%s5230_s5 + $0x1d4] sm:$0xf] }
 0x1a4   :  { %v1074_v52 = vadd.f32 %v1073_v32, %v1025_v44  ;;  %v1125_v55 = vpop.f32.mrf.mxu0  ;;  %v1174_v56 = vpop.f32.mrf.mxu1  ;;  %v3222_v37 = vor.u32 %v3489_v30, %v3219_v31  ;;  %v3019_v44 = vld [vmem:[%s5230_s5 + $0x48] sm:$0xf0] }
 0x1a5   :  { %1785 = vmatmul.bf16.vlgmr.msrb.gmra.mxu1 %v4596_v14  ;;  %v1126_v63 = vadd.f32 %v1125_v55, %v4559_v7  ;;  %v3022_v45 = vor.u32 %v3439_v41, %v3019_v44  ;;  %v3211_v30 = vld [vmem:[%s5230_s5 + $0x1c8] sm:$0xf0]  ;;  %v3011_v41 = vld [vmem:[%s5230_s5 + $0x38] sm:$0xf0] }
 0x1a6   :  { %v1215_v59 = vmax.f32 %v1074_v52, 0.0  ;;  %1643 = vmatmul.bf16.gmra.mxu2 %v4341_v16  ;;  %1692 = vmatmul.bf16.gmra.mxu3 %v4328_v62 }
 0x1a7   :  { %v1175_v8 = vadd.f32 %v1174_v56, %v1126_v63  ;;  %1975 = vmatpush.bf16.msra.mxu1 %v3222_v37  ;;  %1829 = vmatpush.bf16.msra.mxu2 %v3022_v45  ;;  %v3437_v37 = vld [vmem:[%s5230_s5 + $0x34] sm:$0xf] }
 0x1a8   :  { %v4607_v50 = vpack.c.bf16 %v1215_v59, %v1211_v57  ;;  %v3455_v57 = vld [vmem:[%s5230_s5 + $0xc4] sm:$0xf]  ;;  %v3083_v59 = vld [vmem:[%s5230_s5 + $0xc8] sm:$0xf0]  ;;  %v3014_v45 = vor.u32 %v3437_v37, %v3011_v41 }
 0x1a9   :  { %v1027_v0 = vpop.f32.mrf.mxu2  ;;  %v1076_v3 = vpop.f32.mrf.mxu3  ;;  %v1220_v11 = vmax.f32 %v1175_v8, 0.0  ;;  %v3086_v20 = vor.u32 %v3455_v57, %v3083_v59  ;;  %v3453_v57 = vld [vmem:[%s5230_s5 + $0xb4] sm:$0xf]  ;;  %v3075_v59 = vld [vmem:[%s5230_s5 + $0xb8] sm:$0xf0] }
 0x1aa   :  { %1736 = vmatmul.bf16.vlgmr.msrb.gmra.mxu0 %v4607_v50  ;;  %v1028_v18 = vadd.f32 %v1027_v0, %v4573_v10 }
 0x1ab   :  { %1878 = vmatpush.bf16.msra.mxu3 %v3086_v20  ;;  %1830 = vmatpush.bf16.msra.mxu2 %v3014_v45  ;;  %v3078_v20 = vor.u32 %v3453_v57, %v3075_v59 }
 0x1ac   :  { %v1127_v43 = vpop.f32.mrf.mxu0  ;;  %v1176_v4 = vpop.f32.mrf.mxu1  ;;  %v1077_v32 = vadd.f32 %v1076_v3, %v1028_v18  ;;  %v3471_v18 = vld [vmem:[%s5230_s5 + $0x144] sm:$0xf] }
 0x1ad   :  { %v1128_v17 = vadd.f32 %v1127_v43, %v4559_v7 }
 0x1ae   :  { %v1219_v55 = vmax.f32 %v1077_v32, 0.0 }
 0x1af   :  { %v1177_v38 = vadd.f32 %v1176_v4, %v1128_v17  ;;  %1879 = vmatpush.bf16.msra.mxu3 %v3078_v20 }
 0x1b1   :  { %v1224_v12 = vmax.f32 %v1177_v38, 0.0  ;;  %v1029_v2 = vpop.f32.mrf.mxu2  ;;  %v1078_v29 = vpop.f32.mrf.mxu3  ;;  %v3150_v38 = vor.u32 %v3471_v18, %v3147_v22 }
 0x1b2   :  { %v1030_v26 = vadd.f32 %v1029_v2, %v4573_v10 }
 0x1b3   :  { %v4632_v47 = vpack.c.bf16 %v1224_v12, %v1220_v11  ;;  %1927 = vmatpush.bf16.msra.mxu0 %v3150_v38  ;;  %v3139_v38 = vld [vmem:[%s5230_s5 + $0x138] sm:$0xf0] }
 0x1b4   :  { %v1079_v51 = vadd.f32 %v1078_v29, %v1030_v26  ;;  %v1130_v15 = vpop.f32.mrf.mxu0  ;;  %v1179_v52 = vpop.f32.mrf.mxu1  ;;  %v3487_v29 = vld [vmem:[%s5230_s5 + $0x1c4] sm:$0xf] }
 0x1b5   :  { %1790 = vmatmul.bf16.gmra.mxu1 %v4632_v47  ;;  %v1131_v21 = vadd.f32 %v1130_v15, %v4559_v7  ;;  %v3214_v26 = vor.u32 %v3487_v29, %v3211_v30 }
 0x1b6   :  { %v1223_v56 = vmax.f32 %v1079_v51, 0.0  ;;  %1648 = vmatmul.bf16.gmra.mxu2 %v4377_v58  ;;  %1697 = vmatmul.bf16.gmra.mxu3 %v4364_v48 }
 0x1b7   :  { %v1180_v4 = vadd.f32 %v1179_v52, %v1131_v21  ;;  %1976 = vmatpush.bf16.msra.mxu1 %v3214_v26  ;;  %v947_v21 = vadd.f32 %v4418_v46, %v4243_v34  ;;  %v3469_v46 = vld [vmem:[%s5230_s5 + $0x134] sm:$0xf]  ;;  %v1242_v26 = vmax.f32 %v4411_v36, 0.0 }
 0x1b8   :  { %v4643_v6 = vpack.c.bf16 %v1223_v56, %v1219_v55 }
 0x1b9   :  { %v1032_v63 = vpop.f32.mrf.mxu2  ;;  %v1081_v0 = vpop.f32.mrf.mxu3  ;;  %v1228_v39 = vmax.f32 %v1180_v4, 0.0  ;;  %v996_v4 = vadd.f32 %v4420_v49, %v947_v21 }
 0x1ba   :  { %1741 = vmatmul.bf16.gmra.mxu0 %v4643_v6  ;;  %v1033_v17 = vadd.f32 %v1032_v63, %v4573_v10 }
 0x1bc   :  { %v1132_v3 = vpop.f32.mrf.mxu0  ;;  %v1181_v43 = vpop.f32.mrf.mxu1  ;;  %v1082_v31 = vadd.f32 %v1081_v0, %v1033_v17 }
 0x1bd   :  { %v1133_v8 = vadd.f32 %v1132_v3, %v4559_v7 }
 0x1be   :  { %v1227_v55 = vmax.f32 %v1082_v31, 0.0  ;;  %v3485_v31 = vld [vmem:[%s5230_s5 + $0x1b4] sm:$0xf] }
 0x1bf   :  { %v1182_v9 = vadd.f32 %v1181_v43, %v1133_v8 }
 0x1c1   :  { %v1232_v11 = vmax.f32 %v1182_v9, 0.0  ;;  %v1034_v12 = vpop.f32.mrf.mxu2  ;;  %v1083_v2 = vpop.f32.mrf.mxu3 }
 0x1c2   :  { %v1035_v32 = vadd.f32 %v1034_v12, %v4573_v10  ;;  %v1246_v12 = vmax.f32 %v996_v4, 0.0  ;;  %v952_v4 = vadd.f32 %v4457_v23, %v4243_v34  ;;  %v3467_v23 = vld [vmem:[%s5230_s5 + $0x124] sm:$0xf] }
 0x1c3   :  { %v4668_v44 = vpack.c.bf16 %v1232_v11, %v1228_v39  ;;  %v3142_v11 = vor.u32 %v3469_v46, %v3139_v38 }
 0x1c4   :  { %v1084_v51 = vadd.f32 %v1083_v2, %v1035_v32  ;;  %v1135_v15 = vpop.f32.mrf.mxu0  ;;  %v1184_v52 = vpop.f32.mrf.mxu1  ;;  %v3203_v32 = vld [vmem:[%s5230_s5 + $0x1b8] sm:$0xf0]  ;;  %v4710_v20 = vpack.c.bf16 %v1246_v12, %v1242_v26 }
 0x1c5   :  { %1795 = vmatmul.bf16.gmra.mxu1 %v4668_v44  ;;  %v1136_v0 = vadd.f32 %v1135_v15, %v4559_v7  ;;  %1928 = vmatpush.bf16.msra.mxu0 %v3142_v11  ;;  %v3206_v45 = vor.u32 %v3485_v31, %v3203_v32  ;;  %v3003_v15 = vld [vmem:[%s5230_s5 + $0x28] sm:$0xf0] }
 0x1c6   :  { %v1231_v56 = vmax.f32 %v1084_v51, 0.0  ;;  %1653 = vmatmul.bf16.gmra.mxu2 %v4415_v40  ;;  %1702 = vmatmul.bf16.gmra.mxu3 %v4400_v28  ;;  %v3435_v51 = vld [vmem:[%s5230_s5 + $0x24] sm:$0xf] }
 0x1c7   :  { %v1185_v18 = vadd.f32 %v1184_v52, %v1136_v0  ;;  %1977 = vmatpush.bf16.msra.mxu1 %v3206_v45  ;;  %v3451_v0 = vld [vmem:[%s5230_s5 + $0xa4] sm:$0xf]  ;;  %v1250_v45 = vmax.f32 %v4450_v5, 0.0 }
 0x1c8   :  { %v4681_v63 = vpack.c.bf16 %v1231_v56, %v1227_v55  ;;  %v3006_v55 = vor.u32 %v3435_v51, %v3003_v15 }
 0x1c9   :  { %v1037_v3 = vpop.f32.mrf.mxu2  ;;  %v1086_v43 = vpop.f32.mrf.mxu3  ;;  %v1236_v2 = vmax.f32 %v1185_v18, 0.0 }
 0x1ca   :  { %1746 = vmatmul.bf16.gmra.mxu0 %v4681_v63  ;;  %v1038_v9 = vadd.f32 %v1037_v3, %v4573_v10  ;;  %1831 = vmatpush.bf16.msra.mxu2 %v3006_v55  ;;  %v3067_v3 = vld [vmem:[%s5230_s5 + $0xa8] sm:$0xf0] }
 0x1cc   :  { %v1137_v8 = vpop.f32.mrf.mxu0  ;;  %v1186_v17 = vpop.f32.mrf.mxu1  ;;  %v1087_v37 = vadd.f32 %v1086_v43, %v1038_v9  ;;  %v3070_v43 = vor.u32 %v3451_v0, %v3067_v3  ;;  %v1001_v9 = vadd.f32 %v4459_v24, %v952_v4 }
 0x1cd   :  { %v1138_v22 = vadd.f32 %v1137_v8, %v4559_v7 }
 0x1ce   :  { %v1235_v36 = vmax.f32 %v1087_v37, 0.0  ;;  %1880 = vmatpush.bf16.msra.mxu3 %v3070_v43  ;;  %v3483_v37 = vld [vmem:[%s5230_s5 + $0x1a4] sm:$0xf] }
 0x1cf   :  { %v1187_v39 = vadd.f32 %v1186_v17, %v1138_v22 }
 0x1d1   :  { %v1240_v49 = vmax.f32 %v1187_v39, 0.0  ;;  %v1039_v29 = vpop.f32.mrf.mxu2  ;;  %v1088_v30 = vpop.f32.mrf.mxu3 }
 0x1d2   :  { %v1040_v41 = vadd.f32 %v1039_v29, %v4573_v10 }
 0x1d3   :  { %v4708_v52 = vpack.c.bf16 %v1240_v49, %v1236_v2  ;;  %v3131_v2 = vld [vmem:[%s5230_s5 + $0x128] sm:$0xf0] }
 0x1d4   :  { %v1089_v56 = vadd.f32 %v1088_v30, %v1040_v41  ;;  %v1140_v57 = vpop.f32.mrf.mxu0  ;;  %v1189_v59 = vpop.f32.mrf.mxu1  ;;  %v3134_v29 = vor.u32 %v3467_v23, %v3131_v2  ;;  %v1254_v30 = vmax.f32 %v1001_v9, 0.0  ;;  %v3195_v41 = vld [vmem:[%s5230_s5 + $0x1a8] sm:$0xf0]  ;;  %v957_v9 = vadd.f32 %v4496_v60, %v4243_v34  ;;  %v3465_v60 = vld [vmem:[%s5230_s5 + $0x114] sm:$0xf] }
 0x1d5   :  { %1800 = vmatmul.bf16.gmra.mxu1 %v4708_v52  ;;  %v1141_v17 = vadd.f32 %v1140_v57, %v4559_v7  ;;  %v3198_v55 = vor.u32 %v3483_v37, %v3195_v41  ;;  %v2995_v57 = vld [vmem:[%s5230_s5 + $0x18] sm:$0xf0] }
 0x1d6   :  { %v1239_v21 = vmax.f32 %v1089_v56, 0.0  ;;  %1658 = vmatmul.bf16.gmra.mxu2 %v4454_v13  ;;  %1707 = vmatmul.bf16.gmra.mxu3 %v4710_v20  ;;  %v3433_v56 = vld [vmem:[%s5230_s5 + $0x14] sm:$0xf]  ;;  %v4752_v43 = vpack.c.bf16 %v1254_v30, %v1250_v45 }
 0x1d7   :  { %v1190_v39 = vadd.f32 %v1189_v59, %v1141_v17  ;;  %1929 = vmatpush.bf16.msra.mxu0 %v3134_v29  ;;  %1978 = vmatpush.bf16.msra.mxu1 %v3198_v55  ;;  %v3449_v17 = vld [vmem:[%s5230_s5 + $0x94] sm:$0xf]  ;;  %v3187_v55 = vld [vmem:[%s5230_s5 + $0x198] sm:$0xf0] }
 0x1d8   :  { %v4723_v8 = vpack.c.bf16 %v1239_v21, %v1235_v36  ;;  %v2998_v36 = vor.u32 %v3433_v56, %v2995_v57 }
 0x1d9   :  { %v1042_v18 = vpop.f32.mrf.mxu2  ;;  %v1091_v22 = vpop.f32.mrf.mxu3  ;;  %v1244_v31 = vmax.f32 %v1190_v39, 0.0 }
 0x1da   :  { %1751 = vmatmul.bf16.gmra.mxu0 %v4723_v8  ;;  %v1043_v12 = vadd.f32 %v1042_v18, %v4573_v10  ;;  %1832 = vmatpush.bf16.msra.mxu2 %v2998_v36  ;;  %v3059_v18 = vld [vmem:[%s5230_s5 + $0x98] sm:$0xf0] }
 0x1dc   :  { %v1142_v46 = vpop.f32.mrf.mxu0  ;;  %v1191_v38 = vpop.f32.mrf.mxu1  ;;  %v1092_v51 = vadd.f32 %v1091_v22, %v1043_v12  ;;  %v3062_v22 = vor.u32 %v3449_v17, %v3059_v18  ;;  %v1006_v12 = vadd.f32 %v4498_v61, %v957_v9 }
 0x1dd   :  { %v1143_v11 = vadd.f32 %v1142_v46, %v4559_v7 }
 0x1de   :  { %v1243_v5 = vmax.f32 %v1092_v51, 0.0  ;;  %1881 = vmatpush.bf16.msra.mxu3 %v3062_v22  ;;  %v1262_v61 = vmax.f32 %v1006_v12, 0.0  ;;  %v962_v12 = vadd.f32 %v4535_v35, %v4243_v34  ;;  %v3115_v34 = vld [vmem:[%s5230_s5 + $0x108] sm:$0xf0]  ;;  %v3479_v35 = vld [vmem:[%s5230_s5 + $0x184] sm:$0xf] }
 0x1df   :  { %v1192_v49 = vadd.f32 %v1191_v38, %v1143_v11 }
 0x1e1   :  { %v1248_v24 = vmax.f32 %v1192_v49, 0.0  ;;  %v1044_v32 = vpop.f32.mrf.mxu2  ;;  %v1093_v26 = vpop.f32.mrf.mxu3 }
 0x1e2   :  { %v1045_v15 = vadd.f32 %v1044_v32, %v4573_v10 }
 0x1e3   :  { %v4750_v59 = vpack.c.bf16 %v1248_v24, %v1244_v31  ;;  %v3123_v31 = vld [vmem:[%s5230_s5 + $0x118] sm:$0xf0] }
 0x1e4   :  { %v1094_v21 = vadd.f32 %v1093_v26, %v1045_v15  ;;  %v1145_v0 = vpop.f32.mrf.mxu0  ;;  %v1194_v3 = vpop.f32.mrf.mxu1  ;;  %v3126_v32 = vor.u32 %v3465_v60, %v3123_v31  ;;  %v1258_v26 = vmax.f32 %v4489_v53, 0.0  ;;  %v3481_v15 = vld [vmem:[%s5230_s5 + $0x194] sm:$0xf]  ;;  %v3431_v53 = vld [vmem:[%s5230_s5 + $0x4] sm:$0xf] }
 0x1e5   :  { %1805 = vmatmul.bf16.gmra.mxu1 %v4750_v59  ;;  %v1146_v38 = vadd.f32 %v1145_v0, %v4559_v7  ;;  %v3190_v36 = vor.u32 %v3481_v15, %v3187_v55  ;;  %v3447_v0 = vld [vmem:[%s5230_s5 + $0x84] sm:$0xf] }
 0x1e6   :  { %v1247_v4 = vmax.f32 %v1094_v21, 0.0  ;;  %1663 = vmatmul.bf16.gmra.mxu2 %v4493_v54  ;;  %1712 = vmatmul.bf16.gmra.mxu3 %v4752_v43  ;;  %v2987_v21 = vld [vmem:[%s5230_s5 + $0x8] sm:$0xf0]  ;;  %v4800_v9 = vpack.c.bf16 %v1262_v61, %v1258_v26 }
 0x1e7   :  { %v1195_v49 = vadd.f32 %v1194_v3, %v1146_v38  ;;  %1930 = vmatpush.bf16.msra.mxu0 %v3126_v32  ;;  %1979 = vmatpush.bf16.msra.mxu1 %v3190_v36  ;;  %v1266_v36 = vmax.f32 %v4522_v25, 0.0 }
 0x1e8   :  { %v4765_v46 = vpack.c.bf16 %v1247_v4, %v1243_v5  ;;  %v2990_v5 = vor.u32 %v3431_v53, %v2987_v21  ;;  %v3051_v4 = vld [vmem:[%s5230_s5 + $0x88] sm:$0xf0] }
 0x1e9   :  { %v1047_v39 = vpop.f32.mrf.mxu2  ;;  %v1096_v11 = vpop.f32.mrf.mxu3  ;;  %v1252_v37 = vmax.f32 %v1195_v49, 0.0  ;;  %v3054_v38 = vor.u32 %v3447_v0, %v3051_v4 }
 0x1ea   :  { %1756 = vmatmul.bf16.gmra.mxu0 %v4765_v46  ;;  %v1048_v30 = vadd.f32 %v1047_v39, %v4573_v10  ;;  %1833 = vmatpush.bf16.msra.mxu2 %v2990_v5 }
 0x1eb   :  { %1882 = vmatpush.bf16.msra.mxu3 %v3054_v38 }
 0x1ec   :  { %v1147_v23 = vpop.f32.mrf.mxu0  ;;  %v1196_v2 = vpop.f32.mrf.mxu1  ;;  %v1097_v56 = vadd.f32 %v1096_v11, %v1048_v30  ;;  %v1011_v30 = vadd.f32 %v4537_v27, %v962_v12  ;;  %v3179_v27 = vld [vmem:[%s5230_s5 + $0x188] sm:$0xf0] }
 0x1ed   :  { %v1148_v29 = vadd.f32 %v1147_v23, %v4559_v7 }
 0x1ee   :  { %v1251_v39 = vmax.f32 %v1097_v56, 0.0 }
 0x1ef   :  { %v1197_v24 = vadd.f32 %v1196_v2, %v1148_v29 }
 0x1f1   :  { %v1256_v41 = vmax.f32 %v1197_v24, 0.0  ;;  %v1049_v45 = vpop.f32.mrf.mxu2  ;;  %v1098_v51 = vpop.f32.mrf.mxu3  ;;  %v3463_v24 = vld [vmem:[%s5230_s5 + $0x104] sm:$0xf] }
 0x1f2   :  { %v1050_v57 = vadd.f32 %v1049_v45, %v4573_v10  ;;  %v3118_v61 = vor.u32 %v3463_v24, %v3115_v34 }
 0x1f3   :  { %v4795_v3 = vpack.c.bf16 %v1256_v41, %v1252_v37  ;;  %v3182_v41 = vor.u32 %v3479_v35, %v3179_v27 }
 0x1f4   :  { %v1099_v17 = vadd.f32 %v1098_v51, %v1050_v57  ;;  %v1150_v18 = vpop.f32.mrf.mxu0  ;;  %v1199_v22 = vpop.f32.mrf.mxu1  ;;  %1931 = vmatpush.bf16.msra.mxu0 %v3118_v61  ;;  %v1270_v51 = vmax.f32 %v1011_v30, 0.0 }
 0x1f5   :  { %1810 = vmatmul.bf16.gmra.mxu1 %v4795_v3  ;;  %v1151_v2 = vadd.f32 %v1150_v18, %v4559_v7 }
 0x1f6   :  { %v1255_v11 = vmax.f32 %v1099_v17, 0.0  ;;  %1668 = vmatmul.bf16.gmra.mxu2 %v4532_v1  ;;  %1717 = vmatmul.bf16.gmra.mxu3 %v4800_v9  ;;  %v4830_v18 = vpack.c.bf16 %v1270_v51, %v1266_v36 }
 0x1f7   :  { %v1200_v32 = vadd.f32 %v1199_v22, %v1151_v2  ;;  %1980 = vmatpush.bf16.msra.mxu1 %v3182_v41 }
 0x1f8   :  { %v4807_v23 = vpack.c.bf16 %v1255_v11, %v1251_v39 }
 0x1f9   :  { %v1052_v49 = vpop.f32.mrf.mxu2  ;;  %v1101_v29 = vpop.f32.mrf.mxu3  ;;  %v1260_v15 = vmax.f32 %v1200_v32, 0.0 }
 0x1fa   :  { %1761 = vmatmul.bf16.gmra.mxu0 %v4807_v23  ;;  %v1053_v37 = vadd.f32 %v1052_v49, %v4573_v10 }
 0x1fc   :  { %v1152_v60 = vpop.f32.mrf.mxu0  ;;  %v1201_v31 = vpop.f32.mrf.mxu1  ;;  %v1102_v53 = vadd.f32 %v1101_v29, %v1053_v37  ;;  %v4847_v37 = vld [vmem:[%s5232_s6] sm:$0x3] }
 0x1fd   :  { %v1153_v26 = vadd.f32 %v1152_v60, %v4559_v7  ;;  %v4853_v51 = vperm.slane %v4847_v37, 0 }
 0x1fe   :  { %v1259_v22 = vmax.f32 %v1102_v53, 0.0 }
 0x1ff   :  { %v1202_v45 = vadd.f32 %v1201_v31, %v1153_v26 }
 0x201   :  { %v1264_v55 = vmax.f32 %v1202_v45, 0.0  ;;  %v1054_v56 = vpop.f32.mrf.mxu2  ;;  %v1103_v57 = vpop.f32.mrf.mxu3 }
 0x202   :  { %v1055_v21 = vadd.f32 %v1054_v56, %v4573_v10 }
 0x203   :  { %v4828_v0 = vpack.c.bf16 %v1264_v55, %v1260_v15 }
 0x204   :  { %v1104_v5 = vadd.f32 %v1103_v57, %v1055_v21  ;;  %v1155_v4 = vpop.f32.mrf.mxu0  ;;  %v1204_v17 = vpop.f32.mrf.mxu1 }
 0x205   :  { %1815 = vmatmul.bf16.gmra.mxu1 %v4828_v0  ;;  %v1156_v25 = vadd.f32 %v1155_v4, %v4559_v7 }
 0x206   :  { %v1263_v38 = vmax.f32 %v1104_v5, 0.0  ;;  %1673 = vmatmul.bf16.gmra.mxu2 %v4569_v42  ;;  %1722 = vmatmul.bf16.gmra.mxu3 %v4830_v18 }
 0x207   :  { %v1205_v49 = vadd.f32 %v1204_v17, %v1156_v25  ;;  %v3501_v17 = vld [vmem:[%s5233_s7 + $0x30] sm:$0xff] }
 0x208   :  { %v4835_v39 = vpack.c.bf16 %v1263_v38, %v1259_v22 }
 0x209   :  { %v1057_v11 = vpop.f32.mrf.mxu2  ;;  %v1106_v12 = vpop.f32.mrf.mxu3  ;;  %v1268_v24 = vmax.f32 %v1205_v49, 0.0 }
 0x20a   :  { %1766 = vmatmul.bf16.gmra.mxu0 %v4835_v39  ;;  %v1058_v30 = vadd.f32 %v1057_v11, %v4573_v10 }
 0x20c   :  { %v1157_v2 = vpop.f32.mrf.mxu0  ;;  %v1206_v60 = vpop.f32.mrf.mxu1  ;;  %v1107_v26 = vadd.f32 %v1106_v12, %v1058_v30 }
 0x20d   :  { %v1158_v29 = vadd.f32 %v1157_v2, %v4559_v7 }
 0x20e   :  { %v1267_v7 = vmax.f32 %v1107_v26, 0.0 }
 0x20f   :  { %v1207_v31 = vadd.f32 %v1206_v60, %v1158_v29 }
 0x211   :  { %v1272_v34 = vmax.f32 %v1207_v31, 0.0  ;;  %v1059_v35 = vpop.f32.mrf.mxu2  ;;  %v1108_v32 = vpop.f32.mrf.mxu3 }
 0x212   :  { %v1060_v61 = vadd.f32 %v1059_v35, %v4573_v10  ;;  %v3502_v10 = vld [vmem:[%s5233_s7 + $0x38] sm:$0xff] }
 0x213   :  { %v4842_v27 = vpack.c.bf16 %v1272_v34, %v1268_v24  ;;  %2169 = vmatpush.bf16.msrb.mxu2 %v3502_v10 }
 0x214   :  { %v1109_v41 = vadd.f32 %v1108_v32, %v1060_v61  ;;  %v3500_v61 = vld [vmem:[%s5233_s7 + $0x28] sm:$0xff] }
 0x215   :  { %1820 = vmatmul.bf16.gmra.mxu1 %v4842_v27 }
 0x216   :  { %v1271_v45 = vmax.f32 %v1109_v41, 0.0  ;;  %1834 = vmatmul.bf16.vlgmr.msra.gmra.mxu2 %v4305_v33  ;;  %1883 = vmatmul.bf16.vlgmr.msra.gmra.mxu3 %v4292_v19  ;;  %v3510_v19 = vld [vmem:[%s5233_s7 + $0x78] sm:$0xff] }
 0x217   :  { %2218 = vmatpush.bf16.msrb.mxu3 %v3510_v19  ;;  %2170 = vmatpush.bf16.msrb.mxu2 %v3501_v17 }
 0x218   :  { %v4858_v15 = vpack.c.bf16 %v1271_v45, %v1267_v7 }
 0x219   :  { %v1639_v55 = vpop.f32.mrf.mxu2  ;;  %v1688_v56 = vpop.f32.mrf.mxu3 }
 0x21a   :  { %v1640_v57 = vadd.f32 %v1639_v55, %v4853_v51  ;;  %1771 = vmatmul.bf16.gmra.mxu0 %v4858_v15 }
 0x21b   :  { %2171 = vmatpush.bf16.msrb.mxu2 %v3500_v61 }
 0x21c   :  { %v1689_v36 = vadd.f32 %v1688_v56, %v1640_v57 }
 0x221   :  { %v1641_v33 = vpop.f32.mrf.mxu2  ;;  %v1690_v53 = vpop.f32.mrf.mxu3 }
 0x222   :  { %v1642_v21 = vadd.f32 %v1641_v33, %v4853_v51  ;;  %v1786_v5 = vpop.f32.mrf.mxu1 }
 0x224   :  { %v1691_v4 = vadd.f32 %v1690_v53, %v1642_v21 }
 0x225   :  { %1981 = vmatmul.bf16.vlgmr.msra.gmra.mxu1 %v4596_v14 }
 0x226   :  { %1839 = vmatmul.bf16.gmra.mxu2 %v4341_v16  ;;  %1888 = vmatmul.bf16.gmra.mxu3 %v4328_v62  ;;  %v3509_v62 = vld [vmem:[%s5233_s7 + $0x70] sm:$0xff] }
 0x227   :  { %v1737_v22 = vpop.f32.mrf.mxu0  ;;  %2219 = vmatpush.bf16.msrb.mxu3 %v3509_v62 }
 0x228   :  { %v1738_v38 = vadd.f32 %v1737_v22, %v1689_v36 }
 0x229   :  { %v1644_v25 = vpop.f32.mrf.mxu2  ;;  %v1693_v11 = vpop.f32.mrf.mxu3 }
 0x22a   :  { %v1787_v12 = vadd.f32 %v1786_v5, %v1738_v38  ;;  %v1645_v2 = vadd.f32 %v1644_v25, %v4853_v51  ;;  %v1788_v49 = vpop.f32.mrf.mxu1  ;;  %1932 = vmatmul.bf16.vlgmr.msra.gmra.mxu0 %v4607_v50 }
 0x22c   :  { %v1694_v14 = vadd.f32 %v1693_v11, %v1645_v2  ;;  %v2022_v35 = vmax.f32 %v1787_v12, 0.0 }
 0x22f   :  { %v1739_v16 = vpop.f32.mrf.mxu0 }
 0x230   :  { %v1740_v29 = vadd.f32 %v1739_v16, %v1691_v4 }
 0x231   :  { %v1646_v30 = vpop.f32.mrf.mxu2  ;;  %v1695_v60 = vpop.f32.mrf.mxu3 }
 0x232   :  { %v1789_v31 = vadd.f32 %v1788_v49, %v1740_v29  ;;  %v1647_v24 = vadd.f32 %v1646_v30, %v4853_v51  ;;  %v1791_v34 = vpop.f32.mrf.mxu1 }
 0x234   :  { %v2024_v32 = vmax.f32 %v1789_v31, 0.0  ;;  %v1696_v26 = vadd.f32 %v1695_v60, %v1647_v24 }
 0x235   :  { %1986 = vmatmul.bf16.gmra.mxu1 %v4632_v47 }
 0x236   :  { %v4879_v50 = vpack.c.bf16 %v2024_v32, %v2022_v35  ;;  %1844 = vmatmul.bf16.gmra.mxu2 %v4377_v58  ;;  %1893 = vmatmul.bf16.gmra.mxu3 %v4364_v48  ;;  %v3508_v48 = vld [vmem:[%s5233_s7 + $0x68] sm:$0xff] }
 0x237   :  { %v1742_v41 = vpop.f32.mrf.mxu0  ;;  %2220 = vmatpush.bf16.msrb.mxu3 %v3508_v48 }
 0x238   :  { %v1743_v7 = vadd.f32 %v1742_v41, %v1694_v14 }
 0x239   :  { %v1649_v45 = vpop.f32.mrf.mxu2  ;;  %v1698_v10 = vpop.f32.mrf.mxu3 }
 0x23a   :  { %v1792_v55 = vadd.f32 %v1791_v34, %v1743_v7  ;;  %v1650_v56 = vadd.f32 %v1649_v45, %v4853_v51  ;;  %v1793_v57 = vpop.f32.mrf.mxu1  ;;  %1937 = vmatmul.bf16.gmra.mxu0 %v4643_v6  ;;  %v3499_v6 = vld [vmem:[%s5233_s7 + $0x20] sm:$0xff] }
 0x23b   :  { %2172 = vmatpush.bf16.msrb.mxu2 %v3499_v6 }
 0x23c   :  { %v1699_v47 = vadd.f32 %v1698_v10, %v1650_v56  ;;  %v2026_v4 = vmax.f32 %v1792_v55, 0.0 }
 0x23f   :  { %v1744_v58 = vpop.f32.mrf.mxu0 }
 0x240   :  { %v1745_v36 = vadd.f32 %v1744_v58, %v1696_v26 }
 0x241   :  { %v1651_v19 = vpop.f32.mrf.mxu2  ;;  %v1700_v33 = vpop.f32.mrf.mxu3 }
 0x242   :  { %v1794_v53 = vadd.f32 %v1793_v57, %v1745_v36  ;;  %v1652_v21 = vadd.f32 %v1651_v19, %v4853_v51  ;;  %v1796_v5 = vpop.f32.mrf.mxu1 }
 0x244   :  { %v2028_v17 = vmax.f32 %v1794_v53, 0.0  ;;  %v1701_v22 = vadd.f32 %v1700_v33, %v1652_v21 }
 0x245   :  { %1991 = vmatmul.bf16.gmra.mxu1 %v4668_v44 }
 0x246   :  { %1849 = vmatmul.bf16.gmra.mxu2 %v4415_v40  ;;  %1898 = vmatmul.bf16.gmra.mxu3 %v4400_v28  ;;  %v4898_v38 = vpack.c.bf16 %v2028_v17, %v2026_v4  ;;  %v3507_v28 = vld [vmem:[%s5233_s7 + $0x60] sm:$0xff] }
 0x247   :  { %v1747_v25 = vpop.f32.mrf.mxu0  ;;  %2221 = vmatpush.bf16.msrb.mxu3 %v3507_v28 }
 0x248   :  { %v1748_v11 = vadd.f32 %v1747_v25, %v1699_v47 }
 0x249   :  { %v1654_v12 = vpop.f32.mrf.mxu2  ;;  %v1703_v2 = vpop.f32.mrf.mxu3 }
 0x24a   :  { %v1797_v49 = vadd.f32 %v1796_v5, %v1748_v11  ;;  %v1655_v14 = vadd.f32 %v1654_v12, %v4853_v51  ;;  %v1798_v62 = vpop.f32.mrf.mxu1  ;;  %1942 = vmatmul.bf16.gmra.mxu0 %v4681_v63  ;;  %v3498_v63 = vld [vmem:[%s5233_s7 + $0x18] sm:$0xff]  ;;  %v3496_v12 = vld [vmem:[%s5233_s7 + $0x8] sm:$0xff] }
 0x24b   :  { %2173 = vmatpush.bf16.msrb.mxu2 %v3498_v63 }
 0x24c   :  { %v1704_v40 = vadd.f32 %v1703_v2, %v1655_v14  ;;  %v2030_v34 = vmax.f32 %v1797_v49, 0.0 }
 0x24f   :  { %v1749_v44 = vpop.f32.mrf.mxu0 }
 0x250   :  { %v1750_v16 = vadd.f32 %v1749_v44, %v1701_v22 }
 0x251   :  { %v1656_v29 = vpop.f32.mrf.mxu2  ;;  %v1705_v30 = vpop.f32.mrf.mxu3 }
 0x252   :  { %v1799_v60 = vadd.f32 %v1798_v62, %v1750_v16  ;;  %v1657_v31 = vadd.f32 %v1656_v29, %v4853_v51  ;;  %v1801_v24 = vpop.f32.mrf.mxu1 }
 0x254   :  { %v2032_v35 = vmax.f32 %v1799_v60, 0.0  ;;  %v1706_v32 = vadd.f32 %v1705_v30, %v1657_v31 }
 0x255   :  { %1996 = vmatmul.bf16.gmra.mxu1 %v4708_v52  ;;  %v3506_v52 = vld [vmem:[%s5233_s7 + $0x58] sm:$0xff] }
 0x256   :  { %1854 = vmatmul.bf16.gmra.mxu2 %v4454_v13  ;;  %1903 = vmatmul.bf16.gmra.mxu3 %v4710_v20  ;;  %v4912_v26 = vpack.c.bf16 %v2032_v35, %v2030_v34 }
 0x257   :  { %v1752_v61 = vpop.f32.mrf.mxu0  ;;  %2222 = vmatpush.bf16.msrb.mxu3 %v3506_v52 }
 0x258   :  { %v1753_v41 = vadd.f32 %v1752_v61, %v1704_v40 }
 0x259   :  { %v1659_v7 = vpop.f32.mrf.mxu2  ;;  %v1708_v45 = vpop.f32.mrf.mxu3 }
 0x25a   :  { %v1802_v10 = vadd.f32 %v1801_v24, %v1753_v41  ;;  %v1660_v55 = vadd.f32 %v1659_v7, %v4853_v51  ;;  %v1803_v56 = vpop.f32.mrf.mxu1  ;;  %1947 = vmatmul.bf16.gmra.mxu0 %v4723_v8  ;;  %v3497_v8 = vld [vmem:[%s5233_s7 + $0x10] sm:$0xff] }
 0x25b   :  { %2174 = vmatpush.bf16.msrb.mxu2 %v3497_v8 }
 0x25c   :  { %v1709_v13 = vadd.f32 %v1708_v45, %v1660_v55  ;;  %v2034_v19 = vmax.f32 %v1802_v10, 0.0 }
 0x25f   :  { %v1754_v20 = vpop.f32.mrf.mxu0  ;;  %2175 = vmatpush.bf16.msrb.mxu2 %v3496_v12 }
 0x260   :  { %v1755_v57 = vadd.f32 %v1754_v20, %v1706_v32 }
 0x261   :  { %v1661_v47 = vpop.f32.mrf.mxu2  ;;  %v1710_v48 = vpop.f32.mrf.mxu3 }
 0x262   :  { %v1804_v58 = vadd.f32 %v1803_v56, %v1755_v57  ;;  %v1806_v36 = vpop.f32.mrf.mxu1  ;;  %v1662_v22 = vadd.f32 %v1661_v47, %v4853_v51 }
 0x264   :  { %v2036_v33 = vmax.f32 %v1804_v58, 0.0  ;;  %v1711_v11 = vadd.f32 %v1710_v48, %v1662_v22 }
 0x265   :  { %2001 = vmatmul.bf16.gmra.mxu1 %v4750_v59 }
 0x266   :  { %1859 = vmatmul.bf16.gmra.mxu2 %v4493_v54  ;;  %1908 = vmatmul.bf16.gmra.mxu3 %v4752_v43  ;;  %v4925_v53 = vpack.c.bf16 %v2036_v33, %v2034_v19  ;;  %v3505_v43 = vld [vmem:[%s5233_s7 + $0x50] sm:$0xff] }
 0x267   :  { %v1757_v21 = vpop.f32.mrf.mxu0  ;;  %2223 = vmatpush.bf16.msrb.mxu3 %v3505_v43 }
 0x268   :  { %v1758_v5 = vadd.f32 %v1757_v21, %v1709_v13 }
 0x269   :  { %v1664_v4 = vpop.f32.mrf.mxu2  ;;  %v1713_v17 = vpop.f32.mrf.mxu3 }
 0x26a   :  { %v1807_v6 = vadd.f32 %v1806_v36, %v1758_v5  ;;  %v1665_v59 = vadd.f32 %v1664_v4, %v4853_v51  ;;  %v1808_v25 = vpop.f32.mrf.mxu1  ;;  %1952 = vmatmul.bf16.gmra.mxu0 %v4765_v46  ;;  %v3495_v46 = vld [vmem:[%s5233_s7] sm:$0xff] }
 0x26b   :  { %2176 = vmatpush.bf16.msrb.mxu2 %v3495_v46 }
 0x26c   :  { %v1714_v54 = vadd.f32 %v1713_v17, %v1665_v59  ;;  %v2038_v44 = vmax.f32 %v1807_v6, 0.0 }
 0x26f   :  { %v1759_v2 = vpop.f32.mrf.mxu0 }
 0x270   :  { %v1760_v49 = vadd.f32 %v1759_v2, %v1711_v11 }
 0x271   :  { %v1666_v14 = vpop.f32.mrf.mxu2  ;;  %v1715_v62 = vpop.f32.mrf.mxu3 }
 0x272   :  { %v1809_v40 = vadd.f32 %v1808_v25, %v1760_v49  ;;  %v1811_v28 = vpop.f32.mrf.mxu1  ;;  %v1667_v34 = vadd.f32 %v1666_v14, %v4853_v51 }
 0x274   :  { %v2040_v16 = vmax.f32 %v1809_v40, 0.0 }
 0x275   :  { %2006 = vmatmul.bf16.gmra.mxu1 %v4795_v3  ;;  %v1716_v3 = vadd.f32 %v1715_v62, %v1667_v34 }
 0x276   :  { %1864 = vmatmul.bf16.gmra.mxu2 %v4532_v1  ;;  %1913 = vmatmul.bf16.gmra.mxu3 %v4800_v9  ;;  %v4942_v29 = vpack.c.bf16 %v2040_v16, %v2038_v44  ;;  %v3504_v1 = vld [vmem:[%s5233_s7 + $0x48] sm:$0xff] }
 0x277   :  { %v1762_v30 = vpop.f32.mrf.mxu0  ;;  %2224 = vmatpush.bf16.msrb.mxu3 %v3504_v1 }
 0x278   :  { %v1763_v60 = vadd.f32 %v1762_v30, %v1714_v54 }
 0x279   :  { %v1669_v31 = vpop.f32.mrf.mxu2  ;;  %v1718_v24 = vpop.f32.mrf.mxu3 }
 0x27a   :  { %v1812_v35 = vadd.f32 %v1811_v28, %v1763_v60  ;;  %v1670_v32 = vadd.f32 %v1669_v31, %v4853_v51  ;;  %v1813_v63 = vpop.f32.mrf.mxu1  ;;  %1957 = vmatmul.bf16.gmra.mxu0 %v4807_v23 }
 0x27c   :  { %v1719_v61 = vadd.f32 %v1718_v24, %v1670_v32  ;;  %v2042_v56 = vmax.f32 %v1812_v35, 0.0 }
 0x27f   :  { %v1764_v9 = vpop.f32.mrf.mxu0 }
 0x280   :  { %v1765_v41 = vadd.f32 %v1764_v9, %v1716_v3 }
 0x281   :  { %v1671_v7 = vpop.f32.mrf.mxu2  ;;  %v1720_v45 = vpop.f32.mrf.mxu3 }
 0x282   :  { %v1814_v10 = vadd.f32 %v1813_v63, %v1765_v41  ;;  %v1816_v55 = vpop.f32.mrf.mxu1  ;;  %v1672_v48 = vadd.f32 %v1671_v7, %v4853_v51 }
 0x284   :  { %v2044_v13 = vmax.f32 %v1814_v10, 0.0  ;;  %v3518_v10 = vld [vmem:[%s5235_s9 + $0x38] sm:$0xff] }
 0x285   :  { %2011 = vmatmul.bf16.gmra.mxu1 %v4828_v0  ;;  %v1721_v0 = vadd.f32 %v1720_v45, %v1672_v48  ;;  %2342 = vmatpush.bf16.msrb.mxu0 %v3518_v10 }
 0x286   :  { %1869 = vmatmul.bf16.gmra.mxu2 %v4569_v42  ;;  %1918 = vmatmul.bf16.gmra.mxu3 %v4830_v18  ;;  %v4953_v23 = vpack.c.bf16 %v2044_v13, %v2042_v56  ;;  %v3503_v42 = vld [vmem:[%s5233_s7 + $0x40] sm:$0xff] }
 0x287   :  { %v1767_v52 = vpop.f32.mrf.mxu0  ;;  %2225 = vmatpush.bf16.msrb.mxu3 %v3503_v42  ;;  %3537 = vmatpush.bf16.msra.mxu2 %v3518_v10  ;;  %v3515_v10 = vld [vmem:[%s5235_s9 + $0x20] sm:$0xff] }
 0x288   :  { %v1768_v20 = vadd.f32 %v1767_v52, %v1719_v61 }
 0x289   :  { %v1674_v57 = vpop.f32.mrf.mxu2  ;;  %v1723_v47 = vpop.f32.mrf.mxu3 }
 0x28a   :  { %v1817_v58 = vadd.f32 %v1816_v55, %v1768_v20  ;;  %v1675_v36 = vadd.f32 %v1674_v57, %v4853_v51  ;;  %v1818_v19 = vpop.f32.mrf.mxu1  ;;  %1962 = vmatmul.bf16.gmra.mxu0 %v4835_v39 }
 0x28c   :  { %v1724_v33 = vadd.f32 %v1723_v47, %v1675_v36  ;;  %v2046_v22 = vmax.f32 %v1817_v58, 0.0 }
 0x28f   :  { %v1769_v18 = vpop.f32.mrf.mxu0 }
 0x290   :  { %v1770_v8 = vadd.f32 %v1769_v18, %v1721_v0 }
 0x291   :  { %v1676_v21 = vpop.f32.mrf.mxu2  ;;  %v1725_v5 = vpop.f32.mrf.mxu3 }
 0x292   :  { %v1819_v4 = vadd.f32 %v1818_v19, %v1770_v8  ;;  %v1821_v17 = vpop.f32.mrf.mxu1  ;;  %v1677_v11 = vadd.f32 %v1676_v21, %v4853_v51 }
 0x294   :  { %v2048_v6 = vmax.f32 %v1819_v4, 0.0  ;;  %v1726_v49 = vadd.f32 %v1725_v5, %v1677_v11  ;;  %v3517_v4 = vld [vmem:[%s5235_s9 + $0x30] sm:$0xff] }
 0x295   :  { %2016 = vmatmul.bf16.gmra.mxu1 %v4842_v27  ;;  %v4968_v27 = vperm.slane %v4847_v37, 1  ;;  %2343 = vmatpush.bf16.msrb.mxu0 %v3517_v4 }
 0x296   :  { %2177 = vmatmul.bf16.vlgmr.msrb.gmra.mxu2 %v4879_v50  ;;  %v4963_v39 = vpack.c.bf16 %v2048_v6, %v2046_v22 }
 0x297   :  { %v1772_v59 = vpop.f32.mrf.mxu0  ;;  %3538 = vmatpush.bf16.msra.mxu2 %v3517_v4 }
 0x298   :  { %v1773_v25 = vadd.f32 %v1772_v59, %v1724_v33 }
 0x299   :  { %v1835_v54 = vpop.f32.mrf.mxu2  ;;  %v1884_v43 = vpop.f32.mrf.mxu3 }
 0x29a   :  { %v1822_v12 = vadd.f32 %v1821_v17, %v1773_v25  ;;  %v1823_v2 = vpop.f32.mrf.mxu1  ;;  %1967 = vmatmul.bf16.gmra.mxu0 %v4858_v15  ;;  %v1836_v30 = vadd.f32 %v1835_v54, %v4968_v27 }
 0x29c   :  { %v2050_v44 = vmax.f32 %v1822_v12, 0.0  ;;  %v1885_v24 = vadd.f32 %v1884_v43, %v1836_v30 }
 0x29f   :  { %v1774_v14 = vpop.f32.mrf.mxu0 }
 0x2a0   :  { %v1775_v62 = vadd.f32 %v1774_v14, %v1726_v49 }
 0x2a1   :  { %v1837_v40 = vpop.f32.mrf.mxu2  ;;  %v1886_v28 = vpop.f32.mrf.mxu3 }
 0x2a2   :  { %v1824_v50 = vadd.f32 %v1823_v2, %v1775_v62  ;;  %v1982_v46 = vpop.f32.mrf.mxu1  ;;  %v1838_v34 = vadd.f32 %v1837_v40, %v4968_v27 }
 0x2a4   :  { %v2052_v16 = vmax.f32 %v1824_v50, 0.0  ;;  %v1887_v37 = vadd.f32 %v1886_v28, %v1838_v34 }
 0x2a6   :  { %2182 = vmatmul.bf16.gmra.mxu2 %v4898_v38  ;;  %v4972_v51 = vpack.c.bf16 %v2052_v16, %v2050_v44  ;;  %v3516_v16 = vld [vmem:[%s5235_s9 + $0x28] sm:$0xff] }
 0x2a7   :  { %v1933_v60 = vpop.f32.mrf.mxu0  ;;  %2344 = vmatpush.bf16.msrb.mxu0 %v3516_v16  ;;  %3539 = vmatpush.bf16.msra.mxu2 %v3516_v16 }
 0x2a8   :  { %v1934_v32 = vadd.f32 %v1933_v60, %v1885_v24 }
 0x2a9   :  { %v1840_v15 = vpop.f32.mrf.mxu2  ;;  %v1889_v31 = vpop.f32.mrf.mxu3 }
 0x2aa   :  { %v1984_v35 = vpop.f32.mrf.mxu1  ;;  %v1983_v61 = vadd.f32 %v1982_v46, %v1934_v32  ;;  %v1841_v55 = vadd.f32 %v1840_v15, %v4968_v27 }
 0x2ab   :  { %2345 = vmatpush.bf16.msrb.mxu0 %v3515_v10  ;;  %3540 = vmatpush.bf16.msra.mxu2 %v3515_v10 }
 0x2ac   :  { %v2023_v45 = vmax.f32 %v1983_v61, 0.0  ;;  %v1890_v57 = vadd.f32 %v1889_v31, %v1841_v55 }
 0x2af   :  { %v1935_v63 = vpop.f32.mrf.mxu0 }
 0x2b0   :  { %v1936_v1 = vadd.f32 %v1935_v63, %v1887_v37 }
 0x2b1   :  { %v1842_v3 = vpop.f32.mrf.mxu2  ;;  %v1891_v9 = vpop.f32.mrf.mxu3 }
 0x2b2   :  { %v1985_v41 = vadd.f32 %v1984_v35, %v1936_v1  ;;  %v1987_v7 = vpop.f32.mrf.mxu1  ;;  %v1843_v47 = vadd.f32 %v1842_v3, %v4968_v27 }
 0x2b4   :  { %v2025_v38 = vmax.f32 %v1985_v41, 0.0  ;;  %v1892_v36 = vadd.f32 %v1891_v9, %v1843_v47 }
 0x2b6   :  { %v2055_v56 = vpack.c.bf16 %v2025_v38, %v2023_v45  ;;  %2187 = vmatmul.bf16.gmra.mxu2 %v4912_v26 }
 0x2b7   :  { %v1938_v13 = vpop.f32.mrf.mxu0 }
 0x2b8   :  { %2226 = vmatmul.bf16.vlgmr.msrb.gmra.mxu3 %v2055_v56  ;;  %v1939_v58 = vadd.f32 %v1938_v13, %v1890_v57 }
 0x2b9   :  { %v1845_v52 = vpop.f32.mrf.mxu2  ;;  %v1894_v20 = vpop.f32.mrf.mxu3 }
 0x2ba   :  { %v1989_v48 = vpop.f32.mrf.mxu1  ;;  %v1988_v33 = vadd.f32 %v1987_v7, %v1939_v58  ;;  %v1846_v17 = vadd.f32 %v1845_v52, %v4968_v27 }
 0x2bc   :  { %v2027_v26 = vmax.f32 %v1988_v33, 0.0  ;;  %v1895_v54 = vadd.f32 %v1894_v20, %v1846_v17 }
 0x2bf   :  { %v1940_v19 = vpop.f32.mrf.mxu0 }
 0x2c0   :  { %v1941_v42 = vadd.f32 %v1940_v19, %v1892_v36 }
 0x2c1   :  { %v1847_v0 = vpop.f32.mrf.mxu2  ;;  %v1896_v18 = vpop.f32.mrf.mxu3 }
 0x2c2   :  { %v1990_v8 = vadd.f32 %v1989_v48, %v1941_v42  ;;  %v1992_v21 = vpop.f32.mrf.mxu1  ;;  %v1848_v43 = vadd.f32 %v1847_v0, %v4968_v27 }
 0x2c4   :  { %v2029_v5 = vmax.f32 %v1990_v8, 0.0  ;;  %v1897_v2 = vadd.f32 %v1896_v18, %v1848_v43 }
 0x2c6   :  { %2192 = vmatmul.bf16.gmra.mxu2 %v4925_v53  ;;  %v2057_v22 = vpack.c.bf16 %v2029_v5, %v2027_v26  ;;  %v3514_v26 = vld [vmem:[%s5235_s9 + $0x18] sm:$0xff] }
 0x2c7   :  { %v1943_v6 = vpop.f32.mrf.mxu0  ;;  %2346 = vmatpush.bf16.msrb.mxu0 %v3514_v26  ;;  %3541 = vmatpush.bf16.msra.mxu2 %v3514_v26  ;;  %v3526_v26 = vld [vmem:[%s5237_s11 + $0x38] sm:$0xff] }
 0x2c8   :  { %2231 = vmatmul.bf16.gmra.mxu3 %v2057_v22  ;;  %v1944_v12 = vadd.f32 %v1943_v6, %v1895_v54  ;;  %2466 = vmatpush.bf16.msrb.mxu1 %v3526_v26 }
 0x2c9   :  { %v1850_v59 = vpop.f32.mrf.mxu2  ;;  %v1899_v25 = vpop.f32.mrf.mxu3 }
 0x2ca   :  { %v1994_v11 = vpop.f32.mrf.mxu1  ;;  %v1993_v14 = vadd.f32 %v1992_v21, %v1944_v12  ;;  %v1851_v30 = vadd.f32 %v1850_v59, %v4968_v27 }
 0x2cc   :  { %v2031_v46 = vmax.f32 %v1993_v14, 0.0  ;;  %v1900_v34 = vadd.f32 %v1899_v25, %v1851_v30 }
 0x2cf   :  { %v1945_v49 = vpop.f32.mrf.mxu0 }
 0x2d0   :  { %v1946_v62 = vadd.f32 %v1945_v49, %v1897_v2 }
 0x2d1   :  { %v1852_v40 = vpop.f32.mrf.mxu2  ;;  %v1901_v28 = vpop.f32.mrf.mxu3 }
 0x2d2   :  { %v1995_v50 = vadd.f32 %v1994_v11, %v1946_v62  ;;  %v1997_v53 = vpop.f32.mrf.mxu1  ;;  %v1853_v35 = vadd.f32 %v1852_v40, %v4968_v27 }
 0x2d4   :  { %v2033_v44 = vmax.f32 %v1995_v50, 0.0  ;;  %v1902_v63 = vadd.f32 %v1901_v28, %v1853_v35 }
 0x2d6   :  { %2197 = vmatmul.bf16.gmra.mxu2 %v4942_v29  ;;  %v2059_v60 = vpack.c.bf16 %v2033_v44, %v2031_v46 }
 0x2d7   :  { %v1948_v15 = vpop.f32.mrf.mxu0 }
 0x2d8   :  { %2236 = vmatmul.bf16.gmra.mxu3 %v2059_v60  ;;  %v1949_v37 = vadd.f32 %v1948_v15, %v1900_v34 }
 0x2d9   :  { %v1855_v31 = vpop.f32.mrf.mxu2  ;;  %v1904_v24 = vpop.f32.mrf.mxu3 }
 0x2da   :  { %v1999_v32 = vpop.f32.mrf.mxu1  ;;  %v1998_v1 = vadd.f32 %v1997_v53, %v1949_v37  ;;  %v1856_v55 = vadd.f32 %v1855_v31, %v4968_v27  ;;  %v3513_v53 = vld [vmem:[%s5235_s9 + $0x10] sm:$0xff] }
 0x2db   :  { %2347 = vmatpush.bf16.msrb.mxu0 %v3513_v53  ;;  %3542 = vmatpush.bf16.msra.mxu2 %v3513_v53 }
 0x2dc   :  { %v2035_v45 = vmax.f32 %v1998_v1, 0.0  ;;  %v1905_v20 = vadd.f32 %v1904_v24, %v1856_v55  ;;  %v3512_v24 = vld [vmem:[%s5235_s9 + $0x8] sm:$0xff] }
 0x2df   :  { %v1950_v61 = vpop.f32.mrf.mxu0  ;;  %2348 = vmatpush.bf16.msrb.mxu0 %v3512_v24  ;;  %3543 = vmatpush.bf16.msra.mxu2 %v3512_v24 }
 0x2e0   :  { %v1951_v3 = vadd.f32 %v1950_v61, %v1902_v63 }
 0x2e1   :  { %v1857_v9 = vpop.f32.mrf.mxu2  ;;  %v1906_v41 = vpop.f32.mrf.mxu3 }
 0x2e2   :  { %v2000_v7 = vadd.f32 %v1999_v32, %v1951_v3  ;;  %v2002_v29 = vpop.f32.mrf.mxu1  ;;  %v1858_v57 = vadd.f32 %v1857_v9, %v4968_v27 }
 0x2e4   :  { %v2037_v38 = vmax.f32 %v2000_v7, 0.0  ;;  %v1907_v36 = vadd.f32 %v1906_v41, %v1858_v57  ;;  %v3511_v57 = vld [vmem:[%s5235_s9] sm:$0xff] }
 0x2e5   :  { %2349 = vmatpush.bf16.msrb.mxu0 %v3511_v57  ;;  %3544 = vmatpush.bf16.msra.mxu2 %v3511_v57 }
 0x2e6   :  { %2202 = vmatmul.bf16.gmra.mxu2 %v4953_v23  ;;  %v2061_v56 = vpack.c.bf16 %v2037_v38, %v2035_v45 }
 0x2e7   :  { %v1953_v13 = vpop.f32.mrf.mxu0 }
 0x2e8   :  { %2241 = vmatmul.bf16.gmra.mxu3 %v2061_v56  ;;  %v1954_v58 = vadd.f32 %v1953_v13, %v1905_v20 }
 0x2e9   :  { %v1860_v52 = vpop.f32.mrf.mxu2  ;;  %v1909_v48 = vpop.f32.mrf.mxu3 }
 0x2ea   :  { %v2004_v47 = vpop.f32.mrf.mxu1  ;;  %v2003_v33 = vadd.f32 %v2002_v29, %v1954_v58  ;;  %v1861_v4 = vadd.f32 %v1860_v52, %v4968_v27 }
 0x2ec   :  { %v2039_v23 = vmax.f32 %v2003_v33, 0.0  ;;  %v1910_v59 = vadd.f32 %v1909_v48, %v1861_v4 }
 0x2ef   :  { %v1955_v19 = vpop.f32.mrf.mxu0 }
 0x2f0   :  { %v1956_v42 = vadd.f32 %v1955_v19, %v1907_v36 }
 0x2f1   :  { %v1862_v0 = vpop.f32.mrf.mxu2  ;;  %v1911_v5 = vpop.f32.mrf.mxu3 }
 0x2f2   :  { %v2005_v18 = vadd.f32 %v2004_v47, %v1956_v42  ;;  %v2007_v8 = vpop.f32.mrf.mxu1  ;;  %v1863_v25 = vadd.f32 %v1862_v0, %v4968_v27 }
 0x2f4   :  { %v2041_v21 = vmax.f32 %v2005_v18, 0.0  ;;  %v1912_v11 = vadd.f32 %v1911_v5, %v1863_v25 }
 0x2f6   :  { %2207 = vmatmul.bf16.gmra.mxu2 %v4963_v39  ;;  %v2063_v17 = vpack.c.bf16 %v2041_v21, %v2039_v23  ;;  %v5022_v21 = vld [vmem:[%s5234_s8] ss:$0 sm:$0xff] }
 0x2f7   :  { %v1958_v22 = vpop.f32.mrf.mxu0 }
 0x2f8   :  { %2246 = vmatmul.bf16.gmra.mxu3 %v2063_v17  ;;  %v1959_v43 = vadd.f32 %v1958_v22, %v1910_v59 }
 0x2f9   :  { %v1865_v6 = vpop.f32.mrf.mxu2  ;;  %v1914_v12 = vpop.f32.mrf.mxu3 }
 0x2fa   :  { %v2009_v54 = vpop.f32.mrf.mxu1  ;;  %v2008_v49 = vadd.f32 %v2007_v8, %v1959_v43  ;;  %v1866_v46 = vadd.f32 %v1865_v6, %v4968_v27 }
 0x2fc   :  { %v2043_v39 = vmax.f32 %v2008_v49, 0.0  ;;  %v1915_v15 = vadd.f32 %v1914_v12, %v1866_v46 }
 0x2ff   :  { %v1960_v2 = vpop.f32.mrf.mxu0 }
 0x300   :  { %v1961_v14 = vadd.f32 %v1960_v2, %v1912_v11  ;;  %v3525_v2 = vld [vmem:[%s5237_s11 + $0x30] sm:$0xff] }
 0x301   :  { %v1867_v62 = vpop.f32.mrf.mxu2  ;;  %v1916_v30 = vpop.f32.mrf.mxu3  ;;  %2467 = vmatpush.bf16.msrb.mxu1 %v3525_v2 }
 0x302   :  { %v2010_v40 = vadd.f32 %v2009_v54, %v1961_v14  ;;  %v2012_v28 = vpop.f32.mrf.mxu1  ;;  %v1868_v31 = vadd.f32 %v1867_v62, %v4968_v27 }
 0x304   :  { %v2045_v50 = vmax.f32 %v2010_v40, 0.0  ;;  %v1917_v32 = vadd.f32 %v1916_v30, %v1868_v31 }
 0x306   :  { %2212 = vmatmul.bf16.gmra.mxu2 %v4972_v51  ;;  %v2065_v44 = vpack.c.bf16 %v2045_v50, %v2043_v39 }
 0x307   :  { %v1963_v16 = vpop.f32.mrf.mxu0 }
 0x308   :  { %2251 = vmatmul.bf16.gmra.mxu3 %v2065_v44  ;;  %v1964_v34 = vadd.f32 %v1963_v16, %v1915_v15  ;;  %v3524_v16 = vld [vmem:[%s5237_s11 + $0x28] sm:$0xff] }
 0x309   :  { %v1870_v60 = vpop.f32.mrf.mxu2  ;;  %v1919_v3 = vpop.f32.mrf.mxu3  ;;  %2468 = vmatpush.bf16.msrb.mxu1 %v3524_v16 }
 0x30a   :  { %v2014_v35 = vpop.f32.mrf.mxu1  ;;  %v2013_v37 = vadd.f32 %v2012_v28, %v1964_v34  ;;  %v1871_v7 = vadd.f32 %v1870_v60, %v4968_v27 }
 0x30c   :  { %v2047_v9 = vmax.f32 %v2013_v37, 0.0  ;;  %v1920_v55 = vadd.f32 %v1919_v3, %v1871_v7 }
 0x30f   :  { %v1965_v51 = vpop.f32.mrf.mxu0 }
 0x310   :  { %v1966_v63 = vadd.f32 %v1965_v51, %v1917_v32 }
 0x311   :  { %v1872_v61 = vpop.f32.mrf.mxu2  ;;  %v1921_v52 = vpop.f32.mrf.mxu3 }
 0x312   :  { %v2015_v1 = vadd.f32 %v2014_v35, %v1966_v63  ;;  %v2017_v45 = vpop.f32.mrf.mxu1  ;;  %v1873_v56 = vadd.f32 %v1872_v61, %v4968_v27  ;;  %v3523_v61 = vld [vmem:[%s5237_s11 + $0x20] sm:$0xff] }
 0x313   :  { %2469 = vmatpush.bf16.msrb.mxu1 %v3523_v61 }
 0x314   :  { %v2049_v41 = vmax.f32 %v2015_v1, 0.0  ;;  %v1922_v20 = vadd.f32 %v1921_v52, %v1873_v56 }
 0x316   :  { %v2067_v29 = vpack.c.bf16 %v2049_v41, %v2047_v9 }
 0x317   :  { %v1968_v38 = vpop.f32.mrf.mxu0 }
 0x318   :  { %2256 = vmatmul.bf16.gmra.mxu3 %v2067_v29  ;;  %v1969_v13 = vadd.f32 %v1968_v38, %v1920_v55 }
 0x319   :  { %v2178_v10 = vpop.f32.mrf.mxu2 }
 0x31a   :  { %v2018_v48 = vadd.f32 %v2017_v45, %v1969_v13  ;;  %v2019_v36 = vpop.f32.mrf.mxu1  ;;  %v2179_v5 = vadd.f32 %v5022_v21, %v2178_v10  ;;  %v3522_v13 = vld [vmem:[%s5237_s11 + $0x18] sm:$0xff] }
 0x31b   :  { %2470 = vmatpush.bf16.msrb.mxu1 %v3522_v13 }
 0x31c   :  { %v2051_v42 = vmax.f32 %v2018_v48, 0.0 }
 0x31f   :  { %v1970_v47 = vpop.f32.mrf.mxu0 }
 0x320   :  { %v1971_v58 = vadd.f32 %v1970_v47, %v1922_v20 }
 0x321   :  { %v2180_v33 = vpop.f32.mrf.mxu2 }
 0x322   :  { %v2020_v19 = vadd.f32 %v2019_v36, %v1971_v58  ;;  %v2181_v17 = vadd.f32 %v5022_v21, %v2180_v33 }
 0x324   :  { %v2053_v0 = vmax.f32 %v2020_v19, 0.0 }
 0x326   :  { %v2069_v18 = vpack.c.bf16 %v2053_v0, %v2051_v42  ;;  %v3521_v0 = vld [vmem:[%s5237_s11 + $0x10] sm:$0xff] }
 0x327   :  { %2471 = vmatpush.bf16.msrb.mxu1 %v3521_v0 }
 0x328   :  { %2261 = vmatmul.bf16.gmra.mxu3 %v2069_v18 }
 0x329   :  { %v2183_v27 = vpop.f32.mrf.mxu2 }
 0x32a   :  { %v2184_v49 = vadd.f32 %v5022_v21, %v2183_v27 }
 0x331   :  { %v2185_v8 = vpop.f32.mrf.mxu2 }
 0x332   :  { %v2186_v14 = vadd.f32 %v5022_v21, %v2185_v8 }
 0x339   :  { %v2188_v4 = vpop.f32.mrf.mxu2 }
 0x33a   :  { %v2189_v60 = vadd.f32 %v5022_v21, %v2188_v4 }
 0x33b   :  { %v2227_v23 = vpop.f32.mrf.mxu3 }
 0x33c   :  { %v2228_v22 = vadd.f32 %v2227_v23, %v2179_v5 }
 0x33e   :  { %v2267_v25 = vmax.f32 %v2228_v22, 0.0 }
 0x341   :  { %v2190_v11 = vpop.f32.mrf.mxu2 }
 0x342   :  { %v2191_v15 = vadd.f32 %v5022_v21, %v2190_v11 }
 0x343   :  { %v2229_v6 = vpop.f32.mrf.mxu3 }
 0x344   :  { %v2230_v59 = vadd.f32 %v2229_v6, %v2181_v17  ;;  %v3520_v6 = vld [vmem:[%s5237_s11 + $0x8] sm:$0xff] }
 0x345   :  { %2472 = vmatpush.bf16.msrb.mxu1 %v3520_v6 }
 0x346   :  { %v2268_v54 = vmax.f32 %v2230_v59, 0.0 }
 0x348   :  { %v2283_v43 = vpack.c.bf16 %v2268_v54, %v2267_v25 }
 0x349   :  { %v2193_v39 = vpop.f32.mrf.mxu2 }
 0x34a   :  { %2350 = vmatmul.bf16.vlgmr.msrb.gmra.mxu0 %v2283_v43  ;;  %v2194_v1 = vadd.f32 %v5022_v21, %v2193_v39 }
 0x34b   :  { %v2232_v12 = vpop.f32.mrf.mxu3 }
 0x34c   :  { %v2233_v62 = vadd.f32 %v2232_v12, %v2184_v49 }
 0x34e   :  { %v2269_v50 = vmax.f32 %v2233_v62, 0.0 }
 0x351   :  { %v2195_v30 = vpop.f32.mrf.mxu2 }
 0x352   :  { %v2196_v3 = vadd.f32 %v5022_v21, %v2195_v30 }
 0x353   :  { %v2234_v40 = vpop.f32.mrf.mxu3 }
 0x354   :  { %v2235_v28 = vadd.f32 %v2234_v40, %v2186_v14 }
 0x356   :  { %v2270_v53 = vmax.f32 %v2235_v28, 0.0  ;;  %v3519_v28 = vld [vmem:[%s5237_s11] sm:$0xff] }
 0x357   :  { %2473 = vmatpush.bf16.msrb.mxu1 %v3519_v28 }
 0x358   :  { %v2284_v46 = vpack.c.bf16 %v2270_v53, %v2269_v50 }
 0x359   :  { %v2198_v37 = vpop.f32.mrf.mxu2 }
 0x35a   :  { %2355 = vmatmul.bf16.gmra.mxu0 %v2284_v46  ;;  %v2199_v52 = vadd.f32 %v5022_v21, %v2198_v37 }
 0x35b   :  { %v2237_v44 = vpop.f32.mrf.mxu3 }
 0x35c   :  { %v2238_v31 = vadd.f32 %v2237_v44, %v2189_v60 }
 0x35e   :  { %v2271_v35 = vmax.f32 %v2238_v31, 0.0 }
 0x361   :  { %v2200_v41 = vpop.f32.mrf.mxu2 }
 0x362   :  { %v2201_v20 = vadd.f32 %v5022_v21, %v2200_v41 }
 0x363   :  { %v2239_v24 = vpop.f32.mrf.mxu3 }
 0x364   :  { %v2240_v34 = vadd.f32 %v2239_v24, %v2191_v15 }
 0x366   :  { %v2272_v32 = vmax.f32 %v2240_v34, 0.0  ;;  %v3546_v34 = vld [vmem:[%s5236_s10] ss:$0 sm:$0xff] }
 0x368   :  { %v2285_v51 = vpack.c.bf16 %v2272_v32, %v2271_v35 }
 0x369   :  { %v2203_v56 = vpop.f32.mrf.mxu2 }
 0x36a   :  { %2360 = vmatmul.bf16.gmra.mxu0 %v2285_v51  ;;  %v2204_v18 = vadd.f32 %v5022_v21, %v2203_v56 }
 0x36b   :  { %v2242_v63 = vpop.f32.mrf.mxu3 }
 0x36c   :  { %v2243_v9 = vadd.f32 %v2242_v63, %v2194_v1 }
 0x36e   :  { %v2273_v45 = vmax.f32 %v2243_v9, 0.0 }
 0x371   :  { %v2205_v19 = vpop.f32.mrf.mxu2 }
 0x372   :  { %v2206_v8 = vadd.f32 %v5022_v21, %v2205_v19 }
 0x373   :  { %v2244_v7 = vpop.f32.mrf.mxu3 }
 0x374   :  { %v2245_v29 = vadd.f32 %v2244_v7, %v2196_v3 }
 0x376   :  { %v2274_v38 = vmax.f32 %v2245_v29, 0.0 }
 0x378   :  { %v2286_v10 = vpack.c.bf16 %v2274_v38, %v2273_v45 }
 0x379   :  { %v2208_v27 = vpop.f32.mrf.mxu2 }
 0x37a   :  { %2365 = vmatmul.bf16.gmra.mxu0 %v2286_v10  ;;  %v2209_v54 = vadd.f32 %v5022_v21, %v2208_v27 }
 0x37b   :  { %v2247_v55 = vpop.f32.mrf.mxu3 }
 0x37c   :  { %v2248_v57 = vadd.f32 %v2247_v55, %v2199_v52 }
 0x37e   :  { %v2275_v58 = vmax.f32 %v2248_v57, 0.0 }
 0x381   :  { %v2210_v59 = vpop.f32.mrf.mxu2 }
 0x382   :  { %v2211_v43 = vadd.f32 %v5022_v21, %v2210_v59 }
 0x383   :  { %v2249_v47 = vpop.f32.mrf.mxu3 }
 0x384   :  { %v2250_v48 = vadd.f32 %v2249_v47, %v2201_v20 }
 0x386   :  { %v2276_v36 = vmax.f32 %v2250_v48, 0.0 }
 0x388   :  { %v2287_v33 = vpack.c.bf16 %v2276_v36, %v2275_v58 }
 0x389   :  { %v2213_v49 = vpop.f32.mrf.mxu2 }
 0x38a   :  { %2370 = vmatmul.bf16.gmra.mxu0 %v2287_v33  ;;  %v2214_v53 = vadd.f32 %v5022_v21, %v2213_v49 }
 0x38b   :  { %v2252_v42 = vpop.f32.mrf.mxu3 }
 0x38c   :  { %v2253_v23 = vadd.f32 %v2252_v42, %v2204_v18 }
 0x38e   :  { %v2277_v4 = vmax.f32 %v2253_v23, 0.0 }
 0x391   :  { %v2215_v50 = vpop.f32.mrf.mxu2 }
 0x392   :  { %v2216_v46 = vadd.f32 %v5022_v21, %v2215_v50 }
 0x393   :  { %v2254_v26 = vpop.f32.mrf.mxu3 }
 0x394   :  { %v2255_v5 = vadd.f32 %v2254_v26, %v2206_v8 }
 0x396   :  { %v2278_v17 = vmax.f32 %v2255_v5, 0.0 }
 0x398   :  { %v2288_v22 = vpack.c.bf16 %v2278_v17, %v2277_v4 }
 0x39a   :  { %2375 = vmatmul.bf16.gmra.mxu0 %v2288_v22 }
 0x39b   :  { %v2257_v25 = vpop.f32.mrf.mxu3 }
 0x39c   :  { %v2258_v11 = vadd.f32 %v2257_v25, %v2209_v54 }
 0x39e   :  { %v2279_v14 = vmax.f32 %v2258_v11, 0.0 }
 0x3a3   :  { %v2259_v12 = vpop.f32.mrf.mxu3 }
 0x3a4   :  { %v2260_v2 = vadd.f32 %v2259_v12, %v2211_v43 }
 0x3a6   :  { %v2280_v62 = vmax.f32 %v2260_v2, 0.0 }
 0x3a8   :  { %v2289_v40 = vpack.c.bf16 %v2280_v62, %v2279_v14 }
 0x3aa   :  { %2380 = vmatmul.bf16.gmra.mxu0 %v2289_v40 }
 0x3ab   :  { %v2262_v39 = vpop.f32.mrf.mxu3 }
 0x3ac   :  { %v2263_v44 = vadd.f32 %v2262_v39, %v2214_v53 }
 0x3ae   :  { %v2281_v60 = vmax.f32 %v2263_v44, 0.0 }
 0x3b3   :  { %v2264_v16 = vpop.f32.mrf.mxu3 }
 0x3b4   :  { %v2265_v30 = vadd.f32 %v2264_v16, %v2216_v46  ;;  %v3547_v46 = vld [vmem:[%s5238_s12] ss:$0 sm:$0xff] }
 0x3b6   :  { %v2282_v15 = vmax.f32 %v2265_v30, 0.0 }
 0x3b8   :  { %v2290_v31 = vpack.c.bf16 %v2282_v15, %v2281_v60 }
 0x3ba   :  { %2385 = vmatmul.bf16.vlgmr.msra.gmra.mxu2 %v2290_v31 }
 0x3c7   :  { %v2351_v24 = vpop.f32.mrf.mxu0 }
 0x3c8   :  { %v2352_v35 = vadd.f32 %v3546_v34, %v2351_v24 }
 0x3ca   :  { %v2391_v37 = vmax.f32 %v2352_v35, 0.0 }
 0x3cf   :  { %v2353_v32 = vpop.f32.mrf.mxu0 }
 0x3d0   :  { %v2354_v51 = vadd.f32 %v3546_v34, %v2353_v32 }
 0x3d2   :  { %v2392_v63 = vmax.f32 %v2354_v51, 0.0 }
 0x3d4   :  { %v2407_v61 = vpack.c.bf16 %v2392_v63, %v2391_v37 }
 0x3d6   :  { %2474 = vmatmul.bf16.vlgmr.msrb.gmra.mxu1 %v2407_v61 }
 0x3d7   :  { %v2356_v21 = vpop.f32.mrf.mxu0 }
 0x3d8   :  { %v2357_v1 = vadd.f32 %v3546_v34, %v2356_v21 }
 0x3da   :  { %v2393_v41 = vmax.f32 %v2357_v1, 0.0 }
 0x3df   :  { %v2358_v3 = vpop.f32.mrf.mxu0 }
 0x3e0   :  { %v2359_v9 = vadd.f32 %v3546_v34, %v2358_v3 }
 0x3e2   :  { %v2394_v7 = vmax.f32 %v2359_v9, 0.0 }
 0x3e4   :  { %v2408_v29 = vpack.c.bf16 %v2394_v7, %v2393_v41 }
 0x3e6   :  { %2479 = vmatmul.bf16.gmra.mxu1 %v2408_v29 }
 0x3e7   :  { %v2361_v45 = vpop.f32.mrf.mxu0 }
 0x3e8   :  { %v2362_v38 = vadd.f32 %v3546_v34, %v2361_v45 }
 0x3ea   :  { %v2395_v56 = vmax.f32 %v2362_v38, 0.0 }
 0x3ef   :  { %v2363_v10 = vpop.f32.mrf.mxu0 }
 0x3f0   :  { %v2364_v55 = vadd.f32 %v3546_v34, %v2363_v10 }
 0x3f2   :  { %v2396_v13 = vmax.f32 %v2364_v55, 0.0 }
 0x3f4   :  { %v2409_v52 = vpack.c.bf16 %v2396_v13, %v2395_v56 }
 0x3f6   :  { %2484 = vmatmul.bf16.gmra.mxu1 %v2409_v52 }
 0x3f7   :  { %v2366_v20 = vpop.f32.mrf.mxu0 }
 0x3f8   :  { %v2367_v57 = vadd.f32 %v3546_v34, %v2366_v20 }
 0x3fa   :  { %v2397_v58 = vmax.f32 %v2367_v57, 0.0 }
 0x3ff   :  { %v2368_v47 = vpop.f32.mrf.mxu0 }
 0x400   :  { %v2369_v48 = vadd.f32 %v3546_v34, %v2368_v47 }
 0x402   :  { %v2398_v36 = vmax.f32 %v2369_v48, 0.0 }
 0x404   :  { %v2410_v19 = vpack.c.bf16 %v2398_v36, %v2397_v58 }
 0x406   :  { %2489 = vmatmul.bf16.gmra.mxu1 %v2410_v19 }
 0x407   :  { %v2371_v33 = vpop.f32.mrf.mxu0 }
 0x408   :  { %v2372_v42 = vadd.f32 %v3546_v34, %v2371_v33 }
 0x40a   :  { %v2399_v27 = vmax.f32 %v2372_v42, 0.0 }
 0x40f   :  { %v2373_v0 = vpop.f32.mrf.mxu0 }
 0x410   :  { %v2374_v18 = vadd.f32 %v3546_v34, %v2373_v0 }
 0x412   :  { %v2400_v8 = vmax.f32 %v2374_v18, 0.0 }
 0x414   :  { %v2411_v23 = vpack.c.bf16 %v2400_v8, %v2399_v27 }
 0x416   :  { %2494 = vmatmul.bf16.gmra.mxu1 %v2411_v23 }
 0x417   :  { %v2376_v26 = vpop.f32.mrf.mxu0 }
 0x418   :  { %v2377_v5 = vadd.f32 %v3546_v34, %v2376_v26 }
 0x41a   :  { %v2401_v22 = vmax.f32 %v2377_v5, 0.0 }
 0x41f   :  { %v2378_v4 = vpop.f32.mrf.mxu0 }
 0x420   :  { %v2379_v17 = vadd.f32 %v3546_v34, %v2378_v4 }
 0x422   :  { %v2402_v6 = vmax.f32 %v2379_v17, 0.0 }
 0x424   :  { %v2412_v59 = vpack.c.bf16 %v2402_v6, %v2401_v22 }
 0x426   :  { %2499 = vmatmul.bf16.gmra.mxu1 %v2412_v59 }
 0x427   :  { %v2381_v25 = vpop.f32.mrf.mxu0 }
 0x428   :  { %v2382_v54 = vadd.f32 %v3546_v34, %v2381_v25 }
 0x42a   :  { %v2403_v12 = vmax.f32 %v2382_v54, 0.0 }
 0x42f   :  { %v2383_v43 = vpop.f32.mrf.mxu0 }
 0x430   :  { %v2384_v11 = vadd.f32 %v3546_v34, %v2383_v43 }
 0x432   :  { %v2404_v2 = vmax.f32 %v2384_v11, 0.0 }
 0x434   :  { %v2413_v49 = vpack.c.bf16 %v2404_v2, %v2403_v12 }
 0x436   :  { %2504 = vmatmul.bf16.gmra.mxu1 %v2413_v49 }
 0x43d   :  { %v2386_v14 = vpop.f32.mrf.mxu2 }
 0x43e   :  { %v2387_v62 = vadd.f32 %v3546_v34, %v2386_v14 }
 0x440   :  { %v2405_v39 = vmax.f32 %v2387_v62, 0.0 }
 0x445   :  { %v2388_v40 = vpop.f32.mrf.mxu2 }
 0x446   :  { %v2389_v28 = vadd.f32 %v3546_v34, %v2388_v40 }
 0x448   :  { %v2406_v50 = vmax.f32 %v2389_v28, 0.0 }
 0x44a   :  { %v2414_v53 = vpack.c.bf16 %v2406_v50, %v2405_v39 }
 0x44c   :  { %2509 = vmatmul.bf16.gmra.mxu1 %v2414_v53 }
 0x453   :  { %v2475_v44 = vpop.f32.mrf.mxu1 }
 0x454   :  { %v2476_v16 = vadd.f32 %v3547_v46, %v2475_v44 }
 0x456   :  { %2515 = vmax.xlane.f32.xlu0 %v2476_v16 }
 0x45b   :  { %v2477_v30 = vpop.f32.mrf.mxu1 }
 0x45c   :  { %v2478_v60 = vadd.f32 %v3547_v46, %v2477_v30 }
 0x45e   :  { %2517 = vmax.xlane.f32.xlu0 %v2478_v60 }
 0x463   :  { %v2480_v15 = vpop.f32.mrf.mxu1 }
 0x464   :  { %v2481_v31 = vadd.f32 %v3547_v46, %v2480_v15 }
 0x466   :  { %2519 = vmax.xlane.f32.xlu1 %v2481_v31 }
 0x46b   :  { %v2482_v24 = vpop.f32.mrf.mxu1 }
 0x46c   :  { %v2483_v35 = vadd.f32 %v3547_v46, %v2482_v24 }
 0x46e   :  { %2521 = vmax.xlane.f32.xlu1 %v2483_v35 }
 0x473   :  { %v2485_v34 = vpop.f32.mrf.mxu1 }
 0x474   :  { %v2486_v32 = vadd.f32 %v3547_v46, %v2485_v34 }
 0x476   :  { %2523 = vmax.xlane.f32.xlu2 %v2486_v32 }
 0x47b   :  { %v2487_v51 = vpop.f32.mrf.mxu1 }
 0x47c   :  { %v5070_v37 = vadd.f32 %v3547_v46, %v2487_v51 }
 0x47e   :  { %2525 = vmax.xlane.f32.xlu2 %v5070_v37 }
 0x483   :  { %v2490_v63 = vpop.f32.mrf.mxu1 }
 0x484   :  { %v5073_v61 = vadd.f32 %v3547_v46, %v2490_v63 }
 0x486   :  { %2527 = vmax.xlane.f32.xlu0 %v5073_v61 }
 0x48b   :  { %v2492_v21 = vpop.f32.mrf.mxu1 }
 0x48c   :  { %v5076_v1 = vadd.f32 %v3547_v46, %v2492_v21 }
 0x48e   :  { %2529 = vmax.xlane.f32.xlu1 %v5076_v1 }
 0x493   :  { %v2495_v3 = vpop.f32.mrf.mxu1 }
 0x494   :  { %v5079_v9 = vadd.f32 %v3547_v46, %v2495_v3 }
 0x496   :  { %2531 = vmax.xlane.f32.xlu2 %v5079_v9 }
 0x49b   :  { %v2497_v41 = vpop.f32.mrf.mxu1 }
 0x49c   :  { %v5082_v7 = vadd.f32 %v3547_v46, %v2497_v41 }
 0x49e   :  { %2533 = vmax.xlane.f32.xlu0 %v5082_v7 }
 0x4a3   :  { %v2500_v29 = vpop.f32.mrf.mxu1 }
 0x4a4   :  { %v5085_v45 = vadd.f32 %v3547_v46, %v2500_v29 }
 0x4a6   :  { %2535 = vmax.xlane.f32.xlu1 %v5085_v45 }
 0x4ab   :  { %v2502_v38 = vpop.f32.mrf.mxu1 }
 0x4ac   :  { %v5088_v10 = vadd.f32 %v3547_v46, %v2502_v38 }
 0x4ae   :  { %2537 = vmax.xlane.f32.xlu2 %v5088_v10 }
 0x4b3   :  { %v2505_v55 = vpop.f32.mrf.mxu1 }
 0x4b4   :  { %v5091_v56 = vadd.f32 %v3547_v46, %v2505_v55 }
 0x4b6   :  { %2539 = vmax.xlane.f32.xlu0 %v5091_v56 }
 0x4bb   :  { %v2507_v13 = vpop.f32.mrf.mxu1 }
 0x4bc   :  { %v5094_v52 = vadd.f32 %v3547_v46, %v2507_v13 }
 0x4be   :  { %2541 = vmax.xlane.f32.xlu1 %v5094_v52 }
 0x4c9   :  { %v2510_v20 = vpop.f32.mrf.mxu1  ;;  %v2516_v57 = vpop.xlane.xlu0 %2515 }
 0x4ca   :  { %v5097_v47 = vadd.f32 %v3547_v46, %v2510_v20  ;;  %v2547_v48 = vsub.f32 %v2476_v16, %v2516_v57 }
 0x4cc   :  { %v2563_v58 = vmul.f32 1.442695, %v2547_v48  ;;  %2543 = vmax.xlane.f32.xlu2 %v5097_v47 }
 0x4ce   :  { %3548 = vpow2.f32 %v2563_v58 }
 0x4d1   :  { %v2512_v36 = vpop.f32.mrf.mxu1  ;;  %v2518_v19 = vpop.xlane.xlu0 %2517 }
 0x4d2   :  { %v5100_v33 = vadd.f32 %v3547_v46, %v2512_v36  ;;  %v2548_v42 = vsub.f32 %v2478_v60, %v2518_v19 }
 0x4d4   :  { %v5102_v0 = vpop.eup %3548  ;;  %v2565_v18 = vmul.f32 1.442695, %v2548_v42  ;;  %2545 = vmax.xlane.f32.xlu0 %v5100_v33 }
 0x4d5   :  { %2595 = vadd.xlane.f32.xlu1 %v5102_v0 }
 0x4d6   :  { %3550 = vpow2.f32 %v2565_v18 }
 0x4d9   :  { %v2520_v27 = vpop.xlane.xlu1 %2519 }
 0x4da   :  { %v2549_v8 = vsub.f32 %v2481_v31, %v2520_v27 }
 0x4dc   :  { %v5106_v23 = vpop.eup %3550  ;;  %v2567_v26 = vmul.f32 1.442695, %v2549_v8 }
 0x4dd   :  { %2597 = vadd.xlane.f32.xlu2 %v5106_v23 }
 0x4de   :  { %3552 = vpow2.f32 %v2567_v26 }
 0x4e1   :  { %v2522_v5 = vpop.xlane.xlu1 %2521 }
 0x4e2   :  { %v2550_v4 = vsub.f32 %v2483_v35, %v2522_v5 }
 0x4e4   :  { %v5109_v17 = vpop.eup %3552  ;;  %v2569_v22 = vmul.f32 1.442695, %v2550_v4 }
 0x4e5   :  { %2599 = vadd.xlane.f32.xlu0 %v5109_v17 }
 0x4e6   :  { %3554 = vpow2.f32 %v2569_v22 }
 0x4e9   :  { %v2524_v6 = vpop.xlane.xlu2 %2523 }
 0x4ea   :  { %v2551_v59 = vsub.f32 %v2486_v32, %v2524_v6 }
 0x4ec   :  { %v5112_v25 = vpop.eup %3554  ;;  %v2571_v54 = vmul.f32 1.442695, %v2551_v59 }
 0x4ed   :  { %2601 = vadd.xlane.f32.xlu1 %v5112_v25 }
 0x4ee   :  { %3556 = vpow2.f32 %v2571_v54 }
 0x4f1   :  { %v2526_v43 = vpop.xlane.xlu2 %2525 }
 0x4f2   :  { %v2552_v11 = vsub.f32 %v5070_v37, %v2526_v43 }
 0x4f4   :  { %v5116_v12 = vpop.eup %3556  ;;  %v2573_v2 = vmul.f32 1.442695, %v2552_v11 }
 0x4f5   :  { %2603 = vadd.xlane.f32.xlu2 %v5116_v12 }
 0x4f6   :  { %3558 = vpow2.f32 %v2573_v2 }
 0x4f9   :  { %v2528_v49 = vpop.xlane.xlu0 %2527 }
 0x4fa   :  { %v2553_v14 = vsub.f32 %v5073_v61, %v2528_v49 }
 0x4fc   :  { %v5120_v62 = vpop.eup %3558  ;;  %v2575_v40 = vmul.f32 1.442695, %v2553_v14 }
 0x4fd   :  { %2605 = vadd.xlane.f32.xlu0 %v5120_v62 }
 0x4fe   :  { %3560 = vpow2.f32 %v2575_v40 }
 0x501   :  { %v2530_v28 = vpop.xlane.xlu1 %2529 }
 0x502   :  { %v2554_v39 = vsub.f32 %v5076_v1, %v2530_v28 }
 0x504   :  { %v5124_v50 = vpop.eup %3560  ;;  %v2577_v53 = vmul.f32 1.442695, %v2554_v39 }
 0x505   :  { %2607 = vadd.xlane.f32.xlu1 %v5124_v50 }
 0x506   :  { %3562 = vpow2.f32 %v2577_v53 }
 0x509   :  { %v2532_v46 = vpop.xlane.xlu2 %2531 }
 0x50a   :  { %v2555_v44 = vsub.f32 %v5079_v9, %v2532_v46 }
 0x50c   :  { %v5128_v16 = vpop.eup %3562  ;;  %v2579_v30 = vmul.f32 1.442695, %v2555_v44 }
 0x50d   :  { %2609 = vadd.xlane.f32.xlu2 %v5128_v16 }
 0x50e   :  { %3564 = vpow2.f32 %v2579_v30 }
 0x511   :  { %v2534_v60 = vpop.xlane.xlu0 %2533 }
 0x512   :  { %v2556_v15 = vsub.f32 %v5082_v7, %v2534_v60 }
 0x514   :  { %v5132_v31 = vpop.eup %3564  ;;  %v2581_v24 = vmul.f32 1.442695, %v2556_v15 }
 0x515   :  { %2611 = vadd.xlane.f32.xlu0 %v5132_v31 }
 0x516   :  { %3566 = vpow2.f32 %v2581_v24 }
 0x519   :  { %v2536_v35 = vpop.xlane.xlu1 %2535 }
 0x51a   :  { %v2557_v34 = vsub.f32 %v5085_v45, %v2536_v35 }
 0x51c   :  { %v5136_v32 = vpop.eup %3566  ;;  %v2583_v51 = vmul.f32 1.442695, %v2557_v34 }
 0x51d   :  { %2613 = vadd.xlane.f32.xlu1 %v5136_v32 }
 0x51e   :  { %3568 = vpow2.f32 %v2583_v51 }
 0x521   :  { %v2538_v37 = vpop.xlane.xlu2 %2537 }
 0x522   :  { %v2558_v63 = vsub.f32 %v5088_v10, %v2538_v37 }
 0x524   :  { %v5140_v61 = vpop.eup %3568  ;;  %v2585_v21 = vmul.f32 1.442695, %v2558_v63 }
 0x525   :  { %2615 = vadd.xlane.f32.xlu2 %v5140_v61 }
 0x526   :  { %3570 = vpow2.f32 %v2585_v21 }
 0x529   :  { %v2540_v1 = vpop.xlane.xlu0 %2539 }
 0x52a   :  { %v2559_v3 = vsub.f32 %v5091_v56, %v2540_v1 }
 0x52c   :  { %v5144_v9 = vpop.eup %3570  ;;  %v2587_v41 = vmul.f32 1.442695, %v2559_v3 }
 0x52d   :  { %2617 = vadd.xlane.f32.xlu0 %v5144_v9 }
 0x52e   :  { %3572 = vpow2.f32 %v2587_v41 }
 0x531   :  { %v2542_v7 = vpop.xlane.xlu1 %2541 }
 0x532   :  { %v2560_v29 = vsub.f32 %v5094_v52, %v2542_v7 }
 0x534   :  { %v5148_v45 = vpop.eup %3572  ;;  %v2589_v38 = vmul.f32 1.442695, %v2560_v29 }
 0x535   :  { %2619 = vadd.xlane.f32.xlu1 %v5148_v45 }
 0x536   :  { %3574 = vpow2.f32 %v2589_v38 }
 0x53c   :  { %v5151_v10 = vpop.eup %3574 }
 0x53d   :  { %2621 = vadd.xlane.f32.xlu2 %v5151_v10 }
 0x53f   :  { %v2544_v55 = vpop.xlane.xlu2 %2543 }
 0x540   :  { %v2561_v56 = vsub.f32 %v5097_v47, %v2544_v55 }
 0x542   :  { %v2591_v13 = vmul.f32 1.442695, %v2561_v56 }
 0x544   :  { %3576 = vpow2.f32 %v2591_v13 }
 0x547   :  { %v2546_v20 = vpop.xlane.xlu0 %2545 }
 0x548   :  { %v2562_v57 = vsub.f32 %v5100_v33, %v2546_v20  ;;  %v2596_v48 = vpop.xlane.xlu1 %2595 }
 0x549   :  { %3578 = vrcp.f32 %v2596_v48 }
 0x54a   :  { %v5156_v52 = vpop.eup %3576  ;;  %v2593_v58 = vmul.f32 1.442695, %v2562_v57 }
 0x54b   :  { %2623 = vadd.xlane.f32.xlu0 %v5156_v52 }
 0x54c   :  { %3580 = vpow2.f32 %v2593_v58 }
 0x54f   :  { %v3579_v36 = vpop.eup %3578 }
 0x550   :  { %v2643_v19 = vmul.f32 %v3579_v36, %v5102_v0  ;;  %v2598_v42 = vpop.xlane.xlu2 %2597 }
 0x551   :  { %3582 = vrcp.f32 %v2598_v42 }
 0x552   :  { %v5160_v18 = vpop.eup %3580  ;;  %2659 = vst [vmem:[%s5239_s13] sm:$0xff] %v2643_v19 }
 0x553   :  { %2625 = vadd.xlane.f32.xlu1 %v5160_v18 }
 0x557   :  { %v3583_v47 = vpop.eup %3582 }
 0x558   :  { %v2644_v33 = vmul.f32 %v3583_v47, %v5106_v23  ;;  %v2600_v27 = vpop.xlane.xlu0 %2599 }
 0x559   :  { %3584 = vrcp.f32 %v2600_v27 }
 0x55a   :  { %2660 = vst [vmem:[%s5239_s13 + $0x8] sm:$0xff] %v2644_v33 }
 0x55f   :  { %v3585_v0 = vpop.eup %3584 }
 0x560   :  { %v2645_v8 = vmul.f32 %v3585_v0, %v5109_v17  ;;  %v2602_v26 = vpop.xlane.xlu1 %2601 }
 0x561   :  { %3586 = vrcp.f32 %v2602_v26 }
 0x562   :  { %2661 = vst [vmem:[%s5239_s13 + $0x10] sm:$0xff] %v2645_v8 }
 0x567   :  { %v3587_v5 = vpop.eup %3586 }
 0x568   :  { %v2646_v4 = vmul.f32 %v3587_v5, %v5112_v25  ;;  %v2604_v22 = vpop.xlane.xlu2 %2603 }
 0x569   :  { %3588 = vrcp.f32 %v2604_v22 }
 0x56a   :  { %2662 = vst [vmem:[%s5239_s13 + $0x18] sm:$0xff] %v2646_v4 }
 0x56f   :  { %v3589_v23 = vpop.eup %3588 }
 0x570   :  { %v2647_v6 = vmul.f32 %v3589_v23, %v5116_v12  ;;  %v2606_v59 = vpop.xlane.xlu0 %2605 }
 0x571   :  { %3590 = vrcp.f32 %v2606_v59 }
 0x572   :  { %2663 = vst [vmem:[%s5239_s13 + $0x20] sm:$0xff] %v2647_v6 }
 0x577   :  { %v3591_v17 = vpop.eup %3590 }
 0x578   :  { %v2648_v54 = vmul.f32 %v3591_v17, %v5120_v62  ;;  %v2608_v43 = vpop.xlane.xlu1 %2607 }
 0x579   :  { %3592 = vrcp.f32 %v2608_v43 }
 0x57a   :  { %2664 = vst [vmem:[%s5239_s13 + $0x28] sm:$0xff] %v2648_v54 }
 0x57f   :  { %v3593_v25 = vpop.eup %3592 }
 0x580   :  { %v2649_v11 = vmul.f32 %v3593_v25, %v5124_v50  ;;  %v2610_v2 = vpop.xlane.xlu2 %2609 }
 0x581   :  { %3594 = vrcp.f32 %v2610_v2 }
 0x582   :  { %2665 = vst [vmem:[%s5239_s13 + $0x30] sm:$0xff] %v2649_v11 }
 0x587   :  { %v3595_v12 = vpop.eup %3594 }
 0x588   :  { %v2650_v49 = vmul.f32 %v3595_v12, %v5128_v16  ;;  %v2612_v14 = vpop.xlane.xlu0 %2611 }
 0x589   :  { %3596 = vrcp.f32 %v2612_v14 }
 0x58a   :  { %2666 = vst [vmem:[%s5239_s13 + $0x38] sm:$0xff] %v2650_v49 }
 0x58f   :  { %v3597_v62 = vpop.eup %3596 }
 0x590   :  { %v2651_v40 = vmul.f32 %v3597_v62, %v5132_v31  ;;  %v2614_v28 = vpop.xlane.xlu1 %2613 }
 0x591   :  { %3598 = vrcp.f32 %v2614_v28 }
 0x592   :  { %2667 = vst [vmem:[%s5239_s13 + $0x40] sm:$0xff] %v2651_v40 }
 0x597   :  { %v3599_v39 = vpop.eup %3598 }
 0x598   :  { %v2652_v50 = vmul.f32 %v3599_v39, %v5136_v32  ;;  %v2616_v53 = vpop.xlane.xlu2 %2615 }
 0x599   :  { %3600 = vrcp.f32 %v2616_v53 }
 0x59a   :  { %2668 = vst [vmem:[%s5239_s13 + $0x48] sm:$0xff] %v2652_v50 }
 0x59f   :  { %v3601_v46 = vpop.eup %3600 }
 0x5a0   :  { %v2653_v44 = vmul.f32 %v3601_v46, %v5140_v61  ;;  %v2618_v16 = vpop.xlane.xlu0 %2617 }
 0x5a1   :  { %3602 = vrcp.f32 %v2618_v16 }
 0x5a2   :  { %2669 = vst [vmem:[%s5239_s13 + $0x50] sm:$0xff] %v2653_v44 }
 0x5a7   :  { %v3603_v30 = vpop.eup %3602 }
 0x5a8   :  { %v2654_v60 = vmul.f32 %v3603_v30, %v5144_v9  ;;  %v2620_v15 = vpop.xlane.xlu1 %2619 }
 0x5a9   :  { %3604 = vrcp.f32 %v2620_v15 }
 0x5aa   :  { %2670 = vst [vmem:[%s5239_s13 + $0x58] sm:$0xff] %v2654_v60 }
 0x5af   :  { %v3605_v31 = vpop.eup %3604 }
 0x5b0   :  { %v2655_v24 = vmul.f32 %v3605_v31, %v5148_v45  ;;  %v2622_v35 = vpop.xlane.xlu2 %2621 }
 0x5b1   :  { %3606 = vrcp.f32 %v2622_v35 }
 0x5b2   :  { %2671 = vst [vmem:[%s5239_s13 + $0x60] sm:$0xff] %v2655_v24 }
 0x5b7   :  { %v3607_v34 = vpop.eup %3606 }
 0x5b8   :  { %v2656_v32 = vmul.f32 %v3607_v34, %v5151_v10 }
 0x5ba   :  { %2672 = vst [vmem:[%s5239_s13 + $0x68] sm:$0xff] %v2656_v32 }
 0x5be   :  { %v2624_v51 = vpop.xlane.xlu0 %2623 }
 0x5bf   :  { %3608 = vrcp.f32 %v2624_v51 }
 0x5c5   :  { %v3609_v37 = vpop.eup %3608 }
 0x5c6   :  { %v2657_v63 = vmul.f32 %v3609_v37, %v5156_v52  ;;  %v2626_v61 = vpop.xlane.xlu1 %2625 }
 0x5c7   :  { %3610 = vrcp.f32 %v2626_v61 }
 0x5c8   :  { %2673 = vst [vmem:[%s5239_s13 + $0x70] sm:$0xff] %v2657_v63 }
 0x5cd   :  { %v3611_v21 = vpop.eup %3610 }
 0x5ce   :  { %v2658_v1 = vmul.f32 %v3611_v21, %v5160_v18 }
 0x5d0   :  { %2674 = vst [vmem:[%s5239_s13 + $0x78] sm:$0xff] %v2658_v1 }

</bundles_post_ra>
